<compile_context>
chip_gen: v5e
topology: v5e:2x2
jax: 0.10.0
libtpu: 0.0.40
codegen_flags: <defaults>
</compile_context>

<pallas_src>
import functools

import jax
import jax.numpy as jnp
from jax import lax
from jax.experimental import pallas as pl
from jax.experimental.pallas import tpu as pltpu


def _elu(x):
    return jnp.where(x > 0, x, jnp.exp(jnp.minimum(x, 0.0)) - 1.0)


# ----------------------------------------------------------------------------
# Fully fused EMGNet kernel (single invocation, grid=()).
# ----------------------------------------------------------------------------
def emgnet_kernel(xp_ref, wcomb_ref, bcomb_ref, pool_ref, w3_ref, b3_ref,
                  w4_ref, b4_ref, w5mat_ref, b5_ref, wih_ref, blstm_ref,
                  whh_ref, w6_ref, b6_ref, w7_ref, b7_ref,
                  out_ref, hs_ref, *, F2, K1, K2, B, W, H, Lx, Lp):
    f32 = jnp.float32

    # ----- block1: temporal conv (1,K1) + grouped spatial conv (C,1) folded
    # into ONE MXU matmul against an in-register im2col slab.  xp is laid out
    # (C, N*Tc [+K1-1 tail zeros]) with per-window zero padding already baked
    # in, so the K1 shifted slices never mix adjacent windows.
    xp = xp_ref[...]                                            # (C, Lx+K1-1)
    xcol = jnp.concatenate([xp[:, k:k + Lx] for k in range(K1)], axis=0)
    z = _elu(jnp.dot(wcomb_ref[...], xcol, preferred_element_type=f32)
             + bcomb_ref[...])                                  # (F2, Lx)

    # ----- AvgPool(1,P) via a constant pooling matrix (MXU).  The result lands
    # in a per-window zero-padded layout (width Lp + K2 - 1) so block2's
    # temporal shifts stay inside each window.
    zpad = jnp.dot(z, pool_ref[...], preferred_element_type=f32)  # (F2, Lp+K2-1)

    # ----- block2: depthwise temporal conv (K2 shift-FMAs on the VPU),
    # then 1x1 conv (MXU) + ELU.
    w3 = w3_ref[...]                                            # (F2, K2)
    acc = jnp.zeros((F2, Lp), f32)
    for k in range(K2):
        acc = acc + w3[:, k:k + 1] * zpad[:, k:k + Lp]
    acc = acc + b3_ref[...]
    pw = _elu(jnp.dot(w4_ref[...], acc, preferred_element_type=f32)
              + b4_ref[...])                                    # (F2, Lp)

    # ----- Linear(T1 -> 1): masked per-window reduction folded into one lane-
    # dense MXU matmul (pw @ w5mat), producing (F2, N) feature vectors whose
    # columns are time-major (n = w*B + b).
    feat = (jnp.dot(pw, w5mat_ref[...], preferred_element_type=f32)
            + b5_ref[...])                                      # (F2, N)

    # ----- LSTM: input projection for ALL timesteps hoisted out of the loop.
    gates_in = (jnp.dot(wih_ref[...], feat, preferred_element_type=f32)
                + blstm_ref[...])                               # (4H, N)
    whh = whh_ref[...]                                          # (4H, H)

    h = jnp.zeros((H, B), f32)
    c = jnp.zeros((H, B), f32)
    for t in range(W):                # static unroll (W known at trace time)
        g = gates_in[:, t * B:(t + 1) * B] + jnp.dot(
            whh, h, preferred_element_type=f32)                 # (4H, B)
        sig = jax.nn.sigmoid(g)       # one full-tile EUP op covers i/f/o gates
        th = jnp.tanh(g)              # one full-tile EUP op covers the g gate
        # sublane-aligned 32-row gate slices (PyTorch order i, f, g, o)
        c = sig[H:2 * H, :] * c + sig[0:H, :] * th[2 * H:3 * H, :]
        h = sig[3 * H:4 * H, :] * jnp.tanh(c)
        hs_ref[:, t * B:(t + 1) * B] = h                        # collect h_t

    # ----- classifier hoisted out of the recurrence: one pass over the full
    # (H, N) hidden-state slab (lane-denser matmuls, single output store).
    # Linear -> LeakyReLU(0.05) -> Linear -> LogSoftmax (over classes).
    hs = hs_ref[...]                                            # (H, N)
    z1 = jnp.dot(w6_ref[...], hs, preferred_element_type=f32) + b6_ref[...]
    z1 = jnp.where(z1 > 0, z1, 0.05 * z1)
    z2 = jnp.dot(w7_ref[...], z1, preferred_element_type=f32) + b7_ref[...]
    m = jnp.max(z2, axis=0, keepdims=True)
    lse = m + jnp.log(jnp.sum(jnp.exp(z2 - m), axis=0, keepdims=True))
    out_ref[...] = z2 - lse                                     # (NC, N)


# ----------------------------------------------------------------------------
# One-time parameter folding / constant-matrix construction.
# ----------------------------------------------------------------------------
def prepare_params(p, cfg):
    F1, D = cfg['F1'], cfg['D']
    C, T, P = cfg['C'], cfg['T'], cfg['P']
    K1, K2 = cfg['K1'], cfg['K2']
    B, W = cfg['B'], cfg['W']
    F2 = F1 * D
    T1 = T // P
    N = B * W
    assert K1 % 2 == 1 and K2 % 2 == 1 and T % P == 0
    pad1, pad2 = K1 // 2, K2 // 2
    Tc = T + 2 * pad1                 # per-window padded length for block1
    Tp2 = T1 + 2 * pad2               # per-window padded length for block2
    f32 = jnp.float32

    # Fold temporal conv (w1) and grouped spatial conv (w2) into one weight;
    # slab rows are ordered (k, c) to match the in-kernel im2col concat.
    grp = jnp.arange(F2) // D
    w1g = p['w1'][grp]                                           # (F2, K1)
    wcomb = (w1g[:, :, None] * p['w2'][:, None, :]).reshape(F2, K1 * C)
    bcomb = (p['b1'][grp] * jnp.sum(p['w2'], axis=1) + p['b2'])[:, None]

    # AvgPool matrix: conv-output column (n*Tc + t1*P + p) -> padded pooled
    # column (n*Tp2 + t1 + 2*pad2), averaging P samples.
    n_i = jnp.arange(N)[:, None, None]
    t1_i = jnp.arange(T1)[None, :, None]
    p_i = jnp.arange(P)[None, None, :]
    rows = (n_i * Tc + t1_i * P + p_i).reshape(-1)
    cols = jnp.broadcast_to(n_i * Tp2 + t1_i + 2 * pad2, (N, T1, P)).reshape(-1)
    pool = jnp.zeros((N * Tc, N * Tp2 + 2 * pad2), f32).at[rows, cols].set(1.0 / P)

    # Linear(T1 -> 1) as a masked per-window reduction matrix (Lp, N).
    rows5 = (jnp.arange(N)[:, None] * Tp2 + pad2 + jnp.arange(T1)[None, :]).reshape(-1)
    cols5 = jnp.repeat(jnp.arange(N), T1)
    vals5 = jnp.tile(p['w5'][0], N)
    w5mat = jnp.zeros((N * Tp2, N), f32).at[rows5, cols5].set(vals5)

    return dict(
        wcomb=wcomb.astype(f32), bcomb=bcomb.astype(f32), pool=pool,
        w3=p['w3'].astype(f32), b3=p['b3'][:, None].astype(f32),
        w4=p['w4'].astype(f32), b4=p['b4'][:, None].astype(f32),
        w5mat=w5mat, b5=p['b5'].reshape(1, 1).astype(f32),
        wih=p['wih'].astype(f32),
        blstm=(p['bih'] + p['bhh'])[:, None].astype(f32),
        whh=p['whh'].astype(f32),
        w6=p['w6'].astype(f32), b6=p['b6'][:, None].astype(f32),
        w7=p['w7'].astype(f32), b7=p['b7'][:, None].astype(f32),
    )


# ----------------------------------------------------------------------------
# Forward: tiny input relayout + single pallas_call + tiny output relayout.
# ----------------------------------------------------------------------------
def emgnet_forward(x, prep, cfg):
    B, W, C, T = x.shape
    F1, D, P = cfg['F1'], cfg['D'], cfg['P']
    K1, K2 = cfg['K1'], cfg['K2']
    H, NC = cfg['H'], cfg['NC']
    F2 = F1 * D
    T1 = T // P
    N = B * W
    pad1, pad2 = K1 // 2, K2 // 2
    Tc = T + 2 * pad1
    Tp2 = T1 + 2 * pad2
    Lx = N * Tc
    Lp = N * Tp2

    # Time-major window order (n = w*B + b); per-window zero padding baked into
    # the layout so in-kernel temporal shifts never cross window boundaries.
    xpad = jnp.pad(x.astype(jnp.float32),
                   ((0, 0), (0, 0), (0, 0), (pad1, pad1)))       # (B, W, C, Tc)
    xp = jnp.transpose(xpad, (2, 1, 0, 3)).reshape(C, Lx)
    xp = jnp.pad(xp, ((0, 0), (0, K1 - 1)))                      # tail for slices

    kernel = functools.partial(
        emgnet_kernel, F2=F2, K1=K1, K2=K2, B=B, W=W, H=H, Lx=Lx, Lp=Lp)

    vmem = pl.BlockSpec(memory_space=pltpu.MemorySpace.VMEM)
    out = pl.pallas_call(
        kernel,
        out_shape=jax.ShapeDtypeStruct((NC, N), jnp.float32),
        in_specs=[vmem] * 17,
        out_specs=vmem,
        scratch_shapes=[pltpu.VMEM((H, N), jnp.float32)],
    )(xp, prep['wcomb'], prep['bcomb'], prep['pool'], prep['w3'], prep['b3'],
      prep['w4'], prep['b4'], prep['w5mat'], prep['b5'], prep['wih'],
      prep['blstm'], prep['whh'], prep['w6'], prep['b6'], prep['w7'],
      prep['b7'])

    # (NC, N) with columns n = w*B + b  ->  (B, W, NC)
    return jnp.transpose(out.reshape(NC, W, B), (2, 1, 0))


def init_params(key, *, F1, D, C, T, P, K1, K2, H, NC):
    F2 = F1 * D
    T1 = T // P
    shapes = {
        'w1': (F1, K1), 'b1': (F1,),
        'w2': (F2, C), 'b2': (F2,),
        'w3': (F2, K2), 'b3': (F2,),
        'w4': (F2, F2), 'b4': (F2,),
        'w5': (1, T1), 'b5': (1,),
        'wih': (4 * H, F2), 'whh': (4 * H, H), 'bih': (4 * H,), 'bhh': (4 * H,),
        'w6': (H, H), 'b6': (H,),
        'w7': (NC, H), 'b7': (NC,),
    }
    keys = jax.random.split(key, len(shapes))
    return {name: jax.random.uniform(k, shp, jnp.float32, -0.2, 0.2)
            for k, (name, shp) in zip(keys, shapes.items())}


# Pure-JAX reference (independent implementation) for validation.
def reference_forward(x, p, cfg):
    B, W, C, T = x.shape
    F1, D, P = cfg['F1'], cfg['D'], cfg['P']
    F2 = F1 * D
    K1, K2 = cfg['K1'], cfg['K2']
    T1 = T // P
    H = cfg['H']
    dn = ('NCHW', 'OIHW', 'NCHW')
    hp = lax.Precision.HIGHEST

    y = x.reshape(B * W, 1, C, T)
    y = lax.conv_general_dilated(y, p['w1'].reshape(F1, 1, 1, K1), (1, 1),
                                 ((0, 0), (K1 // 2, K1 // 2)),
                                 dimension_numbers=dn, precision=hp)
    y = y + p['b1'].reshape(1, F1, 1, 1)
    y = lax.conv_general_dilated(y, p['w2'].reshape(F2, 1, C, 1), (1, 1),
                                 ((0, 0), (0, 0)), dimension_numbers=dn,
                                 feature_group_count=F1, precision=hp)
    y = jax.nn.elu(y + p['b2'].reshape(1, F2, 1, 1))
    y = y.reshape(B * W, F2, 1, T1, P).mean(-1)
    y = lax.conv_general_dilated(y, p['w3'].reshape(F2, 1, 1, K2), (1, 1),
                                 ((0, 0), (K2 // 2, K2 // 2)),
                                 dimension_numbers=dn,
                                 feature_group_count=F2, precision=hp)
    y = y + p['b3'].reshape(1, F2, 1, 1)
    y = lax.conv_general_dilated(y, p['w4'].reshape(F2, F2, 1, 1), (1, 1),
                                 ((0, 0), (0, 0)), dimension_numbers=dn,
                                 precision=hp)
    y = jax.nn.elu(y + p['b4'].reshape(1, F2, 1, 1))
    y = y.reshape(B * W, F2, T1)
    y = jnp.einsum('nft,t->nf', y, p['w5'][0], precision=hp) + p['b5'][0]
    feats = y.reshape(B, W, F2)

    def step(carry, x_t):
        h, c = carry
        gates = x_t @ p['wih'].T + h @ p['whh'].T + p['bih'] + p['bhh']
        i, f, g, o = jnp.split(gates, 4, axis=-1)
        c = jax.nn.sigmoid(f) * c + jax.nn.sigmoid(i) * jnp.tanh(g)
        h = jax.nn.sigmoid(o) * jnp.tanh(c)
        return (h, c), h

    h0 = jnp.zeros((B, H), jnp.float32)
    _, hs = lax.scan(step, (h0, h0), jnp.transpose(feats, (1, 0, 2)))
    hs = jnp.transpose(hs, (1, 0, 2))
    z = hs @ p['w6'].T + p['b6']
    z = jnp.where(z > 0, z, 0.05 * z)
    z = z @ p['w7'].T + p['b7']
    return jax.nn.log_softmax(z, axis=-1)


if __name__ == "__main__":
    # small shapes consistent with the module (num_chans=8, window_length=32,
    # num_windows=4, effective_fs=80 -> temporal kernel K1=9)
    B, Wn, C, T = 2, 4, 8, 32
    F1, D, P = 8, 2, 4
    effective_fs = 80.0
    K1 = int(0.1 * effective_fs) + 1            # 9
    K2 = 2 * (T // (P * 2)) + 1                 # 9
    H, NC = 32, 6
    cfg = dict(F1=F1, D=D, P=P, K1=K1, K2=K2, H=H, NC=NC, C=C, T=T, B=B, W=Wn)

    key = jax.random.PRNGKey(0)
    kx, kp = jax.random.split(key)
    x = jax.random.normal(kx, (B, Wn, C, T), jnp.float32)
    params = init_params(kp, F1=F1, D=D, C=C, T=T, P=P, K1=K1, K2=K2, H=H, NC=NC)

    prep = prepare_params(params, cfg)          # one-time parameter folding
    fwd = jax.jit(functools.partial(emgnet_forward, cfg=cfg))

    out = jax.block_until_ready(fwd(x, prep))

    ref = reference_forward(x, params, cfg)
    assert out.shape == (B, Wn, NC)
    assert bool(jnp.all(jnp.isfinite(out)))
    assert bool(jnp.allclose(jnp.sum(jnp.exp(out), axis=-1), 1.0, atol=1e-3))
    assert bool(jnp.allclose(out, ref, atol=5e-2, rtol=5e-2))
    print("KERNEL_OK")
</pallas_src>

<mosaic_0001>
module attributes {stable_mosaic.version = 11 : i64} {
  func.func @emgnet_kernel(%arg0: memref<8x328xf32, #tpu.memory_space<vmem>>, %arg1: memref<16x72xf32, #tpu.memory_space<vmem>>, %arg2: memref<16x1xf32, #tpu.memory_space<vmem>>, %arg3: memref<320x136xf32, #tpu.memory_space<vmem>>, %arg4: memref<16x9xf32, #tpu.memory_space<vmem>>, %arg5: memref<16x1xf32, #tpu.memory_space<vmem>>, %arg6: memref<16x16xf32, #tpu.memory_space<vmem>>, %arg7: memref<16x1xf32, #tpu.memory_space<vmem>>, %arg8: memref<128x8xf32, #tpu.memory_space<vmem>>, %arg9: memref<1x1xf32, #tpu.memory_space<vmem>>, %arg10: memref<128x16xf32, #tpu.memory_space<vmem>>, %arg11: memref<128x1xf32, #tpu.memory_space<vmem>>, %arg12: memref<128x32xf32, #tpu.memory_space<vmem>>, %arg13: memref<32x32xf32, #tpu.memory_space<vmem>>, %arg14: memref<32x1xf32, #tpu.memory_space<vmem>>, %arg15: memref<6x32xf32, #tpu.memory_space<vmem>>, %arg16: memref<6x1xf32, #tpu.memory_space<vmem>>, %arg17: memref<6x8xf32, #tpu.memory_space<vmem>>, %arg18: memref<32x8xf32, #tpu.memory_space<vmem>>) attributes {dimension_semantics = [], scalar_prefetch = 0 : i64, scratch_operands = 1 : i64, tpu.core_type = #tpu.core_type<tc>} {
    %c0 = arith.constant 0 : index
    %c0_0 = arith.constant 0 : index
    %0 = vector.load %arg0[%c0, %c0_0] : memref<8x328xf32, #tpu.memory_space<vmem>>, vector<8x328xf32>
    %1 = vector.extract_strided_slice %0 {offsets = [0, 0], sizes = [8, 320], strides = [1, 1]} : vector<8x328xf32> to vector<8x320xf32>
    %2 = vector.extract_strided_slice %0 {offsets = [0, 1], sizes = [8, 320], strides = [1, 1]} : vector<8x328xf32> to vector<8x320xf32>
    %3 = vector.extract_strided_slice %0 {offsets = [0, 2], sizes = [8, 320], strides = [1, 1]} : vector<8x328xf32> to vector<8x320xf32>
    %4 = vector.extract_strided_slice %0 {offsets = [0, 3], sizes = [8, 320], strides = [1, 1]} : vector<8x328xf32> to vector<8x320xf32>
    %5 = vector.extract_strided_slice %0 {offsets = [0, 4], sizes = [8, 320], strides = [1, 1]} : vector<8x328xf32> to vector<8x320xf32>
    %6 = vector.extract_strided_slice %0 {offsets = [0, 5], sizes = [8, 320], strides = [1, 1]} : vector<8x328xf32> to vector<8x320xf32>
    %7 = vector.extract_strided_slice %0 {offsets = [0, 6], sizes = [8, 320], strides = [1, 1]} : vector<8x328xf32> to vector<8x320xf32>
    %8 = vector.extract_strided_slice %0 {offsets = [0, 7], sizes = [8, 320], strides = [1, 1]} : vector<8x328xf32> to vector<8x320xf32>
    %9 = vector.extract_strided_slice %0 {offsets = [0, 8], sizes = [8, 320], strides = [1, 1]} : vector<8x328xf32> to vector<8x320xf32>
    %10 = tpu.concatenate %1, %2, %3, %4, %5, %6, %7, %8, %9 in 0 : vector<8x320xf32>, vector<8x320xf32>, vector<8x320xf32>, vector<8x320xf32>, vector<8x320xf32>, vector<8x320xf32>, vector<8x320xf32>, vector<8x320xf32>, vector<8x320xf32> -> vector<72x320xf32>
    %c0_1 = arith.constant 0 : index
    %c0_2 = arith.constant 0 : index
    %11 = vector.load %arg1[%c0_1, %c0_2] : memref<16x72xf32, #tpu.memory_space<vmem>>, vector<16x72xf32>
    %cst = arith.constant dense<0.000000e+00> : vector<16x320xf32>
    %12 = tpu.matmul %11, %10, %cst {dimension_numbers = #tpu.dot_dimension_numbers<[1], [0], [0], [1], [0, 0, 1, 1], [], []>} : vector<16x72xf32>, vector<72x320xf32>, vector<16x320xf32> -> vector<16x320xf32>
    %c0_3 = arith.constant 0 : index
    %c0_4 = arith.constant 0 : index
    %13 = vector.load %arg2[%c0_3, %c0_4] : memref<16x1xf32, #tpu.memory_space<vmem>>, vector<16x1xf32>
    %14 = vector.broadcast %13 : vector<16x1xf32> to vector<16x320xf32>
    %15 = arith.addf %12, %14 : vector<16x320xf32>
    %cst_5 = arith.constant 0.000000e+00 : f32
    %16 = vector.broadcast %cst_5 : f32 to vector<16x320xf32>
    %17 = arith.cmpf ogt, %15, %16 : vector<16x320xf32>
    %cst_6 = arith.constant 0.000000e+00 : f32
    %18 = vector.broadcast %cst_6 : f32 to vector<16x320xf32>
    %19 = arith.minimumf %15, %18 : vector<16x320xf32>
    %20 = math.exp %19 : vector<16x320xf32>
    %cst_7 = arith.constant 1.000000e+00 : f32
    %21 = vector.broadcast %cst_7 : f32 to vector<16x320xf32>
    %22 = arith.subf %20, %21 : vector<16x320xf32>
    %23 = arith.select %17, %15, %22 : vector<16x320xi1>, vector<16x320xf32>
    %c0_8 = arith.constant 0 : index
    %c0_9 = arith.constant 0 : index
    %24 = vector.load %arg3[%c0_8, %c0_9] : memref<320x136xf32, #tpu.memory_space<vmem>>, vector<320x136xf32>
    %cst_10 = arith.constant dense<0.000000e+00> : vector<16x136xf32>
    %25 = tpu.matmul %23, %24, %cst_10 {dimension_numbers = #tpu.dot_dimension_numbers<[1], [0], [0], [1], [0, 0, 1, 1], [], []>} : vector<16x320xf32>, vector<320x136xf32>, vector<16x136xf32> -> vector<16x136xf32>
    %c0_11 = arith.constant 0 : index
    %c0_12 = arith.constant 0 : index
    %26 = vector.load %arg4[%c0_11, %c0_12] : memref<16x9xf32, #tpu.memory_space<vmem>>, vector<16x9xf32>
    %cst_13 = arith.constant 0.000000e+00 : f32
    %27 = vector.broadcast %cst_13 : f32 to vector<16x128xf32>
    %28 = vector.extract_strided_slice %26 {offsets = [0, 0], sizes = [16, 1], strides = [1, 1]} : vector<16x9xf32> to vector<16x1xf32>
    %29 = vector.extract_strided_slice %25 {offsets = [0, 0], sizes = [16, 128], strides = [1, 1]} : vector<16x136xf32> to vector<16x128xf32>
    %30 = vector.broadcast %28 : vector<16x1xf32> to vector<16x128xf32>
    %31 = arith.mulf %30, %29 : vector<16x128xf32>
    %32 = arith.addf %27, %31 : vector<16x128xf32>
    %33 = vector.extract_strided_slice %26 {offsets = [0, 1], sizes = [16, 1], strides = [1, 1]} : vector<16x9xf32> to vector<16x1xf32>
    %34 = vector.extract_strided_slice %25 {offsets = [0, 1], sizes = [16, 128], strides = [1, 1]} : vector<16x136xf32> to vector<16x128xf32>
    %35 = vector.broadcast %33 : vector<16x1xf32> to vector<16x128xf32>
    %36 = arith.mulf %35, %34 : vector<16x128xf32>
    %37 = arith.addf %32, %36 : vector<16x128xf32>
    %38 = vector.extract_strided_slice %26 {offsets = [0, 2], sizes = [16, 1], strides = [1, 1]} : vector<16x9xf32> to vector<16x1xf32>
    %39 = vector.extract_strided_slice %25 {offsets = [0, 2], sizes = [16, 128], strides = [1, 1]} : vector<16x136xf32> to vector<16x128xf32>
    %40 = vector.broadcast %38 : vector<16x1xf32> to vector<16x128xf32>
    %41 = arith.mulf %40, %39 : vector<16x128xf32>
    %42 = arith.addf %37, %41 : vector<16x128xf32>
    %43 = vector.extract_strided_slice %26 {offsets = [0, 3], sizes = [16, 1], strides = [1, 1]} : vector<16x9xf32> to vector<16x1xf32>
    %44 = vector.extract_strided_slice %25 {offsets = [0, 3], sizes = [16, 128], strides = [1, 1]} : vector<16x136xf32> to vector<16x128xf32>
    %45 = vector.broadcast %43 : vector<16x1xf32> to vector<16x128xf32>
    %46 = arith.mulf %45, %44 : vector<16x128xf32>
    %47 = arith.addf %42, %46 : vector<16x128xf32>
    %48 = vector.extract_strided_slice %26 {offsets = [0, 4], sizes = [16, 1], strides = [1, 1]} : vector<16x9xf32> to vector<16x1xf32>
    %49 = vector.extract_strided_slice %25 {offsets = [0, 4], sizes = [16, 128], strides = [1, 1]} : vector<16x136xf32> to vector<16x128xf32>
    %50 = vector.broadcast %48 : vector<16x1xf32> to vector<16x128xf32>
    %51 = arith.mulf %50, %49 : vector<16x128xf32>
    %52 = arith.addf %47, %51 : vector<16x128xf32>
    %53 = vector.extract_strided_slice %26 {offsets = [0, 5], sizes = [16, 1], strides = [1, 1]} : vector<16x9xf32> to vector<16x1xf32>
    %54 = vector.extract_strided_slice %25 {offsets = [0, 5], sizes = [16, 128], strides = [1, 1]} : vector<16x136xf32> to vector<16x128xf32>
    %55 = vector.broadcast %53 : vector<16x1xf32> to vector<16x128xf32>
    %56 = arith.mulf %55, %54 : vector<16x128xf32>
    %57 = arith.addf %52, %56 : vector<16x128xf32>
    %58 = vector.extract_strided_slice %26 {offsets = [0, 6], sizes = [16, 1], strides = [1, 1]} : vector<16x9xf32> to vector<16x1xf32>
    %59 = vector.extract_strided_slice %25 {offsets = [0, 6], sizes = [16, 128], strides = [1, 1]} : vector<16x136xf32> to vector<16x128xf32>
    %60 = vector.broadcast %58 : vector<16x1xf32> to vector<16x128xf32>
    %61 = arith.mulf %60, %59 : vector<16x128xf32>
    %62 = arith.addf %57, %61 : vector<16x128xf32>
    %63 = vector.extract_strided_slice %26 {offsets = [0, 7], sizes = [16, 1], strides = [1, 1]} : vector<16x9xf32> to vector<16x1xf32>
    %64 = vector.extract_strided_slice %25 {offsets = [0, 7], sizes = [16, 128], strides = [1, 1]} : vector<16x136xf32> to vector<16x128xf32>
    %65 = vector.broadcast %63 : vector<16x1xf32> to vector<16x128xf32>
    %66 = arith.mulf %65, %64 : vector<16x128xf32>
    %67 = arith.addf %62, %66 : vector<16x128xf32>
    %68 = vector.extract_strided_slice %26 {offsets = [0, 8], sizes = [16, 1], strides = [1, 1]} : vector<16x9xf32> to vector<16x1xf32>
    %69 = vector.extract_strided_slice %25 {offsets = [0, 8], sizes = [16, 128], strides = [1, 1]} : vector<16x136xf32> to vector<16x128xf32>
    %70 = vector.broadcast %68 : vector<16x1xf32> to vector<16x128xf32>
    %71 = arith.mulf %70, %69 : vector<16x128xf32>
    %72 = arith.addf %67, %71 : vector<16x128xf32>
    %c0_14 = arith.constant 0 : index
    %c0_15 = arith.constant 0 : index
    %73 = vector.load %arg5[%c0_14, %c0_15] : memref<16x1xf32, #tpu.memory_space<vmem>>, vector<16x1xf32>
    %74 = vector.broadcast %73 : vector<16x1xf32> to vector<16x128xf32>
    %75 = arith.addf %72, %74 : vector<16x128xf32>
    %c0_16 = arith.constant 0 : index
    %c0_17 = arith.constant 0 : index
    %76 = vector.load %arg6[%c0_16, %c0_17] : memref<16x16xf32, #tpu.memory_space<vmem>>, vector<16x16xf32>
    %cst_18 = arith.constant dense<0.000000e+00> : vector<16x128xf32>
    %77 = tpu.matmul %76, %75, %cst_18 {dimension_numbers = #tpu.dot_dimension_numbers<[1], [0], [0], [1], [0, 0, 1, 1], [], []>} : vector<16x16xf32>, vector<16x128xf32>, vector<16x128xf32> -> vector<16x128xf32>
    %c0_19 = arith.constant 0 : index
    %c0_20 = arith.constant 0 : index
    %78 = vector.load %arg7[%c0_19, %c0_20] : memref<16x1xf32, #tpu.memory_space<vmem>>, vector<16x1xf32>
    %79 = vector.broadcast %78 : vector<16x1xf32> to vector<16x128xf32>
    %80 = arith.addf %77, %79 : vector<16x128xf32>
    %cst_21 = arith.constant 0.000000e+00 : f32
    %81 = vector.broadcast %cst_21 : f32 to vector<16x128xf32>
    %82 = arith.cmpf ogt, %80, %81 : vector<16x128xf32>
    %cst_22 = arith.constant 0.000000e+00 : f32
    %83 = vector.broadcast %cst_22 : f32 to vector<16x128xf32>
    %84 = arith.minimumf %80, %83 : vector<16x128xf32>
    %85 = math.exp %84 : vector<16x128xf32>
    %cst_23 = arith.constant 1.000000e+00 : f32
    %86 = vector.broadcast %cst_23 : f32 to vector<16x128xf32>
    %87 = arith.subf %85, %86 : vector<16x128xf32>
    %88 = arith.select %82, %80, %87 : vector<16x128xi1>, vector<16x128xf32>
    %c0_24 = arith.constant 0 : index
    %c0_25 = arith.constant 0 : index
    %89 = vector.load %arg8[%c0_24, %c0_25] : memref<128x8xf32, #tpu.memory_space<vmem>>, vector<128x8xf32>
    %cst_26 = arith.constant dense<0.000000e+00> : vector<16x8xf32>
    %90 = tpu.matmul %88, %89, %cst_26 {dimension_numbers = #tpu.dot_dimension_numbers<[1], [0], [0], [1], [0, 0, 1, 1], [], []>} : vector<16x128xf32>, vector<128x8xf32>, vector<16x8xf32> -> vector<16x8xf32>
    %c0_27 = arith.constant 0 : index
    %c0_28 = arith.constant 0 : index
    %91 = vector.load %arg9[%c0_27, %c0_28] : memref<1x1xf32, #tpu.memory_space<vmem>>, vector<1x1xf32>
    %92 = vector.broadcast %91 : vector<1x1xf32> to vector<16x8xf32>
    %93 = arith.addf %90, %92 : vector<16x8xf32>
    %c0_29 = arith.constant 0 : index
    %c0_30 = arith.constant 0 : index
    %94 = vector.load %arg10[%c0_29, %c0_30] : memref<128x16xf32, #tpu.memory_space<vmem>>, vector<128x16xf32>
    %cst_31 = arith.constant dense<0.000000e+00> : vector<128x8xf32>
    %95 = tpu.matmul %94, %93, %cst_31 {dimension_numbers = #tpu.dot_dimension_numbers<[1], [0], [0], [1], [0, 0, 1, 1], [], []>} : vector<128x16xf32>, vector<16x8xf32>, vector<128x8xf32> -> vector<128x8xf32>
    %c0_32 = arith.constant 0 : index
    %c0_33 = arith.constant 0 : index
    %96 = vector.load %arg11[%c0_32, %c0_33] : memref<128x1xf32, #tpu.memory_space<vmem>>, vector<128x1xf32>
    %97 = vector.broadcast %96 : vector<128x1xf32> to vector<128x8xf32>
    %98 = arith.addf %95, %97 : vector<128x8xf32>
    %c0_34 = arith.constant 0 : index
    %c0_35 = arith.constant 0 : index
    %99 = vector.load %arg12[%c0_34, %c0_35] : memref<128x32xf32, #tpu.memory_space<vmem>>, vector<128x32xf32>
    %cst_36 = arith.constant 0.000000e+00 : f32
    %100 = vector.broadcast %cst_36 : f32 to vector<32x2xf32>
    %cst_37 = arith.constant 0.000000e+00 : f32
    %101 = vector.broadcast %cst_37 : f32 to vector<32x2xf32>
    %102 = vector.extract_strided_slice %98 {offsets = [0, 0], sizes = [128, 2], strides = [1, 1]} : vector<128x8xf32> to vector<128x2xf32>
    %cst_38 = arith.constant dense<0.000000e+00> : vector<128x2xf32>
    %103 = tpu.matmul %99, %100, %cst_38 {dimension_numbers = #tpu.dot_dimension_numbers<[1], [0], [0], [1], [0, 0, 1, 1], [], []>} : vector<128x32xf32>, vector<32x2xf32>, vector<128x2xf32> -> vector<128x2xf32>
    %104 = arith.addf %102, %103 : vector<128x2xf32>
    %105 = arith.negf %104 : vector<128x2xf32>
    %106 = math.exp %105 : vector<128x2xf32>
    %cst_39 = arith.constant 1.000000e+00 : f32
    %107 = vector.broadcast %cst_39 : f32 to vector<128x2xf32>
    %108 = arith.addf %107, %106 : vector<128x2xf32>
    %109 = arith.divf %107, %108 : vector<128x2xf32>
    %110 = math.tanh %104 : vector<128x2xf32>
    %111 = vector.extract_strided_slice %109 {offsets = [32, 0], sizes = [32, 2], strides = [1, 1]} : vector<128x2xf32> to vector<32x2xf32>
    %112 = arith.mulf %111, %101 : vector<32x2xf32>
    %113 = vector.extract_strided_slice %109 {offsets = [0, 0], sizes = [32, 2], strides = [1, 1]} : vector<128x2xf32> to vector<32x2xf32>
    %114 = vector.extract_strided_slice %110 {offsets = [64, 0], sizes = [32, 2], strides = [1, 1]} : vector<128x2xf32> to vector<32x2xf32>
    %115 = arith.mulf %113, %114 : vector<32x2xf32>
    %116 = arith.addf %112, %115 : vector<32x2xf32>
    %117 = vector.extract_strided_slice %109 {offsets = [96, 0], sizes = [32, 2], strides = [1, 1]} : vector<128x2xf32> to vector<32x2xf32>
    %118 = math.tanh %116 : vector<32x2xf32>
    %119 = arith.mulf %117, %118 : vector<32x2xf32>
    %c0_40 = arith.constant 0 : index
    %c0_41 = arith.constant 0 : index
    %120 = vector.load %arg18[%c0_40, %c0_41] : memref<32x8xf32, #tpu.memory_space<vmem>>, vector<32x2xf32>
    tpu.vector_store %arg18[%c0_40, %c0_41], %119 {strides = array<i32>} : memref<32x8xf32, #tpu.memory_space<vmem>>, vector<32x2xf32>,
    %121 = vector.extract_strided_slice %98 {offsets = [0, 2], sizes = [128, 2], strides = [1, 1]} : vector<128x8xf32> to vector<128x2xf32>
    %cst_42 = arith.constant dense<0.000000e+00> : vector<128x2xf32>
    %122 = tpu.matmul %99, %119, %cst_42 {dimension_numbers = #tpu.dot_dimension_numbers<[1], [0], [0], [1], [0, 0, 1, 1], [], []>} : vector<128x32xf32>, vector<32x2xf32>, vector<128x2xf32> -> vector<128x2xf32>
    %123 = arith.addf %121, %122 : vector<128x2xf32>
    %124 = arith.negf %123 : vector<128x2xf32>
    %125 = math.exp %124 : vector<128x2xf32>
    %cst_43 = arith.constant 1.000000e+00 : f32
    %126 = vector.broadcast %cst_43 : f32 to vector<128x2xf32>
    %127 = arith.addf %126, %125 : vector<128x2xf32>
    %128 = arith.divf %126, %127 : vector<128x2xf32>
    %129 = math.tanh %123 : vector<128x2xf32>
    %130 = vector.extract_strided_slice %128 {offsets = [32, 0], sizes = [32, 2], strides = [1, 1]} : vector<128x2xf32> to vector<32x2xf32>
    %131 = arith.mulf %130, %116 : vector<32x2xf32>
    %132 = vector.extract_strided_slice %128 {offsets = [0, 0], sizes = [32, 2], strides = [1, 1]} : vector<128x2xf32> to vector<32x2xf32>
    %133 = vector.extract_strided_slice %129 {offsets = [64, 0], sizes = [32, 2], strides = [1, 1]} : vector<128x2xf32> to vector<32x2xf32>
    %134 = arith.mulf %132, %133 : vector<32x2xf32>
    %135 = arith.addf %131, %134 : vector<32x2xf32>
    %136 = vector.extract_strided_slice %128 {offsets = [96, 0], sizes = [32, 2], strides = [1, 1]} : vector<128x2xf32> to vector<32x2xf32>
    %137 = math.tanh %135 : vector<32x2xf32>
    %138 = arith.mulf %136, %137 : vector<32x2xf32>
    %c0_44 = arith.constant 0 : index
    %c2 = arith.constant 2 : index
    %139 = vector.load %arg18[%c0_44, %c2] : memref<32x8xf32, #tpu.memory_space<vmem>>, vector<32x2xf32>
    tpu.vector_store %arg18[%c0_44, %c2], %138 {strides = array<i32>} : memref<32x8xf32, #tpu.memory_space<vmem>>, vector<32x2xf32>,
    %140 = vector.extract_strided_slice %98 {offsets = [0, 4], sizes = [128, 2], strides = [1, 1]} : vector<128x8xf32> to vector<128x2xf32>
    %cst_45 = arith.constant dense<0.000000e+00> : vector<128x2xf32>
    %141 = tpu.matmul %99, %138, %cst_45 {dimension_numbers = #tpu.dot_dimension_numbers<[1], [0], [0], [1], [0, 0, 1, 1], [], []>} : vector<128x32xf32>, vector<32x2xf32>, vector<128x2xf32> -> vector<128x2xf32>
    %142 = arith.addf %140, %141 : vector<128x2xf32>
    %143 = arith.negf %142 : vector<128x2xf32>
    %144 = math.exp %143 : vector<128x2xf32>
    %cst_46 = arith.constant 1.000000e+00 : f32
    %145 = vector.broadcast %cst_46 : f32 to vector<128x2xf32>
    %146 = arith.addf %145, %144 : vector<128x2xf32>
    %147 = arith.divf %145, %146 : vector<128x2xf32>
    %148 = math.tanh %142 : vector<128x2xf32>
    %149 = vector.extract_strided_slice %147 {offsets = [32, 0], sizes = [32, 2], strides = [1, 1]} : vector<128x2xf32> to vector<32x2xf32>
    %150 = arith.mulf %149, %135 : vector<32x2xf32>
    %151 = vector.extract_strided_slice %147 {offsets = [0, 0], sizes = [32, 2], strides = [1, 1]} : vector<128x2xf32> to vector<32x2xf32>
    %152 = vector.extract_strided_slice %148 {offsets = [64, 0], sizes = [32, 2], strides = [1, 1]} : vector<128x2xf32> to vector<32x2xf32>
    %153 = arith.mulf %151, %152 : vector<32x2xf32>
    %154 = arith.addf %150, %153 : vector<32x2xf32>
    %155 = vector.extract_strided_slice %147 {offsets = [96, 0], sizes = [32, 2], strides = [1, 1]} : vector<128x2xf32> to vector<32x2xf32>
    %156 = math.tanh %154 : vector<32x2xf32>
    %157 = arith.mulf %155, %156 : vector<32x2xf32>
    %c0_47 = arith.constant 0 : index
    %c4 = arith.constant 4 : index
    %158 = vector.load %arg18[%c0_47, %c4] : memref<32x8xf32, #tpu.memory_space<vmem>>, vector<32x2xf32>
    tpu.vector_store %arg18[%c0_47, %c4], %157 {strides = array<i32>} : memref<32x8xf32, #tpu.memory_space<vmem>>, vector<32x2xf32>,
    %159 = vector.extract_strided_slice %98 {offsets = [0, 6], sizes = [128, 2], strides = [1, 1]} : vector<128x8xf32> to vector<128x2xf32>
    %cst_48 = arith.constant dense<0.000000e+00> : vector<128x2xf32>
    %160 = tpu.matmul %99, %157, %cst_48 {dimension_numbers = #tpu.dot_dimension_numbers<[1], [0], [0], [1], [0, 0, 1, 1], [], []>} : vector<128x32xf32>, vector<32x2xf32>, vector<128x2xf32> -> vector<128x2xf32>
    %161 = arith.addf %159, %160 : vector<128x2xf32>
    %162 = arith.negf %161 : vector<128x2xf32>
    %163 = math.exp %162 : vector<128x2xf32>
    %cst_49 = arith.constant 1.000000e+00 : f32
    %164 = vector.broadcast %cst_49 : f32 to vector<128x2xf32>
    %165 = arith.addf %164, %163 : vector<128x2xf32>
    %166 = arith.divf %164, %165 : vector<128x2xf32>
    %167 = math.tanh %161 : vector<128x2xf32>
    %168 = vector.extract_strided_slice %166 {offsets = [32, 0], sizes = [32, 2], strides = [1, 1]} : vector<128x2xf32> to vector<32x2xf32>
    %169 = arith.mulf %168, %154 : vector<32x2xf32>
    %170 = vector.extract_strided_slice %166 {offsets = [0, 0], sizes = [32, 2], strides = [1, 1]} : vector<128x2xf32> to vector<32x2xf32>
    %171 = vector.extract_strided_slice %167 {offsets = [64, 0], sizes = [32, 2], strides = [1, 1]} : vector<128x2xf32> to vector<32x2xf32>
    %172 = arith.mulf %170, %171 : vector<32x2xf32>
    %173 = arith.addf %169, %172 : vector<32x2xf32>
    %174 = vector.extract_strided_slice %166 {offsets = [96, 0], sizes = [32, 2], strides = [1, 1]} : vector<128x2xf32> to vector<32x2xf32>
    %175 = math.tanh %173 : vector<32x2xf32>
    %176 = arith.mulf %174, %175 : vector<32x2xf32>
    %c0_50 = arith.constant 0 : index
    %c6 = arith.constant 6 : index
    %177 = vector.load %arg18[%c0_50, %c6] : memref<32x8xf32, #tpu.memory_space<vmem>>, vector<32x2xf32>
    tpu.vector_store %arg18[%c0_50, %c6], %176 {strides = array<i32>} : memref<32x8xf32, #tpu.memory_space<vmem>>, vector<32x2xf32>,
    %c0_51 = arith.constant 0 : index
    %c0_52 = arith.constant 0 : index
    %178 = vector.load %arg18[%c0_51, %c0_52] : memref<32x8xf32, #tpu.memory_space<vmem>>, vector<32x8xf32>
    %c0_53 = arith.constant 0 : index
    %c0_54 = arith.constant 0 : index
    %179 = vector.load %arg13[%c0_53, %c0_54] : memref<32x32xf32, #tpu.memory_space<vmem>>, vector<32x32xf32>
    %cst_55 = arith.constant dense<0.000000e+00> : vector<32x8xf32>
    %180 = tpu.matmul %179, %178, %cst_55 {dimension_numbers = #tpu.dot_dimension_numbers<[1], [0], [0], [1], [0, 0, 1, 1], [], []>} : vector<32x32xf32>, vector<32x8xf32>, vector<32x8xf32> -> vector<32x8xf32>
    %c0_56 = arith.constant 0 : index
    %c0_57 = arith.constant 0 : index
    %181 = vector.load %arg14[%c0_56, %c0_57] : memref<32x1xf32, #tpu.memory_space<vmem>>, vector<32x1xf32>
    %182 = vector.broadcast %181 : vector<32x1xf32> to vector<32x8xf32>
    %183 = arith.addf %180, %182 : vector<32x8xf32>
    %cst_58 = arith.constant 0.000000e+00 : f32
    %184 = vector.broadcast %cst_58 : f32 to vector<32x8xf32>
    %185 = arith.cmpf ogt, %183, %184 : vector<32x8xf32>
    %cst_59 = arith.constant 5.000000e-02 : f32
    %186 = vector.broadcast %cst_59 : f32 to vector<32x8xf32>
    %187 = arith.mulf %186, %183 : vector<32x8xf32>
    %188 = arith.select %185, %183, %187 : vector<32x8xi1>, vector<32x8xf32>
    %c0_60 = arith.constant 0 : index
    %c0_61 = arith.constant 0 : index
    %189 = vector.load %arg15[%c0_60, %c0_61] : memref<6x32xf32, #tpu.memory_space<vmem>>, vector<6x32xf32>
    %cst_62 = arith.constant dense<0.000000e+00> : vector<6x8xf32>
    %190 = tpu.matmul %189, %188, %cst_62 {dimension_numbers = #tpu.dot_dimension_numbers<[1], [0], [0], [1], [0, 0, 1, 1], [], []>} : vector<6x32xf32>, vector<32x8xf32>, vector<6x8xf32> -> vector<6x8xf32>
    %c0_63 = arith.constant 0 : index
    %c0_64 = arith.constant 0 : index
    %191 = vector.load %arg16[%c0_63, %c0_64] : memref<6x1xf32, #tpu.memory_space<vmem>>, vector<6x1xf32>
    %192 = vector.broadcast %191 : vector<6x1xf32> to vector<6x8xf32>
    %193 = arith.addf %190, %192 : vector<6x8xf32>
    %cst_65 = arith.constant dense<0xFF800000> : vector<8xf32>
    %194 = vector.multi_reduction <maximumf>, %193, %cst_65 [0] : vector<6x8xf32> to vector<8xf32>
    %195 = vector.shape_cast %194 : vector<8xf32> to vector<1x8xf32>
    %196 = vector.broadcast %195 : vector<1x8xf32> to vector<6x8xf32>
    %197 = arith.subf %193, %196 : vector<6x8xf32>
    %198 = math.exp %197 : vector<6x8xf32>
    %cst_66 = arith.constant dense<0.000000e+00> : vector<8xf32>
    %199 = vector.multi_reduction <add>, %198, %cst_66 [0] : vector<6x8xf32> to vector<8xf32>
    %200 = vector.shape_cast %199 : vector<8xf32> to vector<1x8xf32>
    %201 = math.log %200 : vector<1x8xf32>
    %202 = arith.addf %195, %201 : vector<1x8xf32>
    %203 = vector.broadcast %202 : vector<1x8xf32> to vector<6x8xf32>
    %204 = arith.subf %193, %203 : vector<6x8xf32>
    %c0_67 = arith.constant 0 : index
    %c0_68 = arith.constant 0 : index
    %205 = vector.load %arg17[%c0_67, %c0_68] : memref<6x8xf32, #tpu.memory_space<vmem>>, vector<6x8xf32>
    tpu.vector_store %arg17[%c0_67, %c0_68], %204 {strides = array<i32>} : memref<6x8xf32, #tpu.memory_space<vmem>>, vector<6x8xf32>,
    return
  }
}

</mosaic_0001>

<bundles_post_ra>
// kernel: emgnet_forward.1
= control target key start
LH: loop header
LB: loop body
LE: loop exit
PB: predicated region body
PF: predicated region fallthrough
CT: control target
= control target key end

     0   :  { %s3489_s29 = smov 122   ;;  %s3491_s30 = smov 124   ;;  %vm154_vm0 = vcmask 982016   ;;  %vm142_vm1 = vcmask 990208   ;;  %v3497_v19 = vmov 0   ;;  %vm130_vm2 = vcmask 998400   ;;  %s5978_s0 = inlined_call_operand.vmem [shape: f32[8,328], index: 0, kind: input, shape index: {}]   ;;  %s5979_s2 = inlined_call_operand.vmem [shape: f32[16,1], index: 2, kind: input, shape index: {}]   ;;  %s5980_s3 = inlined_call_operand.vmem [shape: f32[320,136], index: 3, kind: input, shape index: {}]   ;;  %s5981_s1 = inlined_call_operand.vmem [shape: f32[16,72], index: 1, kind: input, shape index: {}]   ;;  %s5982_s4 = inlined_call_operand.vmem [shape: f32[16,9], index: 4, kind: input, shape index: {}]   ;;  %s5983_s9 = inlined_call_operand.<no memory space> [shape: f32[1,1], index: 9, kind: input, shape index: {}]   ;;  %s5984_s5 = inlined_call_operand.vmem [shape: f32[16,1], index: 5, kind: input, shape index: {}]   ;;  %s5985_s7 = inlined_call_operand.vmem [shape: f32[16,1], index: 7, kind: input, shape index: {}]   ;;  %s5986_s11 = inlined_call_operand.vmem [shape: f32[128,1], index: 11, kind: input, shape index: {}]   ;;  %s5987_s6 = inlined_call_operand.vmem [shape: f32[16,16], index: 6, kind: input, shape index: {}]   ;;  %s5988_s8 = inlined_call_operand.vmem [shape: f32[128,8], index: 8, kind: input, shape index: {}]   ;;  %s5989_s12 = inlined_call_operand.vmem [shape: f32[128,32], index: 12, kind: input, shape index: {}]   ;;  %s5990_s10 = inlined_call_operand.vmem [shape: f32[128,16], index: 10, kind: input, shape index: {}]   ;;  %s5991_s14 = inlined_call_operand.vmem [shape: f32[32,1], index: 14, kind: input, shape index: {}]   ;;  %s5992_s16 = inlined_call_operand.vmem [shape: f32[6,1], index: 16, kind: input, shape index: {}]   ;;  %s5993_s13 = inlined_call_operand.vmem [shape: f32[32,32], index: 13, kind: input, shape index: {}]   ;;  %s5994_s15 = inlined_call_operand.vmem [shape: f32[6,32], index: 15, kind: input, shape index: {}]   ;;  %s5995_s17 = inlined_call_operand.vmem [shape: f32[6,8], index: 17, kind: output, shape index: {}]  }
   0x1   :  { %6017 = sst [smem:[#allocation14_spill]] %s5978_s0  ;;  %s5998_s0 = smov 120   ;;  %3155 = vset.pattern.permute.xlu1 %v3497_v19  ;;  %3156 = vset.pattern.permute.xlu2 %v3497_v19  ;;  %vm118_vm3 = vcmask 1006592   ;;  %vm106_vm4 = vcmask 1014784   ;;  %vm94_vm5 = vcmask 1022976   ;;  %vm82_vm6 = vcmask 1031168  }
   0x2   :  { %6018 = sst [smem:[#allocation15_spill]] %s5979_s2  ;;  %s3492_s18 = smov 123   ;;  %v316_v39 = vld [vmem:[%s5980_s3 + $0xf0] sm:$0xff]  ;;  %v314_v40 = vld [vmem:[%s5980_s3 + $0xe0] sm:$0xff]  ;;  %vm70_vm7 = vcmask 1039360   ;;  %vm174_vm8 = vcmask 588800  }
   0x3   :  { %s6019_s26 = sld [smem:[#allocation14_spill]]  ;;  %s6000_s19 = smov 121   ;;  %373 = vmatpush.msra.mxu3 %v316_v39  ;;  %v312_v44 = vld [vmem:[%s5980_s3 + $0xd0] sm:$0xff]  ;;  %v310_v48 = vld [vmem:[%s5980_s3 + $0xc0] sm:$0xff]  ;;  %v161_v61 = vld [vmem:[%s5981_s1 + $0x8] sm:$0xff]  ;;  %vm366_vm12 = vcmask 523264  }
   0x4   :  { %s3494_s2 = smov 125   ;;  %s3495_s22 = smov 126   ;;  %v160_v51 = vld [vmem:[%s5981_s1] sm:$0xff]  ;;  %v308_v52 = vld [vmem:[%s5980_s3 + $0xb0] sm:$0xff]  ;;  %v289_v39 = vld [vmem:[%s5980_s3 + $0x18] sm:$0xff] }
   0x5   :  { %s3496_s23 = smov 127   ;;  %374 = vmatpush.msra.mxu3 %v314_v40  ;;  %v306_v53 = vld [vmem:[%s5980_s3 + $0xa0] sm:$0xff]  ;;  %v304_v56 = vld [vmem:[%s5980_s3 + $0x90] sm:$0xff]  ;;  %s6022_s25 = smov 120  }
   0x6   :  { %v302_v59 = vld [vmem:[%s5980_s3 + $0x80] sm:$0xff]  ;;  %v300_v62 = vld [vmem:[%s5980_s3 + $0x70] sm:$0xff] }
   0x7   :  { %375 = vmatpush.msra.mxu3 %v312_v44  ;;  %v332_v40 = vld [vmem:[%s5980_s3 + $0x170] sm:$0xff] }
   0x8   :  { %v352_v44 = vld [vmem:[%s5980_s3 + $0x210] sm:$0xff] }
   0x9   :  { %v3603_v0 = vld [vmem:[%s6019_s26] sm:$0xff]  ;;  %v3608_v1 = vld [vmem:[%s6019_s26 + $0x8] sm:$0xff]  ;;  %v3621_v3 = vld [vmem:[%s6019_s26 + $0x10] sm:$0xff]  ;;  %s6020_s26 = sld [smem:[#allocation15_spill]]  ;;  %376 = vmatpush.msra.mxu3 %v310_v48 }
   0xa   :  { %v3125_v2 = vpack.i.bf16 %v3608_v1, %v3603_v0  ;;  %v326_v48 = vld [vmem:[%s5980_s3 + $0x140] sm:$0xff] }
   0xb   :  { %377 = vmatpush.msra.mxu3 %v308_v52  ;;  %v3500_v52 = vmov 4  }
   0xc   :  { %3126 = vrot.lane.b32.xlu1 %v3125_v2, %s3489_s29  ;;  %3116 = vrot.lane.b32.xlu0 %v3125_v2, %s5998_s0 }
   0xd   :  { %3136 = vrot.lane.b32.xlu2 %v3125_v2, %s3491_s30  ;;  %378 = vmatpush.msra.mxu3 %v306_v53  ;;  %v320_v53 = vld [vmem:[%s5980_s3 + $0x110] sm:$0xff] }
   0xf   :  { %v162_v20 = vld [vmem:[%s6020_s26] sm:$0xff]  ;;  %v163_v38 = vld [vmem:[%s6020_s26 + $0x8] sm:$0xff]  ;;  %379 = vmatpush.msra.mxu3 %v304_v56  ;;  %v365_v56 = vld [vmem:[%s5980_s3 + $0x278] sm:$0xff] }
  0x11   :  { %380 = vmatpush.msra.mxu3 %v302_v59  ;;  %v3501_v59 = vmov 3  }
  0x13   :  { %381 = vmatpush.msra.mxu3 %v300_v62  ;;  %v3502_v62 = vmov 5  }
  0x14   :  { %3131 = vrot.lane.b32.xlu1 %v3125_v2, %s3492_s18  ;;  %3121 = vrot.lane.b32.xlu0 %v3125_v2, %s6000_s19 }
  0x15   :  { %3141 = vrot.lane.b32.xlu2 %v3125_v2, %s3494_s2 }
  0x1c   :  { %3146 = vrot.lane.b32.xlu1 %v3125_v2, %s3495_s22  ;;  %152 = vrot.lane.b32.xlu0 %v3621_v3, %s5998_s0 }
  0x1d   :  { %140 = vrot.lane.b32.xlu2 %v3621_v3, %s6000_s19 }
  0x24   :  { %128 = vrot.lane.b32.xlu1 %v3621_v3, %s3489_s29  ;;  %3151 = vrot.lane.b32.xlu0 %v3125_v2, %s3496_s23 }
  0x25   :  { %116 = vrot.lane.b32.xlu2 %v3621_v3, %s3492_s18 }
  0x2c   :  { %92 = vrot.lane.b32.xlu1 %v3621_v3, %s3494_s2  ;;  %104 = vrot.lane.b32.xlu0 %v3621_v3, %s3491_s30 }
  0x2d   :  { %80 = vrot.lane.b32.xlu2 %v3621_v3, %s3495_s22 }
  0x34   :  { %68 = vrot.lane.b32.xlu0 %v3621_v3, %s3496_s23  ;;  %166 = vperm.xlu1 %3155, %v162_v20   ;;  %v344_v20 = vld [vmem:[%s5980_s3 + $0x1d0] sm:$0xff] }
  0x35   :  { %171 = vperm.xlu2 %3156, %v163_v38   ;;  %v356_v38 = vld [vmem:[%s5980_s3 + $0x230] sm:$0xff] }
  0x67   :  { %v3641_v4 = vpop.permute.xlu2 %3136 }
  0x68   :  { %v3139_v22 = vunpack.i.h.bf16 %v3641_v4  ;;  %v3138_v23 = vunpack.i.l.bf16 %v3641_v4  ;;  %v296_v4 = vld [vmem:[%s5980_s3 + $0x50] sm:$0xff] }
  0x6a   :  { %v107_v33 = vsel %vm106_vm4, %v3138_v23, %v3139_v22  ;;  %v342_v23 = vld [vmem:[%s5980_s3 + $0x1c0] sm:$0xff] }
  0x6f   :  { %v3645_v9 = vpop.permute.xlu2 %3141 }
  0x70   :  { %v3144_v27 = vunpack.i.h.bf16 %v3645_v9  ;;  %v3143_v28 = vunpack.i.l.bf16 %v3645_v9  ;;  %v313_v9 = vld [vmem:[%s5980_s3 + $0xd8] sm:$0xff] }
  0x72   :  { %v95_v35 = vsel %vm94_vm5, %v3143_v28, %v3144_v27  ;;  %v340_v28 = vld [vmem:[%s5980_s3 + $0x1b0] sm:$0xff] }
  0x77   :  { %v141_v24 = vpop.permute.xlu2 %140 }
  0x7e   :  { %v3643_v5 = vpop.permute.xlu1 %3126  ;;  %v3117_v6 = vpop.permute.xlu0 %3116 }
  0x7f   :  { %v3119_v7 = vunpack.i.h.bf16 %v3117_v6  ;;  %v3118_v8 = vunpack.i.l.bf16 %v3117_v6  ;;  %v3129_v11 = vunpack.i.h.bf16 %v3643_v5  ;;  %v3128_v12 = vunpack.i.l.bf16 %v3643_v5  ;;  %v117_v41 = vpop.permute.xlu2 %116  ;;  %v317_v6 = vld [vmem:[%s5980_s3 + $0xf8] sm:$0xff] }
  0x81   :  { %v155_v10 = vsel %vm154_vm0, %v3118_v8, %v3119_v7  ;;  %v131_v25 = vsel %vm130_vm2, %v3128_v12, %v3129_v11  ;;  %v315_v8 = vld [vmem:[%s5980_s3 + $0xe8] sm:$0xff]  ;;  %v305_v12 = vld [vmem:[%s5980_s3 + $0x98] sm:$0xff] }
  0x82   :  { %188 = vmatpush.msra.mxu0 %v155_v10  ;;  %v309_v10 = vld [vmem:[%s5980_s3 + $0xb8] sm:$0xff] }
  0x86   :  { %v3650_v13 = vpop.permute.xlu1 %3131  ;;  %v3122_v14 = vpop.permute.xlu0 %3121 }
  0x87   :  { %v3134_v15 = vunpack.i.h.bf16 %v3650_v13  ;;  %v3133_v16 = vunpack.i.l.bf16 %v3650_v13  ;;  %v3124_v17 = vunpack.i.h.bf16 %v3122_v14  ;;  %v3123_v18 = vunpack.i.l.bf16 %v3122_v14  ;;  %v81_v58 = vpop.permute.xlu2 %80  ;;  %v348_v13 = vld [vmem:[%s5980_s3 + $0x1f0] sm:$0xff]  ;;  %v303_v14 = vld [vmem:[%s5980_s3 + $0x88] sm:$0xff] }
  0x89   :  { %v143_v21 = vsel %vm142_vm1, %v3123_v18, %v3124_v17  ;;  %v119_v26 = vsel %vm118_vm3, %v3133_v16, %v3134_v15  ;;  %v144_v36 = vsel %vm142_vm1, %v3124_v17, %v141_v24  ;;  %v120_v50 = vsel %vm118_vm3, %v3134_v15, %v117_v41  ;;  %v290_v15 = vld [vmem:[%s5980_s3 + $0x20] sm:$0xff]  ;;  %v301_v17 = vld [vmem:[%s5980_s3 + $0x78] sm:$0xff]  ;;  %v288_v18 = vld [vmem:[%s5980_s3 + $0x10] sm:$0xff] }
  0x8a   :  { %189 = vmatpush.msra.mxu0 %v143_v21  ;;  %v346_v16 = vld [vmem:[%s5980_s3 + $0x1e0] sm:$0xff]  ;;  %v299_v21 = vld [vmem:[%s5980_s3 + $0x68] sm:$0xff] }
  0x8c   :  { %190 = vmatpush.msra.mxu0 %v131_v25  ;;  %v297_v25 = vld [vmem:[%s5980_s3 + $0x58] sm:$0xff] }
  0x8e   :  { %v3666_v29 = vpop.permute.xlu1 %3146  ;;  %v153_v30 = vpop.permute.xlu0 %152  ;;  %191 = vmatpush.msra.mxu0 %v119_v26  ;;  %v362_v26 = vld [vmem:[%s5980_s3 + $0x260] sm:$0xff] }
  0x8f   :  { %v3149_v31 = vunpack.i.h.bf16 %v3666_v29  ;;  %v3148_v32 = vunpack.i.l.bf16 %v3666_v29  ;;  %234 = vmatpush.msra.mxu2 %v153_v30  ;;  %v156_v34 = vsel %vm154_vm0, %v3119_v7, %v153_v30  ;;  %v294_v7 = vld [vmem:[%s5980_s3 + $0x40] sm:$0xff]  ;;  %v295_v29 = vld [vmem:[%s5980_s3 + $0x48] sm:$0xff] }
  0x90   :  { %192 = vmatpush.msra.mxu0 %v107_v33  ;;  %211 = vmatpush.msra.mxu1 %v156_v34  ;;  %v3820_v30 = vld [vmem:[%s5982_s4] sm:$0xff]  ;;  %v293_v33 = vld [vmem:[%s5980_s3 + $0x38] sm:$0xff]  ;;  %v336_v34 = vld [vmem:[%s5980_s3 + $0x190] sm:$0xff] }
  0x91   :  { %235 = vmatpush.msra.mxu2 %v141_v24  ;;  %v83_v37 = vsel %vm82_vm6, %v3148_v32, %v3149_v31  ;;  %v84_v63 = vsel %vm82_vm6, %v3149_v31, %v81_v58  ;;  %v364_v24 = vld [vmem:[%s5980_s3 + $0x270] sm:$0xff]  ;;  %v338_v31 = vld [vmem:[%s5980_s3 + $0x1a0] sm:$0xff] }
  0x92   :  { %193 = vmatpush.msra.mxu0 %v95_v35  ;;  %212 = vmatpush.msra.mxu1 %v144_v36  ;;  %v360_v32 = vld [vmem:[%s5980_s3 + $0x250] sm:$0xff]  ;;  %v358_v35 = vld [vmem:[%s5980_s3 + $0x240] sm:$0xff]  ;;  %v291_v36 = vld [vmem:[%s5980_s3 + $0x28] sm:$0xff] }
  0x94   :  { %194 = vmatpush.msra.mxu0 %v83_v37  ;;  %v334_v37 = vld [vmem:[%s5980_s3 + $0x180] sm:$0xff] }
  0x96   :  { %v129_v42 = vpop.permute.xlu1 %128  ;;  %v3152_v43 = vpop.permute.xlu0 %3151 }
  0x97   :  { %v3154_v45 = vunpack.i.h.bf16 %v3152_v43  ;;  %v3153_v46 = vunpack.i.l.bf16 %v3152_v43  ;;  %v132_v47 = vsel %vm130_vm2, %v3129_v11, %v129_v42  ;;  %236 = vmatpush.msra.mxu2 %v129_v42  ;;  %v307_v11 = vld [vmem:[%s5980_s3 + $0xa8] sm:$0xff]  ;;  %v3499_v43 = vmov 2  }
  0x98   :  { %213 = vmatpush.msra.mxu1 %v132_v47  ;;  %v287_v42 = vld [vmem:[%s5980_s3 + $0x8] sm:$0xff]  ;;  %v350_v47 = vld [vmem:[%s5980_s3 + $0x200] sm:$0xff]  ;;  %3159 = vset.pattern.permute.xlu2 %v3499_v43 }
  0x99   :  { %v71_v49 = vsel %vm70_vm7, %v3153_v46, %v3154_v45  ;;  %237 = vmatpush.msra.mxu2 %v117_v41  ;;  %v354_v41 = vld [vmem:[%s5980_s3 + $0x220] sm:$0xff]  ;;  %v328_v46 = vld [vmem:[%s5980_s3 + $0x150] sm:$0xff] }
  0x9a   :  { %195 = vmatpush.msra.mxu0 %v71_v49  ;;  %214 = vmatpush.msra.mxu1 %v120_v50  ;;  %v324_v49 = vld [vmem:[%s5980_s3 + $0x130] sm:$0xff]  ;;  %v3881_v50 = vld [vmem:[%s5982_s4 + $0x8] sm:$0xff] }
  0x9b   :  { %562 = vperm.xlu2 %3159, %v3881_v50  }
  0x9c   :  { %196 = vmatpush.msra.mxu0 %v3603_v0  ;;  %v298_v0 = vld [vmem:[%s5980_s3 + $0x60] sm:$0xff] }
  0x9d   :  { %2939 = vmatmul.msk.f32.vlgmr.msra.gmra.mxu0 %vm174_vm8, %v160_v51  ;;  %382 = vmatpush.msra.mxu3 %v298_v0  ;;  %v359_v0 = vld [vmem:[%s5980_s3 + $0x248] sm:$0xff] }
  0x9e   :  { %v93_v54 = vpop.permute.xlu1 %92  ;;  %v105_v55 = vpop.permute.xlu0 %104 }
  0x9f   :  { %238 = vmatpush.msra.mxu2 %v105_v55  ;;  %v108_v57 = vsel %vm106_vm4, %v3139_v22, %v105_v55  ;;  %v96_v60 = vsel %vm94_vm5, %v3144_v27, %v93_v54  ;;  %383 = vmatpush.msra.mxu3 %v296_v4  ;;  %v286_v22 = vld [vmem:[%s5980_s3] sm:$0xff]  ;;  %v3498_v27 = vmov 1   ;;  %v3910_v4 = vpop.permute.xlu2 %171 }
  0xa0   :  { %215 = vmatpush.msra.mxu1 %v108_v57  ;;  %3158 = vset.pattern.permute.xlu1 %v3498_v27 }
  0xa1   :  { %239 = vmatpush.msra.mxu2 %v93_v54  ;;  %384 = vmatpush.msra.mxu3 %v294_v7  ;;  %v318_v54 = vld [vmem:[%s5980_s3 + $0x100] sm:$0xff] }
  0xa2   :  { %216 = vmatpush.msra.mxu1 %v96_v60  ;;  %528 = vperm.xlu1 %3158, %v3820_v30   ;;  %v363_v60 = vld [vmem:[%s5980_s3 + $0x268] sm:$0xff] }
  0xa3   :  { %240 = vmatpush.msra.mxu2 %v81_v58  ;;  %3157 = vset.pattern.permute.xlu0 %v3498_v27  ;;  %v3504_v27 = vmov 7  }
  0xa4   :  { %217 = vmatpush.msra.mxu1 %v84_v63  ;;  %532 = vperm.xlu0 %3157, %v3881_v50   ;;  %v361_v63 = vld [vmem:[%s5980_s3 + $0x258] sm:$0xff] }
  0xa5   :  { %2940 = vmatmul.msk.f32.gmra.mxu0 %vm174_vm8, %v161_v61  ;;  %3161 = vset.pattern.permute.xlu2 %v3501_v59 }
  0xa6   :  { %v69_v2 = vpop.permute.xlu0 %68  ;;  %v167_v55 = vpop.permute.xlu1 %166  ;;  %592 = vperm.xlu2 %3161, %v3881_v50  }
  0xa7   :  { %241 = vmatpush.msra.mxu2 %v69_v2  ;;  %v72_v5 = vsel %vm70_vm7, %v3154_v45, %v69_v2  ;;  %v330_v45 = vld [vmem:[%s5980_s3 + $0x160] sm:$0xff] }
  0xa8   :  { %218 = vmatpush.msra.mxu1 %v72_v5  ;;  %v357_v5 = vld [vmem:[%s5980_s3 + $0x238] sm:$0xff] }
  0xa9   :  { %242 = vmatpush.msra.mxu2 %v3621_v3  ;;  %v292_v3 = vld [vmem:[%s5980_s3 + $0x30] sm:$0xff] }
  0xaa   :  { %219 = vmatpush.msra.mxu1 %v3608_v1  ;;  %2943 = vmatmul.msk.f32.vlgmr.msra.gmra.mxu2 %vm174_vm8, %v160_v51  ;;  %v311_v1 = vld [vmem:[%s5980_s3 + $0xc8] sm:$0xff] }
  0xab   :  { %2941 = vmatmul.msk.f32.vlgmr.msra.gmra.mxu1 %vm174_vm8, %v160_v51  ;;  %442 = vmatpush.msrb.mxu2 %v317_v6  ;;  %v322_v51 = vld [vmem:[%s5980_s3 + $0x120] sm:$0xff]  ;;  %v355_v6 = vld [vmem:[%s5980_s3 + $0x228] sm:$0xff] }
  0xac   :  { %385 = vmatpush.msra.mxu3 %v292_v3  ;;  %396 = vmatpush.msrb.mxu1 %v348_v13 }
  0xad   :  { %443 = vmatpush.msrb.mxu2 %v315_v8  ;;  %3160 = vset.pattern.permute.xlu1 %v3499_v43 }
  0xae   :  { %386 = vmatpush.msra.mxu3 %v290_v15  ;;  %397 = vmatpush.msrb.mxu1 %v346_v16  ;;  %v349_v16 = vld [vmem:[%s5980_s3 + $0x1f8] sm:$0xff] }
  0xaf   :  { %444 = vmatpush.msrb.mxu2 %v313_v9  ;;  %558 = vperm.xlu1 %3160, %v3820_v30   ;;  %v353_v9 = vld [vmem:[%s5980_s3 + $0x218] sm:$0xff] }
  0xb0   :  { %387 = vmatpush.msra.mxu3 %v288_v18  ;;  %398 = vmatpush.msrb.mxu1 %v344_v20  ;;  %v347_v20 = vld [vmem:[%s5980_s3 + $0x1e8] sm:$0xff] }
  0xb1   :  { %445 = vmatpush.msrb.mxu2 %v311_v1  ;;  %3162 = vset.pattern.permute.xlu0 %v3501_v59  ;;  %v3503_v1 = vmov 6   ;;  %v327_v59 = vld [vmem:[%s5980_s3 + $0x148] sm:$0xff] }
  0xb2   :  { %2944 = vmatmul.msk.f32.gmra.mxu2 %vm174_vm8, %v161_v61  ;;  %388 = vmatpush.msra.mxu3 %v286_v22 }
  0xb3   :  { %2942 = vmatmul.msk.f32.gmra.mxu1 %vm174_vm8, %v161_v61  ;;  %446 = vmatpush.msrb.mxu2 %v309_v10  ;;  %v351_v10 = vld [vmem:[%s5980_s3 + $0x208] sm:$0xff] }
  0xb4   :  { %399 = vmatpush.msrb.mxu1 %v342_v23  ;;  %427 = vmatpush.msrb.mxu3 %v364_v24  ;;  %v345_v23 = vld [vmem:[%s5980_s3 + $0x1d8] sm:$0xff] }
  0xb5   :  { %447 = vmatpush.msrb.mxu2 %v307_v11  ;;  %588 = vperm.xlu0 %3162, %v3820_v30  }
  0xb6   :  { %428 = vmatpush.msrb.mxu3 %v362_v26  ;;  %400 = vmatpush.msrb.mxu1 %v340_v28  ;;  %v343_v26 = vld [vmem:[%s5980_s3 + $0x1c8] sm:$0xff] }
  0xb7   :  { %448 = vmatpush.msrb.mxu2 %v305_v12  ;;  %3163 = vset.pattern.permute.xlu1 %v3500_v52 }
  0xb8   :  { %401 = vmatpush.msrb.mxu1 %v338_v31  ;;  %429 = vmatpush.msrb.mxu3 %v360_v32 }
  0xb9   :  { %449 = vmatpush.msrb.mxu2 %v303_v14  ;;  %622 = vperm.xlu1 %3163, %v3881_v50  }
  0xba   :  { %402 = vmatpush.msrb.mxu1 %v336_v34  ;;  %430 = vmatpush.msrb.mxu3 %v358_v35  ;;  %v3505_v34 = vmov 8  }
  0xbb   :  { %450 = vmatpush.msrb.mxu2 %v301_v17  ;;  %3164 = vset.pattern.permute.xlu2 %v3500_v52 }
  0xbc   :  { %403 = vmatpush.msrb.mxu1 %v334_v37  ;;  %431 = vmatpush.msrb.mxu3 %v356_v38  ;;  %v339_v38 = vld [vmem:[%s5980_s3 + $0x1a8] sm:$0xff] }
  0xbd   :  { %451 = vmatpush.msrb.mxu2 %v299_v21  ;;  %618 = vperm.xlu2 %3164, %v3820_v30  }
  0xbe   :  { %404 = vmatpush.msrb.mxu1 %v332_v40  ;;  %432 = vmatpush.msrb.mxu3 %v354_v41 }
  0xbf   :  { %452 = vmatpush.msrb.mxu2 %v297_v25  ;;  %3167 = vset.pattern.permute.xlu0 %v3503_v1 }
  0xc0   :  { %433 = vmatpush.msrb.mxu3 %v352_v44  ;;  %405 = vmatpush.msrb.mxu1 %v330_v45  ;;  %v335_v45 = vld [vmem:[%s5980_s3 + $0x188] sm:$0xff] }
  0xc1   :  { %453 = vmatpush.msrb.mxu2 %v295_v29  ;;  %3165 = vset.pattern.permute.xlu1 %v3502_v62 }
  0xc2   :  { %434 = vmatpush.msrb.mxu3 %v350_v47  ;;  %406 = vmatpush.msrb.mxu1 %v328_v46 }
  0xc3   :  { %454 = vmatpush.msrb.mxu2 %v293_v33  ;;  %652 = vperm.xlu1 %3165, %v3881_v50   ;;  %v341_v33 = vld [vmem:[%s5980_s3 + $0x1b8] sm:$0xff] }
  0xc4   :  { %407 = vmatpush.msrb.mxu1 %v326_v48  ;;  %682 = vperm.xlu0 %3167, %v3881_v50   ;;  %v333_v48 = vld [vmem:[%s5980_s3 + $0x178] sm:$0xff] }
  0xc5   :  { %455 = vmatpush.msrb.mxu2 %v291_v36  ;;  %3166 = vset.pattern.permute.xlu2 %v3502_v62 }
  0xc6   :  { %408 = vmatpush.msrb.mxu1 %v324_v49  ;;  %648 = vperm.xlu2 %3166, %v3820_v30  }
  0xc7   :  { %456 = vmatpush.msrb.mxu2 %v289_v39 }
  0xc8   :  { %409 = vmatpush.msrb.mxu1 %v322_v51 }
  0xc9   :  { %457 = vmatpush.msrb.mxu2 %v287_v42  ;;  %v337_v42 = vld [vmem:[%s5980_s3 + $0x198] sm:$0xff] }
  0xca   :  { %410 = vmatpush.msrb.mxu1 %v320_v53  ;;  %v331_v53 = vld [vmem:[%s5980_s3 + $0x168] sm:$0xff] }
  0xcb   :  { %3168 = vset.pattern.permute.xlu1 %v3503_v1 }
  0xcc   :  { %411 = vmatpush.msrb.mxu1 %v318_v54  ;;  %678 = vperm.xlu1 %3168, %v3820_v30  }
  0xcd   :  { %3172 = vset.pattern.permute.xlu0 %v3505_v34 }
  0xce   :  { %496 = vmatpush.msra.mxu1 %v365_v56  ;;  %738 = vperm.xlu0 %3172, %v3820_v30  }
  0xcf   :  { %3169 = vset.pattern.permute.xlu2 %v3504_v27 }
  0xd0   :  { %497 = vmatpush.msra.mxu1 %v363_v60  ;;  %712 = vperm.xlu2 %3169, %v3881_v50  }
  0xd2   :  { %498 = vmatpush.msra.mxu1 %v361_v63  ;;  %v323_v63 = vld [vmem:[%s5980_s3 + $0x128] sm:$0xff] }
  0xd4   :  { %499 = vmatpush.msra.mxu1 %v359_v0  ;;  %3170 = vset.pattern.permute.xlu1 %v3504_v27 }
  0xd5   :  { %708 = vperm.xlu1 %3170, %v3820_v30  }
  0xd6   :  { %500 = vmatpush.msra.mxu1 %v357_v5  ;;  %3175 = vset.pattern.permute.xlu0 %v3497_v19 }
  0xd8   :  { %501 = vmatpush.msra.mxu1 %v355_v6  ;;  %3171 = vset.pattern.permute.xlu2 %v3505_v34 }
  0xd9   :  { %742 = vperm.xlu2 %3171, %v3881_v50  }
  0xda   :  { %502 = vmatpush.msra.mxu1 %v353_v9 }
  0xdc   :  { %503 = vmatpush.msra.mxu1 %v351_v10 }
  0xdd   :  { %3173 = vset.pattern.permute.xlu1 %v3497_v19 }
  0xde   :  { %520 = vperm.xlu1 %3173, %v3881_v50   ;;  %v321_v50 = vld [vmem:[%s5980_s3 + $0x118] sm:$0xff] }
  0xe1   :  { %3174 = vset.pattern.permute.xlu2 %v3497_v19 }
  0xe2   :  { %515 = vperm.xlu2 %3174, %v3820_v30  }
 0x116   :  { %v4004_v30 = vpop.permute.xlu0 %532 }
 0x11a   :  { %v198_v57 = vpop.f32.mrf.mxu0 }
 0x11b   :  { %v199_v58 = vadd.f32 %v198_v57, %v167_v55  ;;  %v329_v57 = vld [vmem:[%s5980_s3 + $0x158] sm:$0xff] }
 0x11d   :  { %v256_v61 = vmin.f32 %v199_v58, 0.0  ;;  %vm250_vm9 = vcmp.gt.f32.partialorder %v199_v58, 0.0 }
 0x11f   :  { %v262_v2 = vmul.f32 1.442695, %v256_v61  ;;  %v325_v61 = vld [vmem:[%s5980_s3 + $0x138] sm:$0xff] }
 0x121   :  { %3197 = vpow2.f32 %v262_v2  ;;  %v319_v2 = vld [vmem:[%s5980_s3 + $0x108] sm:$0xff]  ;;  %s6021_s3 = smov 121  }
 0x122   :  { %v201_v7 = vpop.f32.mrf.mxu0 }
 0x123   :  { %v202_v8 = vadd.f32 %v201_v7, %v3910_v4 }
 0x125   :  { %v259_v3 = vmin.f32 %v202_v8, 0.0  ;;  %vm253_vm10 = vcmp.gt.f32.partialorder %v202_v8, 0.0 }
 0x127   :  { %v3198_v11 = vpop.eup %3197  ;;  %v268_v12 = vmul.f32 1.442695, %v259_v3 }
 0x128   :  { %v221_v13 = vpop.f32.mrf.mxu1  ;;  %v2945_v14 = vadd.f32 -1.0, %v3198_v11 }
 0x129   :  { %v222_v15 = vadd.f32 %v221_v13, %v167_v55  ;;  %3199 = vpow2.f32 %v268_v12 }
 0x12a   :  { %v280_v17 = vsel %vm250_vm9, %v199_v58, %v2945_v14 }
 0x12b   :  { %v257_v18 = vmin.f32 %v222_v15, 0.0  ;;  %389 = vmatmul.f32.vlgmr.msra.gmra.mxu3 %v280_v17  ;;  %458 = vmatmul.f32.vlgmr.msrb.gmra.mxu2 %v280_v17  ;;  %vm251_vm11 = vcmp.gt.f32.partialorder %v222_v15, 0.0 }
 0x12c   :  { %465 = vmatpush.msra.mxu3 %v349_v16  ;;  %v589_v16 = vpop.permute.xlu0 %588 }
 0x12d   :  { %v264_v21 = vmul.f32 1.442695, %v257_v18  ;;  %v244_v22 = vpop.f32.mrf.mxu2 }
 0x12e   :  { %v245_v24 = vadd.f32 %v244_v22, %v167_v55  ;;  %466 = vmatpush.msra.mxu3 %v347_v20 }
 0x12f   :  { %v3200_v25 = vpop.eup %3199  ;;  %3201 = vpow2.f32 %v264_v21 }
 0x130   :  { %v258_v28 = vmin.f32 %v245_v24, 0.0  ;;  %v224_v29 = vpop.f32.mrf.mxu1  ;;  %v2948_v31 = vadd.f32 -1.0, %v3200_v25  ;;  %467 = vmatpush.msra.mxu3 %v345_v23  ;;  %vm252_vm13 = vcmp.gt.f32.partialorder %v245_v24, 0.0 }
 0x131   :  { %v225_v32 = vadd.f32 %v224_v29, %v3910_v4 }
 0x132   :  { %v266_v35 = vmul.f32 1.442695, %v258_v28  ;;  %v283_v36 = vsel %vm253_vm10, %v202_v8, %v2948_v31  ;;  %468 = vmatpush.msra.mxu3 %v343_v26  ;;  %v3998_v8 = vpop.permute.xlu2 %562 }
 0x133   :  { %v260_v37 = vmin.f32 %v225_v32, 0.0  ;;  %392 = vmatmul.f32.gmra.mxu3 %v283_v36  ;;  %461 = vmatmul.f32.gmra.mxu2 %v283_v36  ;;  %vm254_vm14 = vcmp.gt.f32.partialorder %v225_v32, 0.0 }
 0x134   :  { %3203 = vpow2.f32 %v266_v35  ;;  %469 = vmatpush.msra.mxu3 %v341_v33 }
 0x135   :  { %v3202_v39 = vpop.eup %3201  ;;  %v270_v40 = vmul.f32 1.442695, %v260_v37  ;;  %v247_v41 = vpop.f32.mrf.mxu2 }
 0x136   :  { %v248_v43 = vadd.f32 %v247_v41, %v3910_v4  ;;  %v2946_v44 = vadd.f32 -1.0, %v3202_v39  ;;  %470 = vmatpush.msra.mxu3 %v339_v38  ;;  %v529_v4 = vpop.permute.xlu1 %528 }
 0x137   :  { %3205 = vpow2.f32 %v270_v40 }
 0x138   :  { %v261_v46 = vmin.f32 %v248_v43, 0.0  ;;  %v281_v47 = vsel %vm251_vm11, %v222_v15, %v2946_v44  ;;  %471 = vmatpush.msra.mxu3 %v337_v42  ;;  %vm255_vm15 = vcmp.gt.f32.partialorder %v248_v43, 0.0  ;;  %v683_v44 = vpop.permute.xlu0 %682 }
 0x139   :  { %412 = vmatmul.f32.vlgmr.msrb.gmra.mxu1 %v281_v47 }
 0x13a   :  { %v3204_v49 = vpop.eup %3203  ;;  %v272_v51 = vmul.f32 1.442695, %v261_v46  ;;  %472 = vmatpush.msra.mxu3 %v335_v45  ;;  %v4002_v9 = vpop.permute.xlu2 %592 }
 0x13b   :  { %v2947_v52 = vadd.f32 -1.0, %v3204_v49 }
 0x13c   :  { %3207 = vpow2.f32 %v272_v51  ;;  %473 = vmatpush.msra.mxu3 %v333_v48 }
 0x13d   :  { %v3206_v54 = vpop.eup %3205  ;;  %v282_v55 = vsel %vm252_vm13, %v245_v24, %v2947_v52 }
 0x13e   :  { %2951 = vmatmul.msk.f32.vlgmr.msrb.gmra.mxu3 %vm366_vm12, %v282_v55  ;;  %v2949_v56 = vadd.f32 -1.0, %v3206_v54  ;;  %v3992_v5 = vpop.permute.xlu1 %558 }
 0x13f   :  { %474 = vmatpush.msra.mxu3 %v331_v53 }
 0x140   :  { %v284_v58 = vsel %vm254_vm14, %v225_v32, %v2949_v56 }
 0x141   :  { %415 = vmatmul.f32.gmra.mxu1 %v284_v58  ;;  %475 = vmatpush.msra.mxu3 %v329_v57 }
 0x142   :  { %v3208_v60 = vpop.eup %3207  ;;  %v619_v14 = vpop.permute.xlu2 %618 }
 0x143   :  { %476 = vmatpush.msra.mxu3 %v327_v59  ;;  %v2950_v62 = vadd.f32 -1.0, %v3208_v60 }
 0x145   :  { %v285_v0 = vsel %vm255_vm15, %v248_v43, %v2950_v62  ;;  %477 = vmatpush.msra.mxu3 %v325_v61 }
 0x146   :  { %2952 = vmatmul.msk.f32.gmra.mxu3 %vm366_vm12, %v285_v0  ;;  %v3994_v6 = vpop.permute.xlu1 %622 }
 0x147   :  { %478 = vmatpush.msra.mxu3 %v323_v63 }
 0x149   :  { %2953 = vmatmul.msk.f32.vlgmr.msra.gmra.mxu1 %vm366_vm12, %v282_v55  ;;  %479 = vmatpush.msra.mxu3 %v321_v50 }
 0x14a   :  { %v649_v26 = vpop.permute.xlu2 %648 }
 0x14b   :  { %480 = vmatpush.msra.mxu3 %v319_v2 }
 0x14e   :  { %481 = vmatmul.f32.vlgmr.msra.gmra.mxu3 %v281_v47  ;;  %v3996_v7 = vpop.permute.xlu1 %652 }
 0x151   :  { %2954 = vmatmul.msk.f32.gmra.mxu1 %vm366_vm12, %v285_v0  ;;  %v22_v0 = vstv %s5983_s9 }
 0x152   :  { %v713_v37 = vpop.permute.xlu2 %712  ;;  %23 = vst [vmem:[#allocation3] sm:$0x1] %v22_v0 }
 0x156   :  { %484 = vmatmul.f32.gmra.mxu3 %v284_v58  ;;  %v4000_v3 = vpop.permute.xlu1 %678 }
 0x15a   :  { %v743_v48 = vpop.permute.xlu2 %742 }
 0x15e   :  { %v709_v11 = vpop.permute.xlu1 %708 }
 0x166   :  { %v521_v24 = vpop.permute.xlu1 %520 }
 0x1ae   :  { %v390_v19 = vpop.f32.mrf.mxu3  ;;  %v459_v36 = vpop.f32.mrf.mxu2 }
 0x1b6   :  { %v393_v1 = vpop.f32.mrf.mxu3  ;;  %v413_v10 = vpop.f32.mrf.mxu1 }
 0x1b7   :  { %v414_v12 = vadd.f32 %v413_v10, %v390_v19  ;;  %v462_v54 = vpop.f32.mrf.mxu2  ;;  %v767_v10 = vld [vmem:[%s5984_s5] sm:$0xff] }
 0x1be   :  { %v416_v18 = vpop.f32.mrf.mxu1 }
 0x1bf   :  { %v417_v22 = vadd.f32 %v416_v18, %v393_v1  ;;  %v783_v1 = vld [vmem:[%s5985_s7] sm:$0xff]  ;;  %v901_v18 = vld [vmem:[%s5986_s11 + $0x10] sm:$0xff] }
 0x1c1   :  { %v436_v13 = vpop.f32.mrf.mxu3 }
 0x1c2   :  { %v4006_v15 = vadd.f32 %v436_v13, %v414_v12  ;;  %v3196_v13 = vld [vmem:[#allocation3] ss:$0 sm:$0xff] }
 0x1c4   :  { %v595_v17 = vmul.f32 %v589_v16, %v4006_v15  ;;  %v565_v20 = vmul.f32 %v3992_v5, %v4006_v15  ;;  %v535_v21 = vmul.f32 %v529_v4, %v4006_v15  ;;  %v685_v28 = vmul.f32 %v4000_v3, %v4006_v15 }
 0x1c5   :  { %v655_v29 = vmul.f32 %v649_v26, %v4006_v15  ;;  %v625_v31 = vmul.f32 %v619_v14, %v4006_v15  ;;  %v715_v33 = vmul.f32 %v709_v11, %v4006_v15 }
 0x1c6   :  { %603 = vrot.lane.b32.xlu2 %v595_v17, %s3494_s2  ;;  %573 = vrot.lane.b32.xlu1 %v565_v20, %s3495_s22  ;;  %v505_v42 = vpop.f32.mrf.mxu1  ;;  %v906_v20 = vld [vmem:[%s5986_s11 + $0x38] sm:$0xff] }
 0x1c7   :  { %543 = vrot.lane.b32.xlu0 %v535_v21, %s3496_s23  ;;  %v899_v21 = vld [vmem:[%s5986_s11] sm:$0xff] }
 0x1c9   :  { %v439_v23 = vpop.f32.mrf.mxu3 }
 0x1ca   :  { %v440_v25 = vadd.f32 %v439_v23, %v417_v22  ;;  %v904_v23 = vld [vmem:[%s5986_s11 + $0x28] sm:$0xff] }
 0x1cc   :  { %v4015_v27 = vmul.f32 %v521_v24, %v440_v25  ;;  %v537_v32 = vmul.f32 %v4004_v30, %v440_v25  ;;  %v627_v34 = vmul.f32 %v3994_v6, %v440_v25  ;;  %v567_v38 = vmul.f32 %v3998_v8, %v440_v25  ;;  %v900_v24 = vld [vmem:[%s5986_s11 + $0x8] sm:$0xff] }
 0x1cd   :  { %v717_v40 = vmul.f32 %v713_v37, %v440_v25  ;;  %v597_v41 = vmul.f32 %v4002_v9, %v440_v25  ;;  %v657_v45 = vmul.f32 %v3996_v7, %v440_v25  ;;  %v687_v47 = vmul.f32 %v683_v44, %v440_v25 }
 0x1ce   :  { %693 = vrot.lane.b32.xlu2 %v685_v28, %s3489_s29  ;;  %663 = vrot.lane.b32.xlu1 %v655_v29, %s3492_s18  ;;  %v747_v49 = vmul.f32 %v743_v48, %v440_v25  ;;  %v508_v59 = vpop.f32.mrf.mxu1  ;;  %v913_v25 = vld [vmem:[%s5986_s11 + $0x70] sm:$0xff] }
 0x1cf   :  { %633 = vrot.lane.b32.xlu0 %v625_v31, %s3491_s30  ;;  %v914_v31 = vld [vmem:[%s5986_s11 + $0x78] sm:$0xff] }
 0x1d1   :  { %v482_v35 = vpop.f32.mrf.mxu3 }
 0x1d2   :  { %v483_v39 = vadd.f32 %v482_v35, %v459_v36  ;;  %v911_v36 = vld [vmem:[%s5986_s11 + $0x60] sm:$0xff] }
 0x1d4   :  { %v506_v43 = vadd.f32 %v505_v42, %v483_v39  ;;  %v907_v39 = vld [vmem:[%s5986_s11 + $0x40] sm:$0xff]  ;;  %v908_v42 = vld [vmem:[%s5986_s11 + $0x48] sm:$0xff] }
 0x1d6   :  { %547 = vrot.lane.b32.xlu2 %v537_v32, %s3496_s23  ;;  %637 = vrot.lane.b32.xlu1 %v627_v34, %s3491_s30  ;;  %v536_v46 = vmul.f32 %v529_v4, %v506_v43  ;;  %v626_v51 = vmul.f32 %v619_v14, %v506_v43  ;;  %v596_v52 = vmul.f32 %v589_v16, %v506_v43  ;;  %v784_v14 = vld [vmem:[%s5985_s7 + $0x8] sm:$0xff]  ;;  %v905_v16 = vld [vmem:[%s5986_s11 + $0x30] sm:$0xff] }
 0x1d7   :  { %723 = vrot.lane.b32.xlu0 %v715_v33, %s6021_s3  ;;  %v566_v55 = vmul.f32 %v3992_v5, %v506_v43  ;;  %v716_v57 = vmul.f32 %v709_v11, %v506_v43  ;;  %v686_v58 = vmul.f32 %v4000_v3, %v506_v43  ;;  %v656_v61 = vmul.f32 %v649_v26, %v506_v43  ;;  %v902_v11 = vld [vmem:[%s5986_s11 + $0x18] sm:$0xff]  ;;  %v903_v32 = vld [vmem:[%s5986_s11 + $0x20] sm:$0xff] }
 0x1d8   :  { %v910_v33 = vld [vmem:[%s5986_s11 + $0x58] sm:$0xff] }
 0x1d9   :  { %v485_v53 = vpop.f32.mrf.mxu3 }
 0x1da   :  { %v486_v56 = vadd.f32 %v485_v53, %v462_v54 }
 0x1dc   :  { %v509_v60 = vadd.f32 %v508_v59, %v486_v56 }
 0x1de   :  { %577 = vrot.lane.b32.xlu2 %v567_v38, %s3495_s22  ;;  %727 = vrot.lane.b32.xlu1 %v717_v40, %s6021_s3  ;;  %v538_v62 = vmul.f32 %v4004_v30, %v509_v60  ;;  %v568_v63 = vmul.f32 %v3998_v8, %v509_v60  ;;  %v628_v50 = vmul.f32 %v3994_v6, %v509_v60  ;;  %v739_v6 = vpop.permute.xlu0 %738  ;;  %v516_v30 = vpop.permute.xlu2 %515  ;;  %v912_v38 = vld [vmem:[%s5986_s11 + $0x68] sm:$0xff] }
 0x1df   :  { %607 = vrot.lane.b32.xlu0 %v597_v41, %s3494_s2  ;;  %v598_v2 = vmul.f32 %v4002_v9, %v509_v60  ;;  %v658_v4 = vmul.f32 %v3996_v7, %v509_v60  ;;  %v718_v5 = vmul.f32 %v713_v37, %v509_v60  ;;  %v688_v8 = vmul.f32 %v683_v44, %v509_v60  ;;  %v768_v7 = vld [vmem:[%s5984_s5 + $0x8] sm:$0xff] }
 0x1e0   :  { %v748_v19 = vmul.f32 %v743_v48, %v509_v60  ;;  %v746_v3 = vmul.f32 %v739_v6, %v506_v43  ;;  %v745_v9 = vmul.f32 %v739_v6, %v4006_v15  ;;  %v909_v43 = vld [vmem:[%s5986_s11 + $0x50] sm:$0xff]  ;;  %v523_v48 = vmul.f32 %v516_v30, %v4006_v15 }
 0x1e6   :  { %667 = vrot.lane.b32.xlu2 %v657_v45, %s3492_s18  ;;  %545 = vrot.lane.b32.xlu1 %v536_v46, %s3496_s23 }
 0x1e7   :  { %697 = vrot.lane.b32.xlu0 %v687_v47, %s3489_s29 }
 0x1ee   :  { %757 = vrot.lane.b32.xlu2 %v747_v49, %s6022_s25  ;;  %635 = vrot.lane.b32.xlu1 %v626_v51, %s3491_s30 }
 0x1ef   :  { %605 = vrot.lane.b32.xlu0 %v596_v52, %s3494_s2 }
 0x1f6   :  { %575 = vrot.lane.b32.xlu2 %v566_v55, %s3495_s22  ;;  %725 = vrot.lane.b32.xlu1 %v716_v57, %s6021_s3 }
 0x1f7   :  { %695 = vrot.lane.b32.xlu0 %v686_v58, %s3489_s29 }
 0x1fe   :  { %665 = vrot.lane.b32.xlu2 %v656_v61, %s3492_s18  ;;  %549 = vrot.lane.b32.xlu1 %v538_v62, %s3496_s23  ;;  %s3508_s23 = smov 4  }
 0x1ff   :  { %579 = vrot.lane.b32.xlu0 %v568_v63, %s3495_s22 }
 0x206   :  { %639 = vrot.lane.b32.xlu2 %v628_v50, %s3491_s30  ;;  %609 = vrot.lane.b32.xlu1 %v598_v2, %s3494_s2 }
 0x207   :  { %669 = vrot.lane.b32.xlu0 %v658_v4, %s3492_s18 }
 0x20e   :  { %729 = vrot.lane.b32.xlu2 %v718_v5, %s6021_s3  ;;  %699 = vrot.lane.b32.xlu1 %v688_v8, %s3489_s29 }
 0x20f   :  { %759 = vrot.lane.b32.xlu0 %v748_v19, %s6022_s25 }
 0x216   :  { %755 = vrot.lane.b32.xlu2 %v746_v3, %s6022_s25  ;;  %753 = vrot.lane.b32.xlu1 %v745_v9, %s6022_s25 }
 0x217   :  { %776 = vperm.xlu0 %3175, %v768_v7  }
 0x21e   :  { %787 = vperm.xlu2 %3174, %v783_v1   ;;  %771 = vperm.xlu1 %3173, %v767_v10  }
 0x21f   :  { %932 = vperm.xlu0 %3175, %v902_v11  }
 0x220   :  { %v604_v12 = vpop.permute.xlu2 %603 }
 0x226   :  { %857 = vperm.xlu2 %3174, %v3196_v13   ;;  %792 = vperm.xlu1 %3173, %v784_v14  }
 0x227   :  { %947 = vperm.xlu0 %3175, %v905_v16  }
 0x228   :  { %v694_v17 = vpop.permute.xlu2 %693 }
 0x22e   :  { %927 = vperm.xlu2 %3174, %v901_v18   ;;  %952 = vperm.xlu1 %3173, %v906_v20  }
 0x22f   :  { %917 = vperm.xlu0 %3175, %v899_v21  }
 0x230   :  { %v548_v22 = vpop.permute.xlu2 %547 }
 0x236   :  { %942 = vperm.xlu2 %3174, %v904_v23   ;;  %922 = vperm.xlu1 %3173, %v900_v24  }
 0x237   :  { %987 = vperm.xlu0 %3175, %v913_v25  }
 0x238   :  { %v574_v26 = vpop.permute.xlu1 %573  ;;  %v578_v29 = vpop.permute.xlu2 %577 }
 0x239   :  { %v544_v28 = vpop.permute.xlu0 %543 }
 0x23e   :  { %992 = vperm.xlu2 %3174, %v914_v31   ;;  %937 = vperm.xlu1 %3173, %v903_v32  }
 0x23f   :  { %972 = vperm.xlu0 %3175, %v910_v33  }
 0x240   :  { %v664_v34 = vpop.permute.xlu1 %663  ;;  %v668_v37 = vpop.permute.xlu2 %667 }
 0x241   :  { %v634_v35 = vpop.permute.xlu0 %633 }
 0x246   :  { %977 = vperm.xlu2 %3174, %v911_v36   ;;  %982 = vperm.xlu1 %3173, %v912_v38   ;;  %v781_v38 = vld [vmem:[%s5987_s6] sm:$0xff] }
 0x247   :  { %957 = vperm.xlu0 %3175, %v907_v39   ;;  %v782_v39 = vld [vmem:[%s5987_s6 + $0x8] sm:$0xff] }
 0x248   :  { %v638_v41 = vpop.permute.xlu1 %637  ;;  %v758_v44 = vpop.permute.xlu2 %757 }
 0x249   :  { %v724_v40 = vpop.permute.xlu0 %723 }
 0x24e   :  { %962 = vperm.xlu2 %3174, %v908_v42   ;;  %967 = vperm.xlu1 %3173, %v909_v43   ;;  %v850_v42 = vld [vmem:[%s5988_s8 + $0x68] sm:$0xff]  ;;  %v849_v43 = vld [vmem:[%s5988_s8 + $0x60] sm:$0xff] }
 0x250   :  { %v728_v45 = vpop.permute.xlu1 %727  ;;  %v576_v47 = vpop.permute.xlu2 %575 }
 0x251   :  { %v608_v46 = vpop.permute.xlu0 %607  ;;  %v581_v54 = vsel %vm82_vm6, %v574_v26, %v576_v47  ;;  %v845_v47 = vld [vmem:[%s5988_s8 + $0x40] sm:$0xff] }
 0x258   :  { %v546_v49 = vpop.permute.xlu1 %545  ;;  %v666_v59 = vpop.permute.xlu2 %665 }
 0x259   :  { %v698_v51 = vpop.permute.xlu0 %697  ;;  %v551_v52 = vsel %vm70_vm7, %v544_v28, %v546_v49  ;;  %v671_v63 = vsel %vm118_vm3, %v664_v34, %v666_v59  ;;  %v843_v49 = vld [vmem:[%s5988_s8 + $0x30] sm:$0xff] }
 0x25a   :  { %v555_v53 = vadd.f32 %v551_v52, %v523_v48  ;;  %v844_v48 = vld [vmem:[%s5988_s8 + $0x38] sm:$0xff]  ;;  %v841_v52 = vld [vmem:[%s5988_s8 + $0x20] sm:$0xff] }
 0x25c   :  { %v585_v55 = vadd.f32 %v581_v54, %v555_v53  ;;  %v840_v53 = vld [vmem:[%s5988_s8 + $0x18] sm:$0xff]  ;;  %v839_v54 = vld [vmem:[%s5988_s8 + $0x10] sm:$0xff] }
 0x260   :  { %v636_v56 = vpop.permute.xlu1 %635  ;;  %v640_v9 = vpop.permute.xlu2 %639 }
 0x261   :  { %v606_v57 = vpop.permute.xlu0 %605  ;;  %v641_v61 = vsel %vm106_vm4, %v634_v35, %v636_v56  ;;  %v642_v14 = vsel %vm106_vm4, %v638_v41, %v640_v9  ;;  %v851_v41 = vld [vmem:[%s5988_s8 + $0x70] sm:$0xff]  ;;  %v837_v56 = vld [vmem:[%s5988_s8] sm:$0xff] }
 0x262   :  { %v611_v58 = vsel %vm94_vm5, %v604_v12, %v606_v57  ;;  %v4204_v57 = vld [vmem:[%s5989_s12] sm:$0xff] }
 0x263   :  { %v615_v60 = vadd.f32 %v611_v58, %v585_v55  ;;  %v838_v55 = vld [vmem:[%s5988_s8 + $0x8] sm:$0xff]  ;;  %v3506_v58 = vmov 0.0  }
 0x264   :  { %1188 = vmatpush.msrb.mxu3 %v3506_v58 }
 0x265   :  { %v645_v62 = vadd.f32 %v641_v61, %v615_v60  ;;  %v4211_v61 = vld [vmem:[%s5989_s12 + $0x8] sm:$0xff] }
 0x267   :  { %v675_v15 = vadd.f32 %v671_v63, %v645_v62 }
 0x268   :  { %v726_v0 = vpop.permute.xlu1 %725 }
 0x269   :  { %v696_v50 = vpop.permute.xlu0 %695  ;;  %v731_v5 = vsel %vm142_vm1, %v724_v40, %v726_v0  ;;  %v852_v40 = vld [vmem:[%s5988_s8 + $0x78] sm:$0xff] }
 0x26a   :  { %v701_v2 = vsel %vm130_vm2, %v694_v17, %v696_v50  ;;  %v730_v17 = vpop.permute.xlu2 %729  ;;  %860 = vmatpush.msrb.mxu1 %v852_v40  ;;  %v888_v40 = vld [vmem:[%s5990_s10 + $0x28] sm:$0xff] }
 0x26b   :  { %v705_v4 = vadd.f32 %v701_v2, %v675_v15  ;;  %v732_v24 = vsel %vm142_vm1, %v728_v45, %v730_v17  ;;  %v847_v45 = vld [vmem:[%s5988_s8 + $0x50] sm:$0xff] }
 0x26c   :  { %861 = vmatpush.msrb.mxu1 %v851_v41  ;;  %v4218_v2 = vld [vmem:[%s5989_s12 + $0x10] sm:$0xff]  ;;  %v896_v41 = vld [vmem:[%s5990_s10 + $0x68] sm:$0xff] }
 0x26d   :  { %v735_v8 = vadd.f32 %v731_v5, %v705_v4  ;;  %v4274_v17 = vld [vmem:[%s5989_s12 + $0x50] sm:$0xff] }
 0x26e   :  { %862 = vmatpush.msrb.mxu1 %v850_v42 }
 0x270   :  { %v550_v19 = vpop.permute.xlu1 %549  ;;  %863 = vmatpush.msrb.mxu1 %v849_v43  ;;  %v889_v43 = vld [vmem:[%s5990_s10 + $0x30] sm:$0xff] }
 0x271   :  { %v580_v6 = vpop.permute.xlu0 %579  ;;  %v552_v7 = vsel %vm70_vm7, %v548_v22, %v550_v19 }
 0x272   :  { %v556_v3 = vadd.f32 %v552_v7, %v4015_v27  ;;  %v582_v30 = vsel %vm82_vm6, %v578_v29, %v580_v6  ;;  %v756_v33 = vpop.permute.xlu2 %755 }
 0x274   :  { %v586_v1 = vadd.f32 %v582_v30, %v556_v3  ;;  %v4225_v3 = vld [vmem:[%s5989_s12 + $0x18] sm:$0xff] }
 0x278   :  { %v610_v10 = vpop.permute.xlu1 %609 }
 0x279   :  { %v670_v11 = vpop.permute.xlu0 %669  ;;  %v612_v12 = vsel %vm94_vm5, %v608_v46, %v610_v10  ;;  %v846_v46 = vld [vmem:[%s5988_s8 + $0x48] sm:$0xff]  ;;  %v4232_v10 = vld [vmem:[%s5989_s12 + $0x20] sm:$0xff] }
 0x27a   :  { %v616_v13 = vadd.f32 %v612_v12, %v586_v1  ;;  %v672_v18 = vsel %vm118_vm3, %v668_v37, %v670_v11  ;;  %v788_v59 = vpop.permute.xlu2 %787  ;;  %v4239_v11 = vld [vmem:[%s5989_s12 + $0x28] sm:$0xff]  ;;  %v4246_v12 = vld [vmem:[%s5989_s12 + $0x30] sm:$0xff] }
 0x27c   :  { %v646_v16 = vadd.f32 %v642_v14, %v616_v13  ;;  %v4253_v13 = vld [vmem:[%s5989_s12 + $0x38] sm:$0xff]  ;;  %v4260_v14 = vld [vmem:[%s5989_s12 + $0x40] sm:$0xff] }
 0x27e   :  { %v676_v20 = vadd.f32 %v672_v18, %v646_v16  ;;  %v4267_v16 = vld [vmem:[%s5989_s12 + $0x48] sm:$0xff] }
 0x280   :  { %v700_v21 = vpop.permute.xlu1 %699 }
 0x281   :  { %v760_v22 = vpop.permute.xlu0 %759  ;;  %v702_v27 = vsel %vm130_vm2, %v698_v51, %v700_v21  ;;  %vm795_vm2 = vcmask 130048   ;;  %v842_v51 = vld [vmem:[%s5988_s8 + $0x28] sm:$0xff] }
 0x282   :  { %v706_v23 = vadd.f32 %v702_v27, %v676_v20  ;;  %v762_v26 = vsel %vm154_vm0, %v758_v44, %v760_v22  ;;  %v848_v44 = vld [vmem:[%s5988_s8 + $0x58] sm:$0xff]  ;;  %v858_v21 = vpop.permute.xlu2 %857 }
 0x283   :  { %864 = vmatpush.msrb.mxu1 %v848_v44  ;;  %v4281_v20 = vld [vmem:[%s5989_s12 + $0x58] sm:$0xff]  ;;  %v897_v44 = vld [vmem:[%s5990_s10 + $0x70] sm:$0xff] }
 0x284   :  { %v736_v25 = vadd.f32 %v732_v24, %v706_v23  ;;  %v883_v24 = vld [vmem:[%s5990_s10] sm:$0xff] }
 0x285   :  { %865 = vmatpush.msrb.mxu1 %v847_v45 }
 0x286   :  { %v766_v28 = vadd.f32 %v762_v26, %v736_v25  ;;  %v891_v25 = vld [vmem:[%s5990_s10 + $0x40] sm:$0xff] }
 0x287   :  { %866 = vmatpush.msrb.mxu1 %v846_v46  ;;  %v4296_v26 = vld [vmem:[%s5989_s12 + $0x60] sm:$0xff]  ;;  %v890_v46 = vld [vmem:[%s5990_s10 + $0x38] sm:$0xff] }
 0x288   :  { %v754_v29 = vpop.permute.xlu1 %753 }
 0x289   :  { %v777_v31 = vpop.permute.xlu0 %776  ;;  %v761_v34 = vsel %vm154_vm0, %v754_v29, %v756_v33  ;;  %867 = vmatpush.msrb.mxu1 %v845_v47  ;;  %vm1124_vm0 = vcmask 261120   ;;  %v892_v29 = vld [vmem:[%s5990_s10 + $0x48] sm:$0xff]  ;;  %v893_v33 = vld [vmem:[%s5990_s10 + $0x50] sm:$0xff]  ;;  %v898_v47 = vld [vmem:[%s5990_s10 + $0x78] sm:$0xff] }
 0x28a   :  { %v780_v32 = vadd.f32 %v777_v31, %v766_v28  ;;  %v765_v35 = vadd.f32 %v761_v34, %v735_v8  ;;  %2975 = vmatmul.msk.f32.vlgmr.msrb.gmra.mxu3 %vm1124_vm0, %v4204_v57  ;;  %v884_v28 = vld [vmem:[%s5990_s10 + $0x8] sm:$0xff]  ;;  %v4326_v34 = vld [vmem:[%s5989_s12 + $0x70] sm:$0xff] }
 0x28b   :  { %868 = vmatpush.msrb.mxu1 %v844_v48  ;;  %v4311_v31 = vld [vmem:[%s5989_s12 + $0x68] sm:$0xff] }
 0x28c   :  { %816 = vmatpush.msrb.mxu0 %v780_v32  ;;  %v885_v32 = vld [vmem:[%s5990_s10 + $0x10] sm:$0xff] }
 0x28d   :  { %869 = vmatpush.msrb.mxu1 %v843_v49 }
 0x28f   :  { %870 = vmatpush.msrb.mxu1 %v842_v51 }
 0x290   :  { %v772_v36 = vpop.permute.xlu1 %771 }
 0x291   :  { %v779_v37 = vadd.f32 %v772_v36, %v765_v35  ;;  %871 = vmatpush.msrb.mxu1 %v841_v52  ;;  %v886_v35 = vld [vmem:[%s5990_s10 + $0x18] sm:$0xff] }
 0x292   :  { %2976 = vmatmul.msk.f32.gmra.mxu3 %vm1124_vm0, %v4211_v61  ;;  %v894_v36 = vld [vmem:[%s5990_s10 + $0x58] sm:$0xff] }
 0x293   :  { %817 = vmatpush.msrb.mxu0 %v779_v37  ;;  %872 = vmatpush.msrb.mxu1 %v840_v53  ;;  %v4341_v37 = vld [vmem:[%s5989_s12 + $0x78] sm:$0xff] }
 0x294   :  { %2955 = vmatmul.msk.f32.vlgmr.msrb.gmra.mxu0 %vm795_vm2, %v781_v38  ;;  %v887_v38 = vld [vmem:[%s5990_s10 + $0x20] sm:$0xff] }
 0x295   :  { %873 = vmatpush.msrb.mxu1 %v839_v54  ;;  %v933_v54 = vpop.permute.xlu0 %932 }
 0x297   :  { %874 = vmatpush.msrb.mxu1 %v838_v55 }
 0x298   :  { %v793_v0 = vpop.permute.xlu1 %792 }
 0x299   :  { %875 = vmatpush.msrb.mxu1 %v837_v56 }
 0x29a   :  { %2977 = vmatmul.msk.f32.gmra.mxu3 %vm1124_vm0, %v4218_v2 }
 0x29c   :  { %2956 = vmatmul.msk.f32.gmra.mxu0 %vm795_vm2, %v782_v39  ;;  %v895_v39 = vld [vmem:[%s5990_s10 + $0x60] sm:$0xff]  ;;  %s3507_s10 = smov 2  }
 0x29d   :  { %v4383_v56 = vpop.permute.xlu0 %947 }
 0x2a2   :  { %2978 = vmatmul.msk.f32.gmra.mxu3 %vm1124_vm0, %v4225_v3 }
 0x2aa   :  { %2979 = vmatmul.msk.f32.gmra.mxu3 %vm1124_vm0, %v4232_v10 }
 0x2b2   :  { %2980 = vmatmul.msk.f32.gmra.mxu3 %vm1124_vm0, %v4239_v11 }
 0x2ba   :  { %2981 = vmatmul.msk.f32.gmra.mxu3 %vm1124_vm0, %v4246_v12 }
 0x2c2   :  { %2982 = vmatmul.msk.f32.gmra.mxu3 %vm1124_vm0, %v4253_v13 }
 0x2ca   :  { %2983 = vmatmul.msk.f32.gmra.mxu3 %vm1124_vm0, %v4260_v14 }
 0x2d2   :  { %2984 = vmatmul.msk.f32.gmra.mxu3 %vm1124_vm0, %v4267_v16 }
 0x2da   :  { %2985 = vmatmul.msk.f32.gmra.mxu3 %vm1124_vm0, %v4274_v17 }
 0x2e2   :  { %2986 = vmatmul.msk.f32.gmra.mxu3 %vm1124_vm0, %v4281_v20 }
 0x2ea   :  { %2987 = vmatmul.msk.f32.gmra.mxu3 %vm1124_vm0, %v4296_v26 }
 0x2f2   :  { %2988 = vmatmul.msk.f32.gmra.mxu3 %vm1124_vm0, %v4311_v31 }
 0x2fa   :  { %2989 = vmatmul.msk.f32.gmra.mxu3 %vm1124_vm0, %v4326_v34 }
 0x302   :  { %2990 = vmatmul.msk.f32.gmra.mxu3 %vm1124_vm0, %v4341_v37 }
 0x30d   :  { %v1190_v42 = vpop.f32.mrf.mxu3 }
 0x311   :  { %v819_v60 = vpop.f32.mrf.mxu0 }
 0x312   :  { %v820_v62 = vadd.f32 %v819_v60, %v788_v59  ;;  %v928_v59 = vpop.permute.xlu2 %927  ;;  %v4387_v60 = vpop.permute.xlu1 %952 }
 0x314   :  { %v827_v63 = vmin.f32 %v820_v62, 0.0  ;;  %vm825_vm1 = vcmp.gt.f32.partialorder %v820_v62, 0.0 }
 0x315   :  { %v1193_v45 = vpop.f32.mrf.mxu3 }
 0x316   :  { %v829_v15 = vmul.f32 1.442695, %v827_v63 }
 0x318   :  { %3209 = vpow2.f32 %v829_v15 }
 0x319   :  { %v822_v50 = vpop.f32.mrf.mxu0 }
 0x31a   :  { %v823_v4 = vadd.f32 %v822_v50, %v793_v0 }
 0x31c   :  { %v828_v5 = vmin.f32 %v823_v4, 0.0  ;;  %vm826_vm3 = vcmp.gt.f32.partialorder %v823_v4, 0.0 }
 0x31d   :  { %v1196_v48 = vpop.f32.mrf.mxu3 }
 0x31e   :  { %v3210_v8 = vpop.eup %3209  ;;  %v831_v19 = vmul.f32 1.442695, %v828_v5  ;;  %v4394_v5 = vpop.permute.xlu2 %942 }
 0x31f   :  { %v2957_v6 = vadd.f32 -1.0, %v3210_v8  ;;  %v923_v8 = vpop.permute.xlu1 %922 }
 0x320   :  { %3211 = vpow2.f32 %v831_v19 }
 0x321   :  { %v835_v7 = vsel %vm825_vm1, %v820_v62, %v2957_v6  ;;  %v918_v62 = vpop.permute.xlu0 %917 }
 0x322   :  { %876 = vmatmul.f32.vlgmr.msrb.gmra.mxu1 %v835_v7 }
 0x325   :  { %v1199_v49 = vpop.f32.mrf.mxu3 }
 0x326   :  { %v3212_v9 = vpop.eup %3211 }
 0x327   :  { %v2958_v30 = vadd.f32 -1.0, %v3212_v9 }
 0x329   :  { %v836_v1 = vsel %vm826_vm3, %v823_v4, %v2958_v30 }
 0x32a   :  { %879 = vmatmul.f32.gmra.mxu1 %v836_v1 }
 0x32d   :  { %v1202_v51 = vpop.f32.mrf.mxu3 }
 0x335   :  { %v4377_v52 = vpop.f32.mrf.mxu3 }
 0x33d   :  { %v4379_v53 = vpop.f32.mrf.mxu3 }
 0x345   :  { %v4381_v55 = vpop.f32.mrf.mxu3 }
 0x34d   :  { %v4385_v58 = vpop.f32.mrf.mxu3 }
 0x355   :  { %v4391_v0 = vpop.f32.mrf.mxu3 }
 0x35d   :  { %v4399_v30 = vpop.f32.mrf.mxu3 }
 0x39f   :  { %v877_v18 = vpop.f32.mrf.mxu1 }
 0x3a0   :  { %v878_v23 = vadd.f32 %v877_v18, %v858_v21 }
 0x3a7   :  { %v880_v22 = vpop.f32.mrf.mxu1 }
 0x3a8   :  { %v881_v27 = vadd.f32 %v880_v22, %v858_v21  ;;  %v4401_v21 = vpop.permute.xlu0 %987 }
 0x3aa   :  { %1057 = vmatpush.msra.mxu0 %v881_v27  ;;  %3092 = vmatpush.msra.mxu2 %v881_v27  ;;  %v4403_v27 = vpop.permute.xlu2 %992 }
 0x3ac   :  { %1058 = vmatpush.msra.mxu0 %v878_v23  ;;  %3093 = vmatpush.msra.mxu2 %v878_v23 }
 0x3ad   :  { %2959 = vmatmul.msk.f32.vlgmr.msra.gmra.mxu0 %vm795_vm2, %v883_v24  ;;  %2967 = vmatmul.msk.f32.vlgmr.msra.gmra.mxu2 %vm795_vm2, %v891_v25 }
 0x3b5   :  { %2960 = vmatmul.msk.f32.gmra.mxu0 %vm795_vm2, %v884_v28  ;;  %2968 = vmatmul.msk.f32.gmra.mxu2 %vm795_vm2, %v892_v29 }
 0x3bd   :  { %2961 = vmatmul.msk.f32.gmra.mxu0 %vm795_vm2, %v885_v32  ;;  %2969 = vmatmul.msk.f32.gmra.mxu2 %vm795_vm2, %v893_v33  ;;  %v4410_v33 = vpop.f32.mrf.mxu3 }
 0x3c5   :  { %2962 = vmatmul.msk.f32.gmra.mxu0 %vm795_vm2, %v886_v35  ;;  %2970 = vmatmul.msk.f32.gmra.mxu2 %vm795_vm2, %v894_v36  ;;  %v938_v36 = vpop.permute.xlu1 %937 }
 0x3cd   :  { %2963 = vmatmul.msk.f32.gmra.mxu0 %vm795_vm2, %v887_v38  ;;  %2971 = vmatmul.msk.f32.gmra.mxu2 %vm795_vm2, %v895_v39 }
 0x3d5   :  { %2964 = vmatmul.msk.f32.gmra.mxu0 %vm795_vm2, %v888_v40  ;;  %2972 = vmatmul.msk.f32.gmra.mxu2 %vm795_vm2, %v896_v41  ;;  %v4414_v40 = vpop.permute.xlu0 %972 }
 0x3dd   :  { %2965 = vmatmul.msk.f32.gmra.mxu0 %vm795_vm2, %v889_v43  ;;  %2973 = vmatmul.msk.f32.gmra.mxu2 %vm795_vm2, %v897_v44 }
 0x3e5   :  { %2966 = vmatmul.msk.f32.gmra.mxu0 %vm795_vm2, %v890_v46  ;;  %2974 = vmatmul.msk.f32.gmra.mxu2 %vm795_vm2, %v898_v47 }
 0x42a   :  { %v1060_v63 = vpop.f32.mrf.mxu0 }
 0x42b   :  { %v4389_v15 = vadd.f32 %v1060_v63, %v918_v62  ;;  %v983_v62 = vpop.permute.xlu1 %982 }
 0x42d   :  { %v1238_v50 = vadd.f32 %v1190_v42, %v4389_v15  ;;  %v978_v42 = vpop.permute.xlu2 %977 }
 0x42f   :  { %v2991_v6 = vmul.f32 -1.442695, %v1238_v50 }
 0x430   :  { %v1084_v4 = vpop.f32.mrf.mxu2 }
 0x431   :  { %3213 = vpow2.f32 %v2991_v6 }
 0x432   :  { %v1063_v19 = vpop.f32.mrf.mxu0 }
 0x433   :  { %v4396_v7 = vadd.f32 %v1063_v19, %v923_v8  ;;  %v958_v8 = vpop.permute.xlu0 %957 }
 0x435   :  { %v1239_v9 = vadd.f32 %v1193_v45, %v4396_v7 }
 0x437   :  { %v2992_v1 = vmul.f32 -1.442695, %v1239_v9  ;;  %v3214_v24 = vpop.eup %3213  ;;  %v963_v9 = vpop.permute.xlu2 %962 }
 0x438   :  { %v1087_v18 = vpop.f32.mrf.mxu2  ;;  %v4408_v29 = vadd.f32 1.0, %v3214_v24 }
 0x439   :  { %3215 = vpow2.f32 %v2992_v1  ;;  %v4435_v1 = vadd.f32 %v1084_v4, %v958_v8 }
 0x43a   :  { %v1066_v22 = vpop.f32.mrf.mxu0  ;;  %vm1307_vm4 = vweird.f32 %v4408_v29 }
 0x43b   :  { %v4405_v23 = vadd.f32 %v1066_v22, %v928_v59  ;;  %v1226_v59 = vpop.f32.mrf.mxu3  ;;  %6024 = vst [vmem:[#allocation5_spill] sm:$0xff] %v4435_v1  ;;  %v4437_v22 = vadd.f32 %v1087_v18, %v963_v9  ;;  %v1311_v18 = vand.u32 2147483647, %v4408_v29 }
 0x43d   :  { %v1240_v25 = vadd.f32 %v1196_v48, %v4405_v23  ;;  %6025 = vst [vmem:[#allocation6_spill] sm:$0xff] %v4437_v22  ;;  %vm4469_vm6 = vcmp.eq.f32.partialorder %v1311_v18, 8.507059e+37 }
 0x43f   :  { %v2993_v28 = vmul.f32 -1.442695, %v1240_v25  ;;  %v3216_v35 = vpop.eup %3215 }
 0x440   :  { %v1090_v32 = vpop.f32.mrf.mxu2  ;;  %v4417_v41 = vadd.f32 1.0, %v3216_v35 }
 0x441   :  { %3217 = vpow2.f32 %v2993_v28 }
 0x442   :  { %v1069_v38 = vpop.f32.mrf.mxu0  ;;  %3219 = vrcp.f32 %v4408_v29  ;;  %vm1322_vm8 = vweird.f32 %v4417_v41 }
 0x443   :  { %v4412_v39 = vadd.f32 %v1069_v38, %v933_v54  ;;  %3221 = vrcp.f32 %v4417_v41 }
 0x445   :  { %v1241_v43 = vadd.f32 %v1199_v49, %v4412_v39 }
 0x447   :  { %v3218_v44 = vpop.eup %3217  ;;  %v2994_v45 = vmul.f32 -1.442695, %v1241_v43 }
 0x448   :  { %v4421_v46 = vpop.f32.mrf.mxu2  ;;  %v4423_v47 = vpop.eup %3219  ;;  %v4425_v48 = vadd.f32 1.0, %v3218_v44  ;;  %v1247_v44 = vadd.f32 %v4391_v0, %v4437_v22  ;;  %v1313_v0 = vand.u32 2147483648, %v4408_v29 }
 0x449   :  { %3223 = vpow2.f32 %v2994_v45  ;;  %v1303_v50 = vmul.f32 %v4423_v47, %v4408_v29  ;;  %v4431_v49 = vpop.eup %3221  ;;  %vm1308_vm5 = vweird.f32 %v4423_v47  ;;  %v4504_v29 = vadd.f32 %v4421_v46, %v4414_v40 }
 0x44a   :  { %v1072_v54 = vpop.f32.mrf.mxu0  ;;  %3225 = vrcp.f32 %v4425_v48  ;;  %v1318_v38 = vmul.f32 %v4431_v49, %v4417_v41  ;;  %vm4491_vm7 = vmor %vm1307_vm4, %vm1308_vm5  ;;  %vm1323_vm9 = vweird.f32 %v4431_v49  ;;  %vm1337_vm11 = vweird.f32 %v4425_v48 }
 0x44b   :  { %v4427_v63 = vadd.f32 %v1072_v54, %v938_v36  ;;  %v1304_v35 = vsub.f32 1.0, %v1303_v50  ;;  %v1229_v54 = vpop.f32.mrf.mxu3  ;;  %v968_v50 = vpop.permute.xlu1 %967  ;;  %6033 = vst [vmem:[#allocation10_spill] sm:$0xff] %v4504_v29  ;;  %vm4525_vm12 = vmor %vm1322_vm8, %vm1323_vm9 }
 0x44d   :  { %6023 = vst [vmem:[#allocation4_spill] sm:$0xff] %v4427_v63  ;;  %v1242_v19 = vadd.f32 %v1202_v51, %v4427_v63  ;;  %v1246_v51 = vadd.f32 %v4385_v58, %v4435_v1  ;;  %v1305_v8 = vmul.f32 %v4423_v47, %v1304_v35 }
 0x44f   :  { %v3224_v6 = vpop.eup %3223  ;;  %v2995_v25 = vmul.f32 -1.442695, %v1242_v19  ;;  %v1319_v19 = vsub.f32 1.0, %v1318_v38  ;;  %v1306_v35 = vadd.f32 %v4423_v47, %v1305_v8  ;;  %v1326_v38 = vand.u32 2147483647, %v4417_v41 }
 0x450   :  { %v4439_v24 = vadd.f32 1.0, %v3224_v6  ;;  %v1096_v28 = vpop.f32.mrf.mxu2  ;;  %v4448_v4 = vpop.eup %3225  ;;  %v4458_v6 = vadd.f32 %v1090_v32, %v968_v50 }
 0x451   :  { %v4441_v36 = vadd.f32 %v1096_v28, %v978_v42  ;;  %vm4512_vm10 = vcmp.eq.f32.partialorder %v1326_v38, 8.507059e+37  ;;  %vm1338_vm13 = vweird.f32 %v4448_v4 }
 0x452   :  { %3227 = vrcp.f32 %v4439_v24  ;;  %v1075_v43 = vpop.f32.mrf.mxu0  ;;  %6027 = vst [vmem:[#allocation8_spill] sm:$0xff] %v4458_v6  ;;  %vm4568_vm15 = vmor %vm1337_vm11, %vm1338_vm13  ;;  %vm1352_vm2 = vweird.f32 %v4439_v24 }
 0x453   :  { %6026 = vst [vmem:[#allocation7_spill] sm:$0xff] %v4441_v36  ;;  %3229 = vpow2.f32 %v2995_v25  ;;  %v4454_v42 = vadd.f32 %v1075_v43, %v4394_v5  ;;  %v1250_v45 = vadd.f32 %v1226_v59, %v4441_v36  ;;  %v1333_v5 = vmul.f32 %v4448_v4, %v4425_v48 }
 0x454   :  { %3231 = vtanh.f32 %v1246_v51  ;;  %v1320_v51 = vmul.f32 %v4431_v49, %v1319_v19  ;;  %v1249_v25 = vadd.f32 %v4410_v33, %v4504_v29 }
 0x455   :  { %v1243_v58 = vadd.f32 %v4377_v52, %v4454_v42  ;;  %v2999_v9 = vmul.f32 -1.442695, %v1250_v45  ;;  %3233 = vtanh.f32 %v1247_v44  ;;  %v1248_v45 = vadd.f32 %v4399_v30, %v4458_v6 }
 0x456   :  { %v1328_v44 = vand.u32 2147483648, %v4417_v41  ;;  %v1314_v30 = vor.u32 1.1754944e-38, %v1313_v0 }
 0x457   :  { %v2996_v32 = vmul.f32 -1.442695, %v1243_v58  ;;  %3235 = vpow2.f32 %v2999_v9  ;;  %v1334_v58 = vsub.f32 1.0, %v1333_v5 }
 0x458   :  { %v4466_v59 = vpop.eup %3227  ;;  %v1099_v52 = vpop.f32.mrf.mxu2 }
 0x459   :  { %v3230_v28 = vpop.eup %3229  ;;  %v4475_v43 = vadd.f32 %v1099_v52, %v983_v62  ;;  %3237 = vpow2.f32 %v2996_v32  ;;  %v1348_v19 = vmul.f32 %v4466_v59, %v4439_v24  ;;  %v1321_v32 = vadd.f32 %v4431_v49, %v1320_v51 }
 0x45a   :  { %v4480_v18 = vadd.f32 1.0, %v3230_v28  ;;  %v1078_v50 = vpop.f32.mrf.mxu0  ;;  %v1335_v40 = vmul.f32 %v4448_v4, %v1334_v58  ;;  %v1341_v51 = vand.u32 2147483647, %v4425_v48  ;;  %v1356_v52 = vand.u32 2147483647, %v4439_v24 }
 0x45b   :  { %6030 = vst [vmem:[#allocation9_spill] sm:$0xff] %v4475_v43  ;;  %v4484_v22 = vadd.f32 %v1078_v50, %v4383_v56  ;;  %v1251_v8 = vadd.f32 %v1229_v54, %v4475_v43  ;;  %v3232_v56 = vpop.eup %3231  ;;  %v1310_v54 = vsel %vm4491_vm7, %v4423_v47, %v1306_v35  ;;  %v1232_v47 = vpop.f32.mrf.mxu3  ;;  %v1329_v35 = vor.u32 1.1754944e-38, %v1328_v44 }
 0x45c   :  { %3239 = vrcp.f32 %v4480_v18  ;;  %v4508_v5 = vpop.eup %3233  ;;  %v1315_v50 = vsel %vm4469_vm6, %v1314_v30, %v1310_v54  ;;  %v1349_v38 = vsub.f32 1.0, %v1348_v19  ;;  %v1343_v44 = vand.u32 2147483648, %v4425_v48 }
 0x45d   :  { %v1244_v9 = vadd.f32 %v4379_v53, %v4484_v22  ;;  %v3000_v0 = vmul.f32 -1.442695, %v1251_v8  ;;  %3241 = vtanh.f32 %v1248_v45  ;;  %v3236_v28 = vpop.eup %3235  ;;  %v1325_v41 = vsel %vm4525_vm12, %v4431_v49, %v1321_v32 }
 0x45e   :  { %v4543_v19 = vadd.f32 1.0, %v3236_v28  ;;  %vm4554_vm14 = vcmp.eq.f32.partialorder %v1341_v51, 8.507059e+37  ;;  %v1350_v32 = vmul.f32 %v4466_v59, %v1349_v38  ;;  %vm1353_vm1 = vweird.f32 %v4466_v59 }
 0x45f   :  { %v2997_v46 = vmul.f32 -1.442695, %v1244_v9  ;;  %3243 = vpow2.f32 %v3000_v0  ;;  %v3238_v53 = vpop.eup %3237  ;;  %v1336_v9 = vadd.f32 %v4448_v4, %v1335_v40  ;;  %vm4602_vm4 = vmor %vm1352_vm2, %vm1353_vm1  ;;  %vm1367_vm5 = vweird.f32 %v4480_v18 }
 0x460   :  { %v1102_v8 = vpop.f32.mrf.mxu2  ;;  %v4532_v58 = vadd.f32 1.0, %v3238_v53  ;;  %v4552_v53 = vmul.f32 %v3232_v56, %v1315_v50  ;;  %v1351_v48 = vadd.f32 %v4466_v59, %v1350_v32  ;;  %v1371_v32 = vand.u32 2147483647, %v4480_v18 }
 0x461   :  { %v4535_v62 = vadd.f32 %v1102_v8, %v4401_v21  ;;  %3245 = vpow2.f32 %v2997_v46  ;;  %v1344_v46 = vor.u32 1.1754944e-38, %v1343_v44  ;;  %vm1357_vm6 = vcmp.eq.f32.partialorder %v1356_v52, 8.507059e+37 }
 0x462   :  { %v4537_v30 = vpop.eup %3239  ;;  %v1081_v54 = vpop.f32.mrf.mxu0  ;;  %3247 = vrcp.f32 %v4532_v58  ;;  %v1355_v49 = vsel %vm4602_vm4, %v4466_v59, %v1351_v48  ;;  %vm1372_vm8 = vcmp.eq.f32.partialorder %v1371_v32, 8.507059e+37  ;;  %vm1427_vm13 = vweird.f32 %v4543_v19 }
 0x463   :  { %6038 = vst [vmem:[#allocation11_spill] sm:$0xff] %v4535_v62  ;;  %v1363_v33 = vmul.f32 %v4537_v30, %v4480_v18  ;;  %v4550_v21 = vadd.f32 %v1081_v54, %v4387_v60  ;;  %v3242_v0 = vpop.eup %3241  ;;  %v1252_v28 = vadd.f32 %v1232_v47, %v4535_v62  ;;  %3249 = vtanh.f32 %v1249_v25  ;;  %v1235_v44 = vpop.f32.mrf.mxu3 }
 0x464   :  { %v1330_v60 = vsel %vm4512_vm10, %v1329_v35, %v1325_v41  ;;  %3251 = vrcp.f32 %v4543_v19  ;;  %vm1368_vm3 = vweird.f32 %v4537_v30  ;;  %vm1382_vm10 = vweird.f32 %v4532_v58 }
 0x465   :  { %6039 = vst [vmem:[#allocation12_spill] sm:$0xff] %v4550_v21  ;;  %v3244_v40 = vpop.eup %3243  ;;  %v1364_v8 = vsub.f32 1.0, %v1363_v33  ;;  %v1245_v45 = vadd.f32 %v4381_v55, %v4550_v21  ;;  %v3001_v50 = vmul.f32 -1.442695, %v1252_v28  ;;  %v1340_v55 = vsel %vm4568_vm15, %v4448_v4, %v1336_v9  ;;  %vm4621_vm7 = vmor %vm1367_vm5, %vm1368_vm3 }
 0x466   :  { %v4573_v47 = vadd.f32 1.0, %v3244_v40  ;;  %v1358_v4 = vand.u32 2147483648, %v4439_v24  ;;  %v1345_v40 = vsel %vm4554_vm14, %v1344_v46, %v1340_v55  ;;  %v4617_v24 = vmul.f32 %v4508_v5, %v1330_v60 }
 0x467   :  { %v2998_v35 = vmul.f32 -1.442695, %v1245_v45  ;;  %v3246_v51 = vpop.eup %3245  ;;  %v1365_v25 = vmul.f32 %v4537_v30, %v1364_v8  ;;  %v1373_v45 = vand.u32 2147483648, %v4480_v18  ;;  %v4627_v59 = vmul.f32 %v3242_v0, %v1345_v40 }
 0x468   :  { %3253 = vrcp.f32 %v4573_v47  ;;  %v1105_v38 = vpop.f32.mrf.mxu2  ;;  %v4584_v41 = vpop.eup %3247  ;;  %v4587_v54 = vadd.f32 1.0, %v3246_v51  ;;  %v1359_v55 = vor.u32 1.1754944e-38, %v1358_v4  ;;  %v1386_v0 = vand.u32 2147483647, %v4532_v58 }
 0x469   :  { %3255 = vpow2.f32 %v2998_v35  ;;  %v4590_v9 = vadd.f32 %v1105_v38, %v4403_v27  ;;  %v1378_v33 = vmul.f32 %v4584_v41, %v4532_v58  ;;  %v3250_v28 = vpop.eup %3249  ;;  %v1431_v40 = vand.u32 2147483647, %v4543_v19 }
 0x46a   :  { %3257 = vpow2.f32 %v3001_v50  ;;  %v4609_v56 = vpop.eup %3251  ;;  %v1366_v50 = vadd.f32 %v4537_v30, %v1365_v25  ;;  %v1360_v60 = vsel %vm1357_vm6, %v1359_v55, %v1355_v49  ;;  %vm1383_vm9 = vweird.f32 %v4584_v41 }
 0x46b   :  { %6044 = vst [vmem:[#allocation13_spill] sm:$0xff] %v4590_v9  ;;  %3259 = vrcp.f32 %v4587_v54  ;;  %v1253_v27 = vadd.f32 %v1235_v44, %v4590_v9  ;;  %v1379_v46 = vsub.f32 1.0, %v1378_v33  ;;  %v1423_v52 = vmul.f32 %v4609_v56, %v4543_v19  ;;  %vm4653_vm11 = vmor %vm1382_vm10, %vm1383_vm9 }
 0x46c   :  { %v1370_v18 = vsel %vm4621_vm7, %v4537_v30, %v1366_v50  ;;  %v1374_v44 = vor.u32 1.1754944e-38, %v1373_v45  ;;  %v1388_v33 = vand.u32 2147483648, %v4532_v58  ;;  %v4644_v49 = vmul.f32 %v3250_v28, %v1360_v60 }
 0x46d   :  { %v3002_v35 = vmul.f32 -1.442695, %v1253_v27  ;;  %v1380_v48 = vmul.f32 %v4584_v41, %v1379_v46  ;;  %v1401_v50 = vand.u32 2147483647, %v4587_v54  ;;  %v1424_v55 = vsub.f32 1.0, %v1423_v52 }
 0x46e   :  { %v4625_v38 = vpop.eup %3253  ;;  %v1375_v32 = vsel %vm1372_vm8, %v1374_v44, %v1370_v18  ;;  %vm4657_vm12 = vcmp.eq.f32.partialorder %v1386_v0, 8.507059e+37  ;;  %v1403_v60 = vand.u32 2147483648, %v4587_v54  ;;  %v1433_v52 = vand.u32 2147483648, %v4543_v19 }
 0x46f   :  { %v3256_v5 = vpop.eup %3255  ;;  %3261 = vpow2.f32 %v3002_v35  ;;  %v1381_v30 = vadd.f32 %v4584_v41, %v1380_v48  ;;  %v1438_v46 = vmul.f32 %v4625_v38, %v4573_v47  ;;  %v1389_v48 = vor.u32 1.1754944e-38, %v1388_v33 }
 0x470   :  { %v3258_v25 = vpop.eup %3257  ;;  %v4635_v4 = vadd.f32 1.0, %v3256_v5  ;;  %v1486_v18 = vmul.f32 0.0, %v1375_v32  ;;  %vm1397_vm14 = vweird.f32 %v4587_v54  ;;  %vm4672_vm2 = vcmp.eq.f32.partialorder %v1401_v50, 8.507059e+37 }
 0x471   :  { %v3260_v8 = vpop.eup %3259  ;;  %v4640_v27 = vadd.f32 1.0, %v3258_v25  ;;  %v1385_v44 = vsel %vm4653_vm11, %v4584_v41, %v1381_v30  ;;  %v1425_v41 = vmul.f32 %v4609_v56, %v1424_v55  ;;  %vm1428_vm1 = vweird.f32 %v4609_v56 }
 0x472   :  { %v1393_v45 = vmul.f32 %v3260_v8, %v4587_v54  ;;  %3263 = vrcp.f32 %v4635_v4  ;;  %vm1398_vm15 = vweird.f32 %v3260_v8  ;;  %v1390_v51 = vsel %vm4657_vm12, %v1389_v48, %v1385_v44  ;;  %vm4719_vm11 = vmor %vm1427_vm13, %vm1428_vm1 }
 0x473   :  { %3265 = vrcp.f32 %v4640_v27  ;;  %v1404_v58 = vor.u32 1.1754944e-38, %v1403_v60  ;;  %vm1442_vm3 = vweird.f32 %v4573_v47  ;;  %vm4688_vm4 = vcmp.eq.f32.partialorder %v1431_v40, 8.507059e+37  ;;  %vm1399_vm6 = vmor %vm1397_vm14, %vm1398_vm15 }
 0x474   :  { %v1394_v35 = vsub.f32 1.0, %v1393_v45  ;;  %v1439_v45 = vsub.f32 1.0, %v1438_v46  ;;  %v4682_v46 = vadd.f32 %v4552_v53, %v1486_v18  ;;  %v1434_v33 = vor.u32 1.1754944e-38, %v1433_v52 }
 0x475   :  { %v3262_v5 = vpop.eup %3261  ;;  %v1416_v48 = vand.u32 2147483647, %v4635_v4  ;;  %vm1506_vm5 = vcmask 15360   ;;  %vm1443_vm7 = vweird.f32 %v4625_v38  ;;  %v1487_v60 = vmul.f32 0.0, %v1390_v51 }
 0x476   :  { %v4668_v25 = vadd.f32 1.0, %v3262_v5  ;;  %v1395_v0 = vmul.f32 %v3260_v8, %v1394_v35  ;;  %v1440_v53 = vmul.f32 %v4625_v38, %v1439_v45  ;;  %v1426_v44 = vadd.f32 %v4609_v56, %v1425_v41  ;;  %vm4743_vm15 = vmor %vm1442_vm3, %vm1443_vm7 }
 0x477   :  { %v1418_v52 = vand.u32 2147483648, %v4635_v4  ;;  %v4706_v45 = vadd.f32 %v4617_v24, %v1487_v60  ;;  %vm1412_vm9 = vweird.f32 %v4635_v4  ;;  %vm4709_vm10 = vcmp.eq.f32.partialorder %v1416_v48, 8.507059e+37 }
 0x478   :  { %v3264_v30 = vpop.eup %3263  ;;  %3267 = vrcp.f32 %v4668_v25  ;;  %v1396_v5 = vadd.f32 %v3260_v8, %v1395_v0  ;;  %v1463_v48 = vand.u32 2147483648, %v4640_v27  ;;  %vm1457_vm13 = vweird.f32 %v4640_v27 }
 0x479   :  { %v4684_v35 = vpop.eup %3265  ;;  %v1408_v50 = vmul.f32 %v3264_v30, %v4635_v4  ;;  %3269 = vtanh.f32 %v4682_v46  ;;  %vm1413_vm8 = vweird.f32 %v3264_v30 }
 0x47a   :  { %v1453_v28 = vmul.f32 %v4684_v35, %v4640_v27  ;;  %v1400_v40 = vsel %vm1399_vm6, %v3260_v8, %v1396_v5  ;;  %vm1414_vm12 = vmor %vm1412_vm9, %vm1413_vm8  ;;  %vm1458_vm14 = vweird.f32 %v4684_v35  ;;  %3271 = vtanh.f32 %v4706_v45 }
 0x47b   :  { %v1409_v18 = vsub.f32 1.0, %v1408_v50  ;;  %v1405_v0 = vsel %vm4672_vm2, %v1404_v58, %v1400_v40  ;;  %v1441_v58 = vadd.f32 %v4625_v38, %v1440_v53  ;;  %v1419_v50 = vor.u32 1.1754944e-38, %v1418_v52  ;;  %vm4749_vm2 = vmor %vm1457_vm13, %vm1458_vm14 }
 0x47c   :  { %v1454_v1 = vsub.f32 1.0, %v1453_v28  ;;  %v1488_v54 = vmul.f32 0.0, %v1405_v0  ;;  %v6065_v0 = vand.u32 2147483648, %v4573_v47  ;;  %v1464_v55 = vor.u32 1.1754944e-38, %v1463_v48 }
 0x47d   :  { %v1410_v36 = vmul.f32 %v3264_v30, %v1409_v18  ;;  %v6066_v8 = vand.u32 2147483647, %v4573_v47  ;;  %vm1472_vm6 = vweird.f32 %v4668_v25 }
 0x47e   :  { %v3268_v6 = vpop.eup %3267  ;;  %v1455_v41 = vmul.f32 %v4684_v35, %v1454_v1  ;;  %v4725_v4 = vadd.f32 %v4627_v59, %v1488_v54  ;;  %v1430_v1 = vsel %vm4719_vm11, %v4609_v56, %v1426_v44  ;;  %v1461_v56 = vand.u32 2147483647, %v4640_v27 }
 0x47f   :  { %v1468_v24 = vmul.f32 %v3268_v6, %v4668_v25  ;;  %v1411_v51 = vadd.f32 %v3264_v30, %v1410_v36  ;;  %v3270_v36 = vpop.eup %3269  ;;  %v1445_v27 = vsel %vm4743_vm15, %v4625_v38, %v1441_v58  ;;  %v1449_v54 = vor.u32 1.1754944e-38, %v6065_v0 }
 0x480   :  { %v1456_v5 = vadd.f32 %v4684_v35, %v1455_v41  ;;  %3273 = vtanh.f32 %v4725_v4  ;;  %vm1447_vm1 = vcmp.eq.f32.partialorder %v6066_v8, 8.507059e+37  ;;  %v3272_v41 = vpop.eup %3271  ;;  %vm1473_vm3 = vweird.f32 %v3268_v6 }
 0x481   :  { %v1469_v19 = vsub.f32 1.0, %v1468_v24  ;;  %v1415_v28 = vsel %vm1414_vm12, %v3264_v30, %v1411_v51  ;;  %v1435_v30 = vsel %vm4688_vm4, %v1434_v33, %v1430_v1  ;;  %vm1462_vm4 = vcmp.eq.f32.partialorder %v1461_v56, 8.507059e+37  ;;  %vm1474_vm7 = vmor %vm1472_vm6, %vm1473_vm3 }
 0x482   :  { %v1420_v59 = vsel %vm4709_vm10, %v1419_v50, %v1415_v28  ;;  %v1502_v44 = vmul.f32 %v3270_v36, %v1435_v30  ;;  %v1460_v52 = vsel %vm4749_vm2, %v4684_v35, %v1456_v5  ;;  %v1450_v38 = vsel %vm1447_vm1, %v1449_v54, %v1445_v27 }
 0x483   :  { %v1470_v18 = vmul.f32 %v3268_v6, %v1469_v19  ;;  %v1489_v40 = vmul.f32 0.0, %v1420_v59  ;;  %v1478_v35 = vand.u32 2147483648, %v4668_v25  ;;  %v1465_v24 = vsel %vm1462_vm4, %v1464_v55, %v1460_v52 }
 0x484   :  { %1507 = vst.msk [vmem:[#allocation2] sm:$0xff] %vm1506_vm5, %v1502_v44  ;;  %v1503_v51 = vmul.f32 %v3272_v41, %v1450_v38 }
 0x485   :  { %v4762_v33 = vadd.f32 %v4644_v49, %v1489_v40  ;;  %v1471_v32 = vadd.f32 %v3268_v6, %v1470_v18  ;;  %v1476_v49 = vand.u32 2147483647, %v4668_v25  ;;  %v1479_v50 = vor.u32 1.1754944e-38, %v1478_v35 }
 0x486   :  { %v3274_v58 = vpop.eup %3273  ;;  %1508 = vst.msk [vmem:[#allocation2 + $0x8] sm:$0xff] %vm1506_vm5, %v1503_v51 }
 0x487   :  { %3275 = vtanh.f32 %v4762_v33  ;;  %v1504_v47 = vmul.f32 %v3274_v58, %v1465_v24  ;;  %v1475_v1 = vsel %vm1474_vm7, %v3268_v6, %v1471_v32  ;;  %vm1477_vm8 = vcmp.eq.f32.partialorder %v1476_v49, 8.507059e+37 }
 0x488   :  { %v1480_v19 = vsel %vm1477_vm8, %v1479_v50, %v1475_v1 }
 0x489   :  { %1509 = vst.msk [vmem:[#allocation2 + $0x10] sm:$0xff] %vm1506_vm5, %v1504_v47 }
 0x48d   :  { %v3276_v5 = vpop.eup %3275 }
 0x48e   :  { %v1505_v28 = vmul.f32 %v3276_v5, %v1480_v19 }
 0x490   :  { %1510 = vst.msk [vmem:[#allocation2 + $0x18] sm:$0xff] %vm1506_vm5, %v1505_v28  ;;  %1523 = vmatpush.msrb.mxu0 %v1505_v28 }
 0x492   :  { %1524 = vmatpush.msrb.mxu0 %v1504_v47 }
 0x494   :  { %1525 = vmatpush.msrb.mxu0 %v1503_v51 }
 0x496   :  { %1526 = vmatpush.msrb.mxu0 %v1502_v44 }
 0x497   :  { %3003 = vmatmul.msk.f32.vlgmr.msrb.gmra.mxu0 %vm1124_vm0, %v4204_v57 }
 0x49f   :  { %3004 = vmatmul.msk.f32.gmra.mxu0 %vm1124_vm0, %v4211_v61 }
 0x4a7   :  { %3005 = vmatmul.msk.f32.gmra.mxu0 %vm1124_vm0, %v4218_v2 }
 0x4af   :  { %3006 = vmatmul.msk.f32.gmra.mxu0 %vm1124_vm0, %v4225_v3 }
 0x4b7   :  { %3007 = vmatmul.msk.f32.gmra.mxu0 %vm1124_vm0, %v4232_v10 }
 0x4bf   :  { %3008 = vmatmul.msk.f32.gmra.mxu0 %vm1124_vm0, %v4239_v11 }
 0x4c7   :  { %3009 = vmatmul.msk.f32.gmra.mxu0 %vm1124_vm0, %v4246_v12 }
 0x4cf   :  { %3010 = vmatmul.msk.f32.gmra.mxu0 %vm1124_vm0, %v4253_v13 }
 0x4d7   :  { %3011 = vmatmul.msk.f32.gmra.mxu0 %vm1124_vm0, %v4260_v14 }
 0x4df   :  { %3012 = vmatmul.msk.f32.gmra.mxu0 %vm1124_vm0, %v4267_v16 }
 0x4e7   :  { %3013 = vmatmul.msk.f32.gmra.mxu0 %vm1124_vm0, %v4274_v17 }
 0x4ef   :  { %3014 = vmatmul.msk.f32.gmra.mxu0 %vm1124_vm0, %v4281_v20 }
 0x4f7   :  { %3015 = vmatmul.msk.f32.gmra.mxu0 %vm1124_vm0, %v4296_v26 }
 0x4ff   :  { %3016 = vmatmul.msk.f32.gmra.mxu0 %vm1124_vm0, %v4311_v31 }
 0x507   :  { %3017 = vmatmul.msk.f32.gmra.mxu0 %vm1124_vm0, %v4326_v34 }
 0x50f   :  { %3018 = vmatmul.msk.f32.gmra.mxu0 %vm1124_vm0, %v4341_v37 }
 0x514   :  { %v1528_v57 = vpop.f32.mrf.mxu0 }
 0x515   :  { %1592 = vrot.lane.b32.xlu1 %v1528_v57, %s3507_s10 }
 0x51c   :  { %v1531_v61 = vpop.f32.mrf.mxu0 }
 0x51d   :  { %1594 = vrot.lane.b32.xlu2 %v1531_v61, %s3507_s10 }
 0x524   :  { %v1534_v2 = vpop.f32.mrf.mxu0 }
 0x525   :  { %1596 = vrot.lane.b32.xlu0 %v1534_v2, %s3507_s10 }
 0x52c   :  { %v1537_v3 = vpop.f32.mrf.mxu0 }
 0x52d   :  { %1598 = vrot.lane.b32.xlu1 %v1537_v3, %s3507_s10 }
 0x534   :  { %v1540_v10 = vpop.f32.mrf.mxu0 }
 0x53c   :  { %v1543_v11 = vpop.f32.mrf.mxu0 }
 0x53d   :  { %1602 = vrot.lane.b32.xlu0 %v1543_v11, %s3507_s10 }
 0x544   :  { %v1546_v12 = vpop.f32.mrf.mxu0 }
 0x545   :  { %1604 = vrot.lane.b32.xlu1 %v1546_v12, %s3507_s10 }
 0x54c   :  { %v1549_v13 = vpop.f32.mrf.mxu0 }
 0x54d   :  { %1606 = vrot.lane.b32.xlu2 %v1549_v13, %s3507_s10 }
 0x554   :  { %v1552_v14 = vpop.f32.mrf.mxu0 }
 0x555   :  { %1600 = vrot.lane.b32.xlu2 %v1540_v10, %s3507_s10 }
 0x55c   :  { %v1555_v16 = vpop.f32.mrf.mxu0 }
 0x564   :  { %v1558_v17 = vpop.f32.mrf.mxu0 }
 0x56c   :  { %v1561_v20 = vpop.f32.mrf.mxu0 }
 0x574   :  { %v1564_v26 = vpop.f32.mrf.mxu0 }
 0x577   :  { %v1595_v6 = vpop.permute.xlu2 %1594 }
 0x578   :  { %v1641_v48 = vadd.f32 %v1595_v6, %v4396_v7 }
 0x57a   :  { %v3020_v59 = vmul.f32 -1.442695, %v1641_v48 }
 0x57c   :  { %v1567_v31 = vpop.f32.mrf.mxu0  ;;  %3277 = vpow2.f32 %v3020_v59 }
 0x57d   :  { %1618 = vrot.lane.b32.xlu2 %v1567_v31, %s3507_s10 }
 0x584   :  { %v1570_v34 = vpop.f32.mrf.mxu0 }
 0x585   :  { %1612 = vrot.lane.b32.xlu2 %v1558_v17, %s3507_s10  ;;  %1620 = vrot.lane.b32.xlu1 %v1570_v34, %s3507_s10 }
 0x587   :  { %v1593_v25 = vpop.permute.xlu1 %1592 }
 0x588   :  { %v1640_v36 = vadd.f32 %v1593_v25, %v4389_v15 }
 0x58a   :  { %v3019_v56 = vmul.f32 -1.442695, %v1640_v36 }
 0x58c   :  { %v1573_v37 = vpop.f32.mrf.mxu0  ;;  %3279 = vpow2.f32 %v3019_v56 }
 0x58d   :  { %1898 = vrot.lane.b32.xlu2 %v4762_v33, %s3507_s10  ;;  %1614 = vrot.lane.b32.xlu1 %v1561_v20, %s3507_s10 }
 0x58e   :  { %1622 = vrot.lane.b32.xlu0 %v1573_v37, %s3507_s10 }
 0x595   :  { %1892 = vrot.lane.b32.xlu2 %v4682_v46, %s3507_s10  ;;  %1608 = vrot.lane.b32.xlu1 %v1552_v14, %s3507_s10 }
 0x596   :  { %1616 = vrot.lane.b32.xlu0 %v1564_v26, %s3507_s10 }
 0x597   :  { %v1597_v46 = vpop.permute.xlu0 %1596 }
 0x598   :  { %v1642_v30 = vadd.f32 %v1597_v46, %v4405_v23 }
 0x59a   :  { %v3021_v40 = vmul.f32 -1.442695, %v1642_v30 }
 0x59c   :  { %3281 = vpow2.f32 %v3021_v40 }
 0x59d   :  { %1894 = vrot.lane.b32.xlu1 %v4706_v45, %s3507_s10 }
 0x59e   :  { %1610 = vrot.lane.b32.xlu0 %v1555_v16, %s3507_s10 }
 0x59f   :  { %v1599_v53 = vpop.permute.xlu1 %1598 }
 0x5a0   :  { %v1643_v45 = vadd.f32 %v1599_v53, %v4412_v39 }
 0x5a2   :  { %v3022_v60 = vmul.f32 -1.442695, %v1643_v45 }
 0x5a4   :  { %3283 = vpow2.f32 %v3022_v60 }
 0x5a6   :  { %1896 = vrot.lane.b32.xlu0 %v4725_v4, %s3507_s10  ;;  %v3278_v4 = vpop.eup %3277 }
 0x5a7   :  { %v1607_v18 = vpop.permute.xlu2 %1606  ;;  %v3280_v27 = vpop.eup %3279  ;;  %v4834_v44 = vadd.f32 1.0, %v3278_v4 }
 0x5a8   :  { %v4836_v52 = vadd.f32 1.0, %v3280_v27  ;;  %v1647_v0 = vadd.f32 %v1607_v18, %v4550_v21  ;;  %v3282_v55 = vpop.eup %3281 }
 0x5a9   :  { %3285 = vrcp.f32 %v4834_v44  ;;  %v4843_v35 = vadd.f32 1.0, %v3282_v55  ;;  %vm1724_vm5 = vweird.f32 %v4834_v44  ;;  %v1728_v46 = vand.u32 2147483647, %v4834_v44 }
 0x5aa   :  { %v3284_v41 = vpop.eup %3283  ;;  %3287 = vrcp.f32 %v4836_v52  ;;  %v3026_v32 = vmul.f32 -1.442695, %v1647_v0  ;;  %v1730_v56 = vand.u32 2147483648, %v4834_v44  ;;  %vm1709_vm11 = vweird.f32 %v4836_v52 }
 0x5ab   :  { %v4846_v51 = vadd.f32 1.0, %v3284_v41  ;;  %v1715_v45 = vand.u32 2147483648, %v4836_v52  ;;  %v1713_v27 = vand.u32 2147483647, %v4836_v52  ;;  %vm1729_vm13 = vcmp.eq.f32.partialorder %v1728_v46, 8.507059e+37 }
 0x5ac   :  { %3289 = vpow2.f32 %v3026_v32  ;;  %vm1739_vm2 = vweird.f32 %v4843_v35 }
 0x5ad   :  { %3291 = vrcp.f32 %v4843_v35  ;;  %v1716_v32 = vor.u32 1.1754944e-38, %v1715_v45  ;;  %vm1714_vm15 = vcmp.eq.f32.partialorder %v1713_v27, 8.507059e+37  ;;  %vm1754_vm6 = vweird.f32 %v4846_v51 }
 0x5ae   :  { %3293 = vrcp.f32 %v4846_v51 }
 0x5af   :  { %v1603_v54 = vpop.permute.xlu0 %1602  ;;  %v1601_v33 = vpop.permute.xlu2 %1600 }
 0x5b0   :  { %v1645_v38 = vadd.f32 %v1603_v54, %v4454_v42  ;;  %v1644_v58 = vadd.f32 %v1601_v33, %v4427_v63  ;;  %v4848_v47 = vpop.eup %3285 }
 0x5b1   :  { %v4850_v50 = vpop.eup %3287  ;;  %v1720_v19 = vmul.f32 %v4848_v47, %v4834_v44  ;;  %vm1725_vm9 = vweird.f32 %v4848_v47  ;;  %v1743_v44 = vand.u32 2147483647, %v4843_v35 }
 0x5b2   :  { %v3024_v49 = vmul.f32 -1.442695, %v1645_v38  ;;  %v3023_v1 = vmul.f32 -1.442695, %v1644_v58  ;;  %v1705_v57 = vmul.f32 %v4850_v50, %v4836_v52  ;;  %v3290_v61 = vpop.eup %3289  ;;  %vm1710_vm10 = vweird.f32 %v4850_v50  ;;  %vm4898_vm12 = vmor %vm1724_vm5, %vm1725_vm9 }
 0x5b3   :  { %v4859_v3 = vpop.eup %3291  ;;  %v1721_v10 = vsub.f32 1.0, %v1720_v19  ;;  %v4863_v13 = vadd.f32 1.0, %v3290_v61  ;;  %vm4902_vm14 = vmor %vm1709_vm11, %vm1710_vm10  ;;  %v1745_v19 = vand.u32 2147483648, %v4843_v35  ;;  %v1758_v61 = vand.u32 2147483647, %v4846_v51 }
 0x5b4   :  { %3295 = vpow2.f32 %v3024_v49  ;;  %v4861_v11 = vpop.eup %3293  ;;  %v1706_v12 = vsub.f32 1.0, %v1705_v57  ;;  %v1735_v37 = vmul.f32 %v4859_v3, %v4843_v35  ;;  %vm1740_vm1 = vweird.f32 %v4859_v3 }
 0x5b5   :  { %3297 = vpow2.f32 %v3023_v1  ;;  %v1722_v26 = vmul.f32 %v4848_v47, %v1721_v10  ;;  %v1750_v25 = vmul.f32 %v4861_v11, %v4846_v51  ;;  %vm4934_vm3 = vcmp.eq.f32.partialorder %v1743_v44, 8.507059e+37  ;;  %vm4959_vm7 = vmor %vm1739_vm2, %vm1740_vm1  ;;  %v6081_v44 = vld [vmem:[#allocation8_spill] sm:$0xff] }
 0x5b6   :  { %v1707_v34 = vmul.f32 %v4850_v50, %v1706_v12  ;;  %v1736_v18 = vsub.f32 1.0, %v1735_v37  ;;  %vm1755_vm4 = vweird.f32 %v4861_v11  ;;  %v1746_v45 = vor.u32 1.1754944e-38, %v1745_v19 }
 0x5b7   :  { %v1605_v8 = vpop.permute.xlu1 %1604  ;;  %v1723_v59 = vadd.f32 %v4848_v47, %v1722_v26  ;;  %v1751_v60 = vsub.f32 1.0, %v1750_v25  ;;  %vm4964_vm8 = vmor %vm1754_vm6, %vm1755_vm4  ;;  %vm4968_vm5 = vcmp.eq.f32.partialorder %v1758_v61, 8.507059e+37  ;;  %vm1814_vm9 = vweird.f32 %v4863_v13 }
 0x5b8   :  { %v1646_v24 = vadd.f32 %v1605_v8, %v4484_v22  ;;  %v1708_v30 = vadd.f32 %v4850_v50, %v1707_v34  ;;  %v1731_v8 = vor.u32 1.1754944e-38, %v1730_v56  ;;  %v1737_v38 = vmul.f32 %v4859_v3, %v1736_v18 }
 0x5b9   :  { %v1727_v33 = vsel %vm4898_vm12, %v4848_v47, %v1723_v59  ;;  %v1818_v56 = vand.u32 2147483647, %v4863_v13 }
 0x5ba   :  { %v3025_v5 = vmul.f32 -1.442695, %v1646_v24  ;;  %v3296_v14 = vpop.eup %3295  ;;  %v1712_v52 = vsel %vm4902_vm14, %v4850_v50, %v1708_v30  ;;  %v1752_v24 = vmul.f32 %v4861_v11, %v1751_v60  ;;  %v4919_v49 = vsel %vm1729_vm13, %v1731_v8, %v1727_v33 }
 0x5bb   :  { %v3298_v16 = vpop.eup %3297  ;;  %v4867_v31 = vadd.f32 1.0, %v3296_v14  ;;  %vm4981_vm11 = vcmp.eq.f32.partialorder %v1818_v56, 8.507059e+37 }
 0x5bc   :  { %3299 = vpow2.f32 %v3025_v5  ;;  %v4872_v6 = vadd.f32 1.0, %v3298_v16  ;;  %v4925_v5 = vsel %vm1714_vm15, %v1716_v32, %v1712_v52  ;;  %v1753_v37 = vadd.f32 %v4861_v11, %v1752_v24 }
 0x5bd   :  { %3301 = vrcp.f32 %v4863_v13  ;;  %vm1784_vm12 = vweird.f32 %v4867_v31  ;;  %v1790_v12 = vand.u32 2147483648, %v4867_v31 }
 0x5be   :  { %vm1769_vm14 = vweird.f32 %v4872_v6 }
 0x5c2   :  { %v3300_v20 = vpop.eup %3299 }
 0x5c3   :  { %v4876_v48 = vadd.f32 1.0, %v3300_v20  ;;  %v4890_v40 = vpop.eup %3301  ;;  %v1738_v20 = vadd.f32 %v4859_v3, %v1737_v38 }
 0x5c4   :  { %v1810_v41 = vmul.f32 %v4890_v40, %v4863_v13  ;;  %vm1815_vm10 = vweird.f32 %v4890_v40 }
 0x5c5   :  { %v1742_v35 = vsel %vm4959_vm7, %v4859_v3, %v1738_v20  ;;  %vm5009_vm13 = vmor %vm1814_vm9, %vm1815_vm10  ;;  %vm1799_vm6 = vweird.f32 %v4876_v48 }
 0x5c6   :  { %v1811_v14 = vsub.f32 1.0, %v1810_v41 }
 0x5c8   :  { %v1812_v18 = vmul.f32 %v4890_v40, %v1811_v14 }
 0x5ca   :  { %v1813_v32 = vadd.f32 %v4890_v40, %v1812_v18 }
 0x5d7   :  { %v1619_v28 = vpop.permute.xlu2 %1618 }
 0x5d8   :  { %v1653_v2 = vadd.f32 %v1619_v28, %v4475_v43 }
 0x5da   :  { %v3028_v17 = vmul.f32 -1.442695, %v1653_v2  ;;  %v1760_v2 = vand.u32 2147483648, %v4846_v51  ;;  %v1757_v51 = vsel %vm4964_vm8, %v4861_v11, %v1753_v37  ;;  %v4987_v11 = vsel %vm4934_vm3, %v1746_v45, %v1742_v35 }
 0x5db   :  { %v1773_v37 = vand.u32 2147483647, %v4872_v6  ;;  %v1805_v45 = vand.u32 2147483648, %v4876_v48 }
 0x5dc   :  { %3303 = vpow2.f32 %v3028_v17  ;;  %v1761_v27 = vor.u32 1.1754944e-38, %v1760_v2 }
 0x5dd   :  { %3305 = vrcp.f32 %v4867_v31 }
 0x5de   :  { %3307 = vrcp.f32 %v4872_v6  ;;  %v1762_v38 = vsel %vm4968_vm5, %v1761_v27, %v1757_v51  ;;  %vm1774_vm5 = vcmp.eq.f32.partialorder %v1773_v37, 8.507059e+37 }
 0x5df   :  { %3309 = vrcp.f32 %v4876_v48  ;;  %v1613_v57 = vpop.permute.xlu2 %1612 }
 0x5e0   :  { %v1650_v41 = vadd.f32 %v1613_v57, %v6081_v44 }
 0x5e2   :  { %v3304_v55 = vpop.eup %3303 }
 0x5e3   :  { %v4916_v58 = vpop.eup %3305  ;;  %v4923_v1 = vadd.f32 1.0, %v3304_v55 }
 0x5e4   :  { %v4921_v47 = vpop.eup %3307  ;;  %v1780_v25 = vmul.f32 %v4916_v58, %v4867_v31  ;;  %vm1785_vm15 = vweird.f32 %v4916_v58 }
 0x5e5   :  { %v4929_v28 = vpop.eup %3309  ;;  %v1765_v34 = vmul.f32 %v4921_v47, %v4872_v6  ;;  %vm1770_vm2 = vweird.f32 %v4921_v47  ;;  %vm5035_vm3 = vmor %vm1784_vm12, %vm1785_vm15 }
 0x5e6   :  { %v1795_v46 = vmul.f32 %v4929_v28, %v4876_v48  ;;  %v1781_v0 = vsub.f32 1.0, %v1780_v25  ;;  %v1775_v25 = vand.u32 2147483648, %v4872_v6  ;;  %vm1800_vm1 = vweird.f32 %v4929_v28  ;;  %vm5045_vm4 = vmor %vm1769_vm14, %vm1770_vm2 }
 0x5e7   :  { %v1766_v54 = vsub.f32 1.0, %v1765_v34  ;;  %v1899_v61 = vpop.permute.xlu2 %1898  ;;  %v1791_v6 = vor.u32 1.1754944e-38, %v1790_v12  ;;  %vm5061_vm8 = vmor %vm1799_vm6, %vm1800_vm1  ;;  %v1806_v12 = vor.u32 1.1754944e-38, %v1805_v45  ;;  %v1850_v34 = vand.u32 2147483648, %v4923_v1 }
 0x5e8   :  { %v1796_v33 = vsub.f32 1.0, %v1795_v46  ;;  %v1782_v2 = vmul.f32 %v4916_v58, %v1781_v0 }
 0x5e9   :  { %v1767_v57 = vmul.f32 %v4921_v47, %v1766_v54 }
 0x5eb   :  { %v1768_v18 = vadd.f32 %v4921_v47, %v1767_v57 }
 0x5f7   :  { %v1621_v36 = vpop.permute.xlu1 %1620 }
 0x5f8   :  { %v1654_v53 = vadd.f32 %v1621_v36, %v4535_v62 }
 0x5fa   :  { %v3029_v4 = vmul.f32 -1.442695, %v1654_v53  ;;  %v1820_v53 = vand.u32 2147483648, %v4863_v13  ;;  %v1783_v13 = vadd.f32 %v4916_v58, %v1782_v2 }
 0x5fc   :  { %3311 = vpow2.f32 %v3029_v4  ;;  %v1821_v3 = vor.u32 1.1754944e-38, %v1820_v53  ;;  %v1817_v53 = vsel %vm5009_vm13, %v4890_v40, %v1813_v32  ;;  %v1787_v55 = vsel %vm5035_vm3, %v4916_v58, %v1783_v13 }
 0x5fd   :  { %3313 = vrcp.f32 %v4923_v1  ;;  %vm1924_vm3 = vcmask 31760  }
 0x5fe   :  { %v1822_v0 = vsel %vm4981_vm11, %v1821_v3, %v1817_v53 }
 0x5ff   :  { %v1615_v50 = vpop.permute.xlu1 %1614 }
 0x600   :  { %v1623_v10 = vpop.permute.xlu0 %1622  ;;  %v1651_v16 = vadd.f32 %v1615_v50, %v4504_v29  ;;  %v6082_v50 = vld [vmem:[#allocation7_spill] sm:$0xff] }
 0x601   :  { %v1655_v17 = vadd.f32 %v1623_v10, %v4590_v9  ;;  %v1788_v10 = vand.u32 2147483647, %v4867_v31  ;;  %v1803_v31 = vand.u32 2147483647, %v4876_v48  ;;  %v1772_v48 = vsel %vm5045_vm4, %v4921_v47, %v1768_v18 }
 0x602   :  { %v3312_v26 = vpop.eup %3311  ;;  %3315 = vtanh.f32 %v1651_v16  ;;  %vm1844_vm4 = vweird.f32 %v4923_v1 }
 0x603   :  { %v4948_v36 = vadd.f32 1.0, %v3312_v26  ;;  %v3030_v59 = vmul.f32 -1.442695, %v1655_v17  ;;  %v4989_v8 = vpop.eup %3313  ;;  %v1797_v17 = vmul.f32 %v4929_v28, %v1796_v33  ;;  %v6090_v33 = vld [vmem:[#allocation6_spill] sm:$0xff]  ;;  %vm5055_vm7 = vcmp.eq.f32.partialorder %v1788_v10, 8.507059e+37 }
 0x604   :  { %v1840_v26 = vmul.f32 %v4989_v8, %v4923_v1  ;;  %v1792_v47 = vsel %vm5055_vm7, %v1791_v6, %v1787_v55  ;;  %vm1804_vm9 = vcmp.eq.f32.partialorder %v1803_v31, 8.507059e+37  ;;  %vm1845_vm10 = vweird.f32 %v4989_v8 }
 0x605   :  { %3317 = vpow2.f32 %v3030_v59  ;;  %v6085_v59 = vld [vmem:[#allocation5_spill] sm:$0xff]  ;;  %v1798_v60 = vadd.f32 %v4929_v28, %v1797_v17  ;;  %vm1859_vm12 = vweird.f32 %v4948_v36  ;;  %vm5120_vm6 = vmor %vm1844_vm4, %vm1845_vm10 }
 0x606   :  { %3319 = vrcp.f32 %v4948_v36  ;;  %v1841_v40 = vsub.f32 1.0, %v1840_v26 }
 0x607   :  { %v1609_v24 = vpop.permute.xlu1 %1608  ;;  %3321 = vtanh.f32 %v1650_v41  ;;  %v1907_v41 = vmul.f32 %v1899_v61, %v1822_v0  ;;  %v1802_v58 = vsel %vm5061_vm8, %v4929_v28, %v1798_v60  ;;  %v1893_v61 = vpop.permute.xlu2 %1892 }
 0x608   :  { %v1617_v52 = vpop.permute.xlu0 %1616  ;;  %v3316_v14 = vpop.eup %3315  ;;  %v1648_v46 = vadd.f32 %v1609_v24, %v6085_v59  ;;  %v1776_v24 = vor.u32 1.1754944e-38, %v1775_v25  ;;  %v1807_v26 = vsel %vm1804_vm9, %v1806_v12, %v1802_v58  ;;  %v1848_v58 = vand.u32 2147483647, %v4923_v1 }
 0x609   :  { %v1652_v19 = vadd.f32 %v1617_v52, %v6082_v50  ;;  %v1911_v35 = vmul.f32 %v3316_v14, %v1762_v38  ;;  %v1842_v14 = vmul.f32 %v4989_v8, %v1841_v40  ;;  %v1851_v12 = vor.u32 1.1754944e-38, %v1850_v34 }
 0x60b   :  { %v3027_v16 = vmul.f32 -1.442695, %v1652_v19  ;;  %v3318_v20 = vpop.eup %3317  ;;  %v5071_v10 = vadd.f32 %v1911_v35, %v1907_v41  ;;  %v1843_v18 = vadd.f32 %v4989_v8, %v1842_v14 }
 0x60c   :  { %v5016_v56 = vpop.eup %3319  ;;  %v5021_v30 = vadd.f32 1.0, %v3318_v20  ;;  %v1777_v20 = vsel %vm1774_vm5, %v1776_v24, %v1772_v48  ;;  %vm1849_vm5 = vcmp.eq.f32.partialorder %v1848_v58, 8.507059e+37  ;;  %v5231_v58 = vld [vmem:[%s5989_s12 + $0x68] sm:$0xff] }
 0x60d   :  { %3323 = vpow2.f32 %v3027_v16  ;;  %v1855_v4 = vmul.f32 %v5016_v56, %v4948_v36  ;;  %v3322_v38 = vpop.eup %3321  ;;  %v1904_v25 = vmul.f32 %v1893_v61, %v1777_v20  ;;  %vm1860_vm14 = vweird.f32 %v5016_v56 }
 0x60e   :  { %3325 = vrcp.f32 %v5021_v30  ;;  %v1910_v53 = vmul.f32 %v3322_v38, %v4987_v11  ;;  %v1878_v35 = vand.u32 2147483647, %v5021_v30  ;;  %v1880_v51 = vand.u32 2147483648, %v5021_v30  ;;  %vm5109_vm1 = vmor %vm1859_vm12, %vm1860_vm14 }
 0x60f   :  { %3327 = vtanh.f32 %v1648_v46  ;;  %v1856_v2 = vsub.f32 1.0, %v1855_v4  ;;  %v1895_v46 = vpop.permute.xlu1 %1894  ;;  %vm1874_vm13 = vweird.f32 %v5021_v30  ;;  %v1847_v1 = vsel %vm5120_vm6, %v4989_v8, %v1843_v18 }
 0x610   :  { %v1611_v27 = vpop.permute.xlu0 %1610  ;;  %v1881_v6 = vor.u32 1.1754944e-38, %v1880_v51  ;;  %vm1879_vm2 = vcmp.eq.f32.partialorder %v1878_v35, 8.507059e+37 }
 0x611   :  { %v1649_v52 = vadd.f32 %v1611_v27, %v6090_v33  ;;  %v1857_v45 = vmul.f32 %v5016_v56, %v1856_v2  ;;  %v1905_v27 = vmul.f32 %v1895_v46, %v1792_v47 }
 0x613   :  { %3329 = vtanh.f32 %v1649_v52  ;;  %v3324_v19 = vpop.eup %3323  ;;  %v1863_v52 = vand.u32 2147483647, %v4948_v36 }
 0x614   :  { %v3326_v57 = vpop.eup %3325  ;;  %v5074_v16 = vadd.f32 1.0, %v3324_v19 }
 0x615   :  { %v3328_v17 = vpop.eup %3327  ;;  %v1870_v28 = vmul.f32 %v3326_v57, %v5021_v30  ;;  %vm1875_vm11 = vweird.f32 %v3326_v57  ;;  %vm1864_vm7 = vcmp.eq.f32.partialorder %v1863_v52, 8.507059e+37  ;;  %v5154_v52 = vld [vmem:[%s5989_s12 + $0x10] sm:$0xff]  ;;  %v5217_v30 = vld [vmem:[%s5989_s12 + $0x58] sm:$0xff] }
 0x616   :  { %3331 = vrcp.f32 %v5074_v16  ;;  %v1908_v40 = vmul.f32 %v3328_v17, %v4925_v5  ;;  %v1858_v5 = vadd.f32 %v5016_v56, %v1857_v45  ;;  %vm1876_vm15 = vmor %vm1874_vm13, %vm1875_vm11  ;;  %v1833_v47 = vand.u32 2147483647, %v5074_v16 }
 0x617   :  { %3333 = vtanh.f32 %v5071_v10  ;;  %v1871_v37 = vsub.f32 1.0, %v1870_v28  ;;  %vm1829_vm9 = vweird.f32 %v5074_v16 }
 0x618   :  { %v1897_v13 = vpop.permute.xlu0 %1896  ;;  %v5099_v3 = vadd.f32 %v1908_v40, %v1904_v25  ;;  %v1862_v61 = vsel %vm5109_vm1, %v5016_v56, %v1858_v5  ;;  %v1852_v25 = vsel %vm1849_vm5, %v1851_v12, %v1847_v1  ;;  %vm1834_vm11 = vcmp.eq.f32.partialorder %v1833_v47, 8.507059e+37  ;;  %v5161_v5 = vld [vmem:[%s5989_s12 + $0x18] sm:$0xff] }
 0x619   :  { %v3330_v60 = vpop.eup %3329  ;;  %v1906_v4 = vmul.f32 %v1897_v13, %v1807_v26  ;;  %v1872_v0 = vmul.f32 %v3326_v57, %v1871_v37 }
 0x61a   :  { %v1909_v11 = vmul.f32 %v3330_v60, %v4919_v49  ;;  %v1865_v49 = vand.u32 2147483648, %v4948_v36 }
 0x61b   :  { %v5090_v54 = vadd.f32 %v1910_v53, %v1906_v4  ;;  %v1873_v41 = vadd.f32 %v3326_v57, %v1872_v0  ;;  %v5147_v0 = vld [vmem:[%s5989_s12 + $0x8] sm:$0xff] }
 0x61c   :  { %v5095_v31 = vadd.f32 %v1909_v11, %v1905_v27  ;;  %v3332_v55 = vpop.eup %3331  ;;  %v1866_v14 = vor.u32 1.1754944e-38, %v1865_v49  ;;  %v5140_v11 = vld [vmem:[%s5989_s12] sm:$0xff]  ;;  %v5182_v49 = vld [vmem:[%s5989_s12 + $0x30] sm:$0xff] }
 0x61d   :  { %3335 = vtanh.f32 %v5090_v54  ;;  %v3334_v32 = vpop.eup %3333  ;;  %v1825_v38 = vmul.f32 %v3332_v55, %v5074_v16  ;;  %v1877_v48 = vsel %vm1876_vm15, %v3326_v57, %v1873_v41  ;;  %v1835_v57 = vand.u32 2147483648, %v5074_v16  ;;  %v5168_v41 = vld [vmem:[%s5989_s12 + $0x20] sm:$0xff] }
 0x61e   :  { %3337 = vtanh.f32 %v5095_v31  ;;  %v1882_v24 = vsel %vm1879_vm2, %v1881_v6, %v1877_v48  ;;  %vm1830_vm8 = vweird.f32 %v3332_v55  ;;  %v1867_v20 = vsel %vm1864_vm7, %v1866_v14, %v1862_v61  ;;  %v5189_v6 = vld [vmem:[%s5989_s12 + $0x38] sm:$0xff]  ;;  %v5210_v48 = vld [vmem:[%s5989_s12 + $0x50] sm:$0xff] }
 0x61f   :  { %v1826_v19 = vsub.f32 1.0, %v1825_v38  ;;  %v1923_v2 = vmul.f32 %v3334_v32, %v1882_v24  ;;  %3339 = vtanh.f32 %v5099_v3  ;;  %vm1831_vm10 = vmor %vm1829_vm9, %vm1830_vm8  ;;  %v1836_v46 = vor.u32 1.1754944e-38, %v1835_v57  ;;  %v5196_v32 = vld [vmem:[%s5989_s12 + $0x40] sm:$0xff]  ;;  %v5203_v38 = vld [vmem:[%s5989_s12 + $0x48] sm:$0xff] }
 0x620   :  { %v5224_v24 = vld [vmem:[%s5989_s12 + $0x60] sm:$0xff]  ;;  %v5245_v61 = vld [vmem:[%s5989_s12 + $0x78] sm:$0xff] }
 0x621   :  { %1928 = vst.msk [vmem:[#allocation2 + $0x18] sm:$0xff] %vm1924_vm3, %v1923_v2  ;;  %v1827_v56 = vmul.f32 %v3332_v55, %v1826_v19  ;;  %v5238_v19 = vld [vmem:[%s5989_s12 + $0x70] sm:$0xff] }
 0x623   :  { %v3336_v17 = vpop.eup %3335  ;;  %v1828_v34 = vadd.f32 %v3332_v55, %v1827_v56 }
 0x624   :  { %v3338_v28 = vpop.eup %3337  ;;  %v1922_v26 = vmul.f32 %v3336_v17, %v1867_v20 }
 0x625   :  { %v1921_v53 = vmul.f32 %v3338_v28, %v1852_v25  ;;  %v1832_v37 = vsel %vm1831_vm10, %v3332_v55, %v1828_v34  ;;  %v3340_v13 = vpop.eup %3339  ;;  %v5175_v55 = vld [vmem:[%s5989_s12 + $0x28] sm:$0xff]  ;;  %s3509_s12 = smov 6  }
 0x626   :  { %v3176_v8 = vpack.i.bf16 %v1922_v26, %v1923_v2  ;;  %1927 = vst.msk [vmem:[#allocation2 + $0x10] sm:$0xff] %vm1924_vm3, %v1922_v26  ;;  %v1837_v45 = vsel %vm1834_vm11, %v1836_v46, %v1832_v37 }
 0x627   :  { %1926 = vst.msk [vmem:[#allocation2 + $0x8] sm:$0xff] %vm1924_vm3, %v1921_v53  ;;  %v1920_v18 = vmul.f32 %v3340_v13, %v1837_v45 }
 0x628   :  { %3177 = vrot.lane.b32.xlu0 %v3176_v8, %s3495_s22 }
 0x629   :  { %v3181_v60 = vpack.i.bf16 %v1920_v18, %v1921_v53  ;;  %1925 = vst.msk [vmem:[#allocation2] sm:$0xff] %vm1924_vm3, %v1920_v18 }
 0x62b   :  { %3182 = vrot.lane.b32.xlu1 %v3181_v60, %s3495_s22 }
 0x69a   :  { %v3178_v16 = vpop.permute.xlu0 %3177 }
 0x69b   :  { %v3179_v40 = vunpack.i.l.bf16 %v3178_v16  ;;  %v3180_v4 = vunpack.i.h.bf16 %v3178_v16 }
 0x69d   :  { %1957 = vmatpush.msra.mxu1 %v3179_v40  ;;  %v3183_v35 = vpop.permute.xlu1 %3182 }
 0x69e   :  { %v3184_v51 = vunpack.i.l.bf16 %v3183_v35  ;;  %v3185_v27 = vunpack.i.h.bf16 %v3183_v35 }
 0x69f   :  { %1958 = vmatpush.msra.mxu1 %v3180_v4 }
 0x6a1   :  { %1959 = vmatpush.msra.mxu1 %v3184_v51 }
 0x6a3   :  { %1960 = vmatpush.msra.mxu1 %v3185_v27 }
 0x6a4   :  { %3031 = vmatmul.msk.f32.vlgmr.msra.gmra.mxu1 %vm1124_vm0, %v5140_v11 }
 0x6ac   :  { %3032 = vmatmul.msk.f32.gmra.mxu1 %vm1124_vm0, %v5147_v0 }
 0x6b4   :  { %3033 = vmatmul.msk.f32.gmra.mxu1 %vm1124_vm0, %v5154_v52 }
 0x6bc   :  { %3034 = vmatmul.msk.f32.gmra.mxu1 %vm1124_vm0, %v5161_v5 }
 0x6c4   :  { %3035 = vmatmul.msk.f32.gmra.mxu1 %vm1124_vm0, %v5168_v41 }
 0x6cc   :  { %3036 = vmatmul.msk.f32.gmra.mxu1 %vm1124_vm0, %v5175_v55 }
 0x6d4   :  { %3037 = vmatmul.msk.f32.gmra.mxu1 %vm1124_vm0, %v5182_v49 }
 0x6dc   :  { %3038 = vmatmul.msk.f32.gmra.mxu1 %vm1124_vm0, %v5189_v6 }
 0x6e4   :  { %3039 = vmatmul.msk.f32.gmra.mxu1 %vm1124_vm0, %v5196_v32 }
 0x6ec   :  { %3040 = vmatmul.msk.f32.gmra.mxu1 %vm1124_vm0, %v5203_v38 }
 0x6f4   :  { %3041 = vmatmul.msk.f32.gmra.mxu1 %vm1124_vm0, %v5210_v48 }
 0x6fc   :  { %3042 = vmatmul.msk.f32.gmra.mxu1 %vm1124_vm0, %v5217_v30 }
 0x704   :  { %3043 = vmatmul.msk.f32.gmra.mxu1 %vm1124_vm0, %v5224_v24 }
 0x70c   :  { %3044 = vmatmul.msk.f32.gmra.mxu1 %vm1124_vm0, %v5231_v58 }
 0x714   :  { %3045 = vmatmul.msk.f32.gmra.mxu1 %vm1124_vm0, %v5238_v19 }
 0x71c   :  { %3046 = vmatmul.msk.f32.gmra.mxu1 %vm1124_vm0, %v5245_v61 }
 0x721   :  { %v1962_v2 = vpop.f32.mrf.mxu1 }
 0x722   :  { %2026 = vrot.lane.b32.xlu2 %v1962_v2, %s3508_s23 }
 0x729   :  { %v1965_v36 = vpop.f32.mrf.mxu1 }
 0x72a   :  { %2028 = vrot.lane.b32.xlu0 %v1965_v36, %s3508_s23 }
 0x731   :  { %v1968_v12 = vpop.f32.mrf.mxu1 }
 0x732   :  { %2030 = vrot.lane.b32.xlu1 %v1968_v12, %s3508_s23 }
 0x739   :  { %v1971_v14 = vpop.f32.mrf.mxu1 }
 0x73a   :  { %2032 = vrot.lane.b32.xlu2 %v1971_v14, %s3508_s23 }
 0x741   :  { %v1974_v57 = vpop.f32.mrf.mxu1 }
 0x749   :  { %v1977_v1 = vpop.f32.mrf.mxu1 }
 0x74a   :  { %2036 = vrot.lane.b32.xlu1 %v1977_v1, %s3508_s23 }
 0x751   :  { %v1980_v56 = vpop.f32.mrf.mxu1 }
 0x752   :  { %2038 = vrot.lane.b32.xlu2 %v1980_v56, %s3508_s23 }
 0x759   :  { %v1983_v47 = vpop.f32.mrf.mxu1 }
 0x75a   :  { %2040 = vrot.lane.b32.xlu0 %v1983_v47, %s3508_s23 }
 0x761   :  { %v1986_v17 = vpop.f32.mrf.mxu1 }
 0x762   :  { %2034 = vrot.lane.b32.xlu0 %v1974_v57, %s3508_s23 }
 0x769   :  { %v1989_v20 = vpop.f32.mrf.mxu1 }
 0x771   :  { %v1992_v28 = vpop.f32.mrf.mxu1 }
 0x779   :  { %v1995_v26 = vpop.f32.mrf.mxu1 }
 0x781   :  { %v1998_v34 = vpop.f32.mrf.mxu1 }
 0x789   :  { %v2001_v25 = vpop.f32.mrf.mxu1 }
 0x78a   :  { %2052 = vrot.lane.b32.xlu0 %v2001_v25, %s3508_s23 }
 0x791   :  { %v2004_v46 = vpop.f32.mrf.mxu1 }
 0x792   :  { %2046 = vrot.lane.b32.xlu0 %v1992_v28, %s3508_s23  ;;  %2054 = vrot.lane.b32.xlu2 %v2004_v46, %s3508_s23 }
 0x799   :  { %v2007_v53 = vpop.f32.mrf.mxu1 }
 0x79a   :  { %2332 = vrot.lane.b32.xlu0 %v5071_v10, %s3507_s10  ;;  %2048 = vrot.lane.b32.xlu2 %v1995_v26, %s3508_s23  ;;  %v2027_v10 = vpop.permute.xlu2 %2026 }
 0x79b   :  { %2056 = vrot.lane.b32.xlu1 %v2007_v53, %s3508_s23  ;;  %v2074_v8 = vadd.f32 %v2027_v10, %v4389_v15 }
 0x79c   :  { %v2029_v45 = vpop.permute.xlu0 %2028 }
 0x79d   :  { %v3047_v13 = vmul.f32 -1.442695, %v2074_v8  ;;  %v2075_v18 = vadd.f32 %v2029_v45, %v4396_v7 }
 0x79f   :  { %3341 = vpow2.f32 %v3047_v13  ;;  %v3048_v16 = vmul.f32 -1.442695, %v2075_v18 }
 0x7a2   :  { %2326 = vrot.lane.b32.xlu0 %v5099_v3, %s3507_s10  ;;  %2042 = vrot.lane.b32.xlu2 %v1986_v17, %s3508_s23  ;;  %v2033_v37 = vpop.permute.xlu2 %2032 }
 0x7a3   :  { %2050 = vrot.lane.b32.xlu1 %v1998_v34, %s3508_s23  ;;  %v2077_v3 = vadd.f32 %v2033_v37, %v4412_v39 }
 0x7a4   :  { %v2031_v40 = vpop.permute.xlu1 %2030 }
 0x7a5   :  { %v3050_v60 = vmul.f32 -1.442695, %v2077_v3  ;;  %v3342_v4 = vpop.eup %3341 }
 0x7a6   :  { %v5276_v35 = vadd.f32 1.0, %v3342_v4 }
 0x7a7   :  { %3343 = vpow2.f32 %v3050_v60 }
 0x7a8   :  { %3345 = vpow2.f32 %v3048_v16  ;;  %vm2143_vm14 = vweird.f32 %v5276_v35 }
 0x7a9   :  { %3347 = vrcp.f32 %v5276_v35 }
 0x7aa   :  { %2328 = vrot.lane.b32.xlu2 %v5095_v31, %s3507_s10 }
 0x7ab   :  { %2044 = vrot.lane.b32.xlu1 %v1989_v20, %s3508_s23 }
 0x7ac   :  { %v2039_v51 = vpop.permute.xlu2 %2038 }
 0x7ad   :  { %v3344_v27 = vpop.eup %3343  ;;  %v2080_v57 = vadd.f32 %v2039_v51, %v4484_v22 }
 0x7ae   :  { %v3346_v12 = vpop.eup %3345  ;;  %v5282_v1 = vadd.f32 1.0, %v3344_v27 }
 0x7af   :  { %v5285_v20 = vadd.f32 1.0, %v3346_v12  ;;  %v3053_v28 = vmul.f32 -1.442695, %v2080_v57  ;;  %v5289_v25 = vpop.eup %3347 }
 0x7b0   :  { %v2139_v53 = vmul.f32 %v5289_v25, %v5276_v35  ;;  %vm2144_vm12 = vweird.f32 %v5289_v25  ;;  %vm2188_vm2 = vweird.f32 %v5282_v1 }
 0x7b1   :  { %vm5326_vm13 = vmor %vm2143_vm14, %vm2144_vm12  ;;  %vm2158_vm7 = vweird.f32 %v5285_v20 }
 0x7b2   :  { %v2140_v18 = vsub.f32 1.0, %v2139_v53  ;;  %v2149_v53 = vand.u32 2147483648, %v5276_v35 }
 0x7b3   :  { %2330 = vrot.lane.b32.xlu1 %v5090_v54, %s3507_s10  ;;  %v2076_v54 = vadd.f32 %v2031_v40, %v4405_v23 }
 0x7b4   :  { %v2141_v27 = vmul.f32 %v5289_v25, %v2140_v18 }
 0x7b5   :  { %v3049_v14 = vmul.f32 -1.442695, %v2076_v54 }
 0x7b7   :  { %3349 = vpow2.f32 %v3049_v14 }
 0x7b8   :  { %3351 = vrcp.f32 %v5282_v1 }
 0x7bc   :  { %v2037_v2 = vpop.permute.xlu1 %2036 }
 0x7bd   :  { %v2079_v56 = vadd.f32 %v2037_v2, %v4454_v42  ;;  %v3350_v10 = vpop.eup %3349 }
 0x7be   :  { %v5294_v8 = vpop.eup %3351  ;;  %v5298_v3 = vadd.f32 1.0, %v3350_v10 }
 0x7bf   :  { %v3052_v34 = vmul.f32 -1.442695, %v2079_v56  ;;  %v2184_v16 = vmul.f32 %v5294_v8, %v5282_v1  ;;  %vm2189_vm15 = vweird.f32 %v5294_v8 }
 0x7c0   :  { %vm5354_vm3 = vmor %vm2188_vm2, %vm2189_vm15  ;;  %vm2173_vm9 = vweird.f32 %v5298_v3 }
 0x7c1   :  { %v2185_v57 = vsub.f32 1.0, %v2184_v16 }
 0x7cc   :  { %v2041_v31 = vpop.permute.xlu0 %2040 }
 0x7cd   :  { %v2081_v36 = vadd.f32 %v2041_v31, %v4550_v21  ;;  %v2177_v21 = vand.u32 2147483647, %v5298_v3 }
 0x7cf   :  { %v3054_v17 = vmul.f32 -1.442695, %v2081_v36  ;;  %vm5421_vm14 = vcmp.eq.f32.partialorder %v2177_v21, 8.507059e+37 }
 0x7d1   :  { %3353 = vpow2.f32 %v3054_v17  ;;  %v2142_v17 = vadd.f32 %v5289_v25, %v2141_v27  ;;  %v2150_v27 = vor.u32 1.1754944e-38, %v2149_v53 }
 0x7d2   :  { %3355 = vrcp.f32 %v5285_v20 }
 0x7d3   :  { %3357 = vpow2.f32 %v3053_v28  ;;  %v2146_v18 = vsel %vm5326_vm13, %v5289_v25, %v2142_v17  ;;  %v2164_v17 = vand.u32 2147483648, %v5285_v20 }
 0x7d4   :  { %v2035_v47 = vpop.permute.xlu0 %2034  ;;  %3359 = vpow2.f32 %v3052_v34  ;;  %v2186_v34 = vmul.f32 %v5294_v8, %v2185_v57 }
 0x7d5   :  { %v2078_v26 = vadd.f32 %v2035_v47, %v4427_v63  ;;  %v2165_v57 = vor.u32 1.1754944e-38, %v2164_v17 }
 0x7d6   :  { %v2187_v16 = vadd.f32 %v5294_v8, %v2186_v34 }
 0x7d7   :  { %v3051_v46 = vmul.f32 -1.442695, %v2078_v26  ;;  %v3354_v37 = vpop.eup %3353 }
 0x7d8   :  { %v5296_v45 = vpop.eup %3355  ;;  %v5302_v31 = vadd.f32 1.0, %v3354_v37  ;;  %v2147_v37 = vand.u32 2147483647, %v5276_v35  ;;  %v2192_v35 = vand.u32 2147483647, %v5282_v1 }
 0x7d9   :  { %3361 = vpow2.f32 %v3051_v46  ;;  %v3358_v60 = vpop.eup %3357  ;;  %v2154_v36 = vmul.f32 %v5296_v45, %v5285_v20  ;;  %vm2159_vm4 = vweird.f32 %v5296_v45 }
 0x7da   :  { %v3360_v40 = vpop.eup %3359  ;;  %3363 = vrcp.f32 %v5298_v3  ;;  %v5306_v51 = vadd.f32 1.0, %v3358_v60  ;;  %vm2148_vm1 = vcmp.eq.f32.partialorder %v2147_v37, 8.507059e+37  ;;  %vm2193_vm6 = vcmp.eq.f32.partialorder %v2192_v35, 8.507059e+37  ;;  %vm5384_vm5 = vmor %vm2158_vm7, %vm2159_vm4 }
 0x7db   :  { %v5311_v12 = vadd.f32 1.0, %v3360_v40  ;;  %3365 = vrcp.f32 %v5302_v31  ;;  %v2155_v28 = vsub.f32 1.0, %v2154_v36  ;;  %v2162_v36 = vand.u32 2147483647, %v5285_v20 }
 0x7dc   :  { %3367 = vrcp.f32 %v5306_v51  ;;  %vm2233_vm11 = vweird.f32 %v5306_v51  ;;  %vm2248_vm15 = vweird.f32 %v5302_v31 }
 0x7dd   :  { %3369 = vrcp.f32 %v5311_v12  ;;  %v2156_v40 = vmul.f32 %v5296_v45, %v2155_v28  ;;  %vm5375_vm8 = vcmp.eq.f32.partialorder %v2162_v36, 8.507059e+37 }
 0x7df   :  { %v3362_v2 = vpop.eup %3361  ;;  %v2157_v28 = vadd.f32 %v5296_v45, %v2156_v40 }
 0x7e0   :  { %v5316_v47 = vadd.f32 1.0, %v3362_v2  ;;  %v5322_v46 = vpop.eup %3363 }
 0x7e1   :  { %v2169_v60 = vmul.f32 %v5322_v46, %v5298_v3  ;;  %v2161_v36 = vsel %vm5384_vm5, %v5296_v45, %v2157_v28  ;;  %vm2174_vm10 = vweird.f32 %v5322_v46 }
 0x7e2   :  { %vm5432_vm13 = vmor %vm2173_vm9, %vm2174_vm10  ;;  %vm2203_vm10 = vweird.f32 %v5316_v47 }
 0x7ec   :  { %v2055_v13 = vpop.permute.xlu2 %2054 }
 0x7ed   :  { %v2088_v4 = vadd.f32 %v2055_v13, %v4535_v62  ;;  %v5331_v13 = vpop.eup %3365  ;;  %v2179_v62 = vand.u32 2147483648, %v5298_v3 }
 0x7ee   :  { %v2244_v25 = vmul.f32 %v5331_v13, %v5302_v31  ;;  %vm2249_vm12 = vweird.f32 %v5331_v13 }
 0x7ef   :  { %v3057_v56 = vmul.f32 -1.442695, %v2088_v4  ;;  %v5342_v4 = vpop.eup %3367  ;;  %v5404_v45 = vor.u32 1.1754944e-38, %v2179_v62  ;;  %vm5448_vm4 = vmor %vm2248_vm15, %vm2249_vm12 }
 0x7f0   :  { %v5346_v2 = vpop.eup %3369  ;;  %v2229_v10 = vmul.f32 %v5342_v4, %v5306_v51  ;;  %vm2234_vm2 = vweird.f32 %v5342_v4 }
 0x7f1   :  { %3371 = vpow2.f32 %v3057_v56  ;;  %v5358_v56 = vsel %vm2148_vm1, %v2150_v27, %v2146_v18  ;;  %vm2218_vm1 = vweird.f32 %v5311_v12  ;;  %vm5478_vm5 = vmor %vm2233_vm11, %vm2234_vm2 }
 0x7f2   :  { %3373 = vrcp.f32 %v5316_v47 }
 0x7f4   :  { %v2049_v27 = vpop.permute.xlu2 %2048 }
 0x7fc   :  { %v2053_v54 = vpop.permute.xlu0 %2052  ;;  %v2043_v21 = vpop.permute.xlu2 %2042 }
 0x7fd   :  { %v2087_v14 = vadd.f32 %v2053_v54, %v4475_v43  ;;  %v2194_v54 = vand.u32 2147483648, %v5282_v1  ;;  %v2191_v1 = vsel %vm5354_vm3, %v5294_v8, %v2187_v16  ;;  %v2214_v8 = vmul.f32 %v5346_v2, %v5311_v12 }
 0x7fe   :  { %v2245_v16 = vsub.f32 1.0, %v2244_v25  ;;  %v2230_v43 = vsub.f32 1.0, %v2229_v10  ;;  %vm2219_vm3 = vweird.f32 %v5346_v2 }
 0x7ff   :  { %v3056_v26 = vmul.f32 -1.442695, %v2087_v14  ;;  %v3372_v14 = vpop.eup %3371  ;;  %v2195_v53 = vor.u32 1.1754944e-38, %v2194_v54  ;;  %v2215_v17 = vsub.f32 1.0, %v2214_v8  ;;  %vm5488_vm9 = vmor %vm2218_vm1, %vm2219_vm3 }
 0x800   :  { %v5366_v34 = vpop.eup %3373  ;;  %v5371_v18 = vadd.f32 1.0, %v3372_v14  ;;  %v2246_v63 = vmul.f32 %v5331_v13, %v2245_v16  ;;  %v2085_v14 = vadd.f32 %v2049_v27, %v4504_v29  ;;  %v2237_v27 = vand.u32 2147483647, %v5306_v51 }
 0x801   :  { %3375 = vpow2.f32 %v3056_v26  ;;  %v2170_v26 = vsub.f32 1.0, %v2169_v60  ;;  %v5379_v54 = vsel %vm2193_vm6, %v2195_v53, %v2191_v1  ;;  %v2199_v25 = vmul.f32 %v5366_v34, %v5316_v47 }
 0x802   :  { %3377 = vrcp.f32 %v5371_v18  ;;  %v2216_v16 = vmul.f32 %v5346_v2, %v2215_v17  ;;  %v2247_v60 = vadd.f32 %v5331_v13, %v2246_v63  ;;  %vm5459_vm6 = vcmp.eq.f32.partialorder %v2237_v27, 8.507059e+37 }
 0x803   :  { %v2171_v1 = vmul.f32 %v5322_v46, %v2170_v26  ;;  %v2200_v28 = vsub.f32 1.0, %v2199_v25  ;;  %v5408_v26 = vsel %vm5375_vm8, %v2165_v57, %v2161_v36  ;;  %v2254_v25 = vand.u32 2147483648, %v5302_v31 }
 0x804   :  { %v2047_v35 = vpop.permute.xlu0 %2046  ;;  %v2082_v29 = vadd.f32 %v2043_v21, %v6085_v59  ;;  %vm2204_vm8 = vweird.f32 %v5366_v34  ;;  %v2209_v21 = vand.u32 2147483648, %v5316_v47 }
 0x805   :  { %v2172_v10 = vadd.f32 %v5322_v46, %v2171_v1  ;;  %v2084_v62 = vadd.f32 %v2047_v35, %v6081_v44  ;;  %v2201_v36 = vmul.f32 %v5366_v34, %v2200_v28  ;;  %v2251_v28 = vsel %vm5448_vm4, %v5331_v13, %v2247_v60  ;;  %vm5494_vm11 = vmor %vm2203_vm10, %vm2204_vm8 }
 0x807   :  { %v3376_v37 = vpop.eup %3375  ;;  %v2176_v1 = vsel %vm5432_vm13, %v5322_v46, %v2172_v10  ;;  %v2217_v46 = vadd.f32 %v5346_v2, %v2216_v16  ;;  %v2202_v13 = vadd.f32 %v5366_v34, %v2201_v36  ;;  %v2224_v16 = vand.u32 2147483648, %v5311_v12 }
 0x808   :  { %v5396_v53 = vadd.f32 1.0, %v3376_v37  ;;  %v2231_v37 = vmul.f32 %v5342_v4, %v2230_v43  ;;  %v2252_v43 = vand.u32 2147483647, %v5302_v31  ;;  %v5436_v35 = vpop.eup %3377  ;;  %vm2293_vm13 = vweird.f32 %v5371_v18 }
 0x809   :  { %v2225_v57 = vor.u32 1.1754944e-38, %v2224_v16  ;;  %vm2294_vm15 = vweird.f32 %v5436_v35 }
 0x80a   :  { %vm2253_vm7 = vcmp.eq.f32.partialorder %v2252_v43, 8.507059e+37  ;;  %vm5550_vm8 = vmor %vm2293_vm13, %vm2294_vm15 }
 0x80c   :  { %v2333_v31 = vpop.permute.xlu0 %2332 }
 0x80d   :  { %v2057_v40 = vpop.permute.xlu1 %2056 }
 0x80e   :  { %v2089_v20 = vadd.f32 %v2057_v40, %v4590_v9  ;;  %v2239_v9 = vand.u32 2147483648, %v5306_v51  ;;  %v2207_v51 = vand.u32 2147483647, %v5316_v47 }
 0x810   :  { %v3058_v40 = vmul.f32 -1.442695, %v2089_v20  ;;  %v5415_v8 = vor.u32 1.1754944e-38, %v2239_v9 }
 0x812   :  { %3379 = vpow2.f32 %v3058_v40 }
 0x813   :  { %3381 = vrcp.f32 %v5396_v53 }
 0x814   :  { %3383 = vtanh.f32 %v2085_v14  ;;  %v2232_v14 = vadd.f32 %v5342_v4, %v2231_v37  ;;  %v2289_v37 = vmul.f32 %v5436_v35, %v5371_v18 }
 0x815   :  { %v2051_v20 = vpop.permute.xlu1 %2050  ;;  %3385 = vtanh.f32 %v2084_v62  ;;  %v2222_v62 = vand.u32 2147483647, %v5311_v12  ;;  %v2181_v12 = vsel %vm5421_vm14, %v5404_v45, %v2176_v1  ;;  %v2210_v45 = vor.u32 1.1754944e-38, %v2209_v21 }
 0x816   :  { %v2086_v9 = vadd.f32 %v2051_v20, %v6082_v50  ;;  %vm2208_vm14 = vcmp.eq.f32.partialorder %v2207_v51, 8.507059e+37 }
 0x817   :  { %vm2223_vm12 = vcmp.eq.f32.partialorder %v2222_v62, 8.507059e+37 }
 0x818   :  { %v3380_v40 = vpop.eup %3379  ;;  %v3055_v17 = vmul.f32 -1.442695, %v2086_v9  ;;  %v2255_v9 = vor.u32 1.1754944e-38, %v2254_v25 }
 0x819   :  { %v5457_v10 = vadd.f32 1.0, %v3380_v40  ;;  %v5463_v63 = vpop.eup %3381 }
 0x81a   :  { %3387 = vpow2.f32 %v3055_v17  ;;  %v3384_v27 = vpop.eup %3383  ;;  %v2256_v60 = vsel %vm2253_vm7, %v2255_v9, %v2251_v28  ;;  %v2274_v25 = vmul.f32 %v5463_v63, %v5396_v53  ;;  %vm2279_vm3 = vweird.f32 %v5463_v63 }
 0x81b   :  { %3389 = vrcp.f32 %v5457_v10  ;;  %v2341_v40 = vmul.f32 %v2333_v31, %v2256_v60  ;;  %v2236_v31 = vsel %vm5478_vm5, %v5342_v4, %v2232_v14  ;;  %v3386_v9 = vpop.eup %3385  ;;  %v2290_v60 = vsub.f32 1.0, %v2289_v37 }
 0x81c   :  { %3391 = vtanh.f32 %v2082_v29  ;;  %v2221_v29 = vsel %vm5488_vm9, %v5346_v2, %v2217_v46  ;;  %v2345_v47 = vmul.f32 %v3384_v27, %v5379_v54  ;;  %v2275_v43 = vsub.f32 1.0, %v2274_v25  ;;  %v2327_v46 = vpop.permute.xlu0 %2326 }
 0x81d   :  { %v2045_v3 = vpop.permute.xlu1 %2044  ;;  %v2226_v37 = vsel %vm2223_vm12, %v2225_v57, %v2221_v29  ;;  %v2297_v27 = vand.u32 2147483647, %v5371_v18  ;;  %v2344_v21 = vmul.f32 %v3386_v9, %v2181_v12  ;;  %v2299_v25 = vand.u32 2147483648, %v5371_v18 }
 0x81e   :  { %v2083_v28 = vadd.f32 %v2045_v3, %v6090_v33  ;;  %v2206_v3 = vsel %vm5494_vm11, %v5366_v34, %v2202_v13  ;;  %v5512_v4 = vadd.f32 %v2345_v47, %v2341_v40  ;;  %v2241_v34 = vsel %vm5459_vm6, %v5415_v8, %v2236_v31 }
 0x81f   :  { %v2211_v54 = vsel %vm2208_vm14, %v2210_v45, %v2206_v3  ;;  %v2291_v13 = vmul.f32 %v5436_v35, %v2290_v60  ;;  %v2314_v36 = vand.u32 2147483648, %v5457_v10  ;;  %v2276_v40 = vmul.f32 %v5463_v63, %v2275_v43 }
 0x820   :  { %v3388_v59 = vpop.eup %3387  ;;  %3393 = vtanh.f32 %v2083_v28  ;;  %v2338_v20 = vmul.f32 %v2327_v46, %v2211_v54  ;;  %v2312_v31 = vand.u32 2147483647, %v5457_v10  ;;  %vm2308_vm1 = vweird.f32 %v5457_v10 }
 0x821   :  { %v3390_v1 = vpop.eup %3389  ;;  %v5514_v14 = vadd.f32 1.0, %v3388_v59  ;;  %v2329_v59 = vpop.permute.xlu2 %2328  ;;  %v2292_v29 = vadd.f32 %v5436_v35, %v2291_v13  ;;  %vm2358_vm7 = vcmask 48160   ;;  %v2284_v46 = vand.u32 2147483648, %v5396_v53 }
 0x822   :  { %v2304_v2 = vmul.f32 %v3390_v1, %v5457_v10  ;;  %v3392_v62 = vpop.eup %3391  ;;  %vm2309_vm2 = vweird.f32 %v3390_v1  ;;  %v2339_v60 = vmul.f32 %v2329_v59, %v2226_v37  ;;  %v2315_v37 = vor.u32 1.1754944e-38, %v2314_v36 }
 0x823   :  { %3395 = vrcp.f32 %v5514_v14  ;;  %v2342_v12 = vmul.f32 %v3392_v62, %v5358_v56  ;;  %vm2310_vm4 = vmor %vm2308_vm1, %vm2309_vm2  ;;  %v2277_v56 = vadd.f32 %v5463_v63, %v2276_v40  ;;  %vm2313_vm6 = vcmp.eq.f32.partialorder %v2312_v31, 8.507059e+37 }
 0x824   :  { %v2305_v16 = vsub.f32 1.0, %v2304_v2  ;;  %3397 = vtanh.f32 %v5512_v4  ;;  %vm2278_vm5 = vweird.f32 %v5396_v53  ;;  %v2296_v59 = vsel %vm5550_vm8, %v5436_v35, %v2292_v29 }
 0x825   :  { %v2331_v8 = vpop.permute.xlu1 %2330  ;;  %v5537_v45 = vadd.f32 %v2342_v12, %v2338_v20  ;;  %vm5563_vm9 = vmor %vm2278_vm5, %vm2279_vm3  ;;  %vm2298_vm11 = vcmp.eq.f32.partialorder %v2297_v27, 8.507059e+37  ;;  %v2285_v35 = vor.u32 1.1754944e-38, %v2284_v46  ;;  %vm2263_vm12 = vweird.f32 %v5514_v14 }
 0x826   :  { %v3394_v51 = vpop.eup %3393  ;;  %v2340_v17 = vmul.f32 %v2331_v8, %v2241_v34  ;;  %v2306_v28 = vmul.f32 %v3390_v1, %v2305_v16  ;;  %v2300_v16 = vor.u32 1.1754944e-38, %v2299_v25  ;;  %v2281_v8 = vsel %vm5563_vm9, %v5463_v63, %v2277_v56 }
 0x827   :  { %v2343_v9 = vmul.f32 %v3394_v51, %v5408_v26 }
 0x828   :  { %v5533_v47 = vadd.f32 %v2344_v21, %v2340_v17  ;;  %v2307_v3 = vadd.f32 %v3390_v1, %v2306_v28  ;;  %v2269_v21 = vand.u32 2147483648, %v5514_v14  ;;  %v2301_v36 = vsel %vm2298_vm11, %v2300_v16, %v2296_v59 }
 0x829   :  { %v3396_v57 = vpop.eup %3395  ;;  %v5539_v43 = vadd.f32 %v2343_v9, %v2339_v60 }
 0x82a   :  { %v2259_v26 = vmul.f32 %v3396_v57, %v5514_v14  ;;  %3399 = vtanh.f32 %v5533_v47  ;;  %v2311_v2 = vsel %vm2310_vm4, %v3390_v1, %v2307_v3  ;;  %v3398_v54 = vpop.eup %3397  ;;  %v2282_v1 = vand.u32 2147483647, %v5396_v53 }
 0x82b   :  { %3401 = vtanh.f32 %v5539_v43  ;;  %v2316_v10 = vsel %vm2313_vm6, %v2315_v37, %v2311_v2  ;;  %vm2264_vm10 = vweird.f32 %v3396_v57  ;;  %v2267_v53 = vand.u32 2147483647, %v5514_v14 }
 0x82c   :  { %v2260_v34 = vsub.f32 1.0, %v2259_v26  ;;  %v2357_v62 = vmul.f32 %v3398_v54, %v2316_v10  ;;  %3403 = vtanh.f32 %v5537_v45  ;;  %vm2283_vm14 = vcmp.eq.f32.partialorder %v2282_v1, 8.507059e+37  ;;  %vm2265_vm13 = vmor %vm2263_vm12, %vm2264_vm10  ;;  %v2806_v54 = vld [vmem:[%s5991_s14 + $0x8] sm:$0xff]  ;;  %v2808_v10 = vld [vmem:[%s5991_s14 + $0x18] sm:$0xff] }
 0x82d   :  { %v2270_v28 = vor.u32 1.1754944e-38, %v2269_v21  ;;  %v2286_v31 = vsel %vm2283_vm14, %v2285_v35, %v2281_v8  ;;  %vm2268_vm15 = vcmp.eq.f32.partialorder %v2267_v53, 8.507059e+37 }
 0x82e   :  { %2362 = vst.msk [vmem:[#allocation2 + $0x18] sm:$0xff] %vm2358_vm7, %v2357_v62  ;;  %v2261_v20 = vmul.f32 %v3396_v57, %v2260_v34 }
 0x830   :  { %v3400_v25 = vpop.eup %3399  ;;  %v2262_v40 = vadd.f32 %v3396_v57, %v2261_v20 }
 0x831   :  { %v3402_v51 = vpop.eup %3401  ;;  %v2356_v17 = vmul.f32 %v3400_v25, %v2301_v36 }
 0x832   :  { %v2266_v60 = vsel %vm2265_vm13, %v3396_v57, %v2262_v40  ;;  %v2355_v12 = vmul.f32 %v3402_v51, %v2286_v31  ;;  %v3404_v9 = vpop.eup %3403 }
 0x833   :  { %v3186_v29 = vpack.i.bf16 %v2356_v17, %v2357_v62  ;;  %2361 = vst.msk [vmem:[#allocation2 + $0x10] sm:$0xff] %vm2358_vm7, %v2356_v17  ;;  %v2271_v63 = vsel %vm2268_vm15, %v2270_v28, %v2266_v60  ;;  %v6125_v28 = vld [vmem:[#allocation12_spill] sm:$0xff] }
 0x834   :  { %v2354_v27 = vmul.f32 %v3404_v9, %v2271_v63  ;;  %2360 = vst.msk [vmem:[#allocation2 + $0x8] sm:$0xff] %vm2358_vm7, %v2355_v12 }
 0x835   :  { %3187 = vrot.lane.b32.xlu1 %v3186_v29, %s3491_s30  ;;  %v6126_v29 = vld [vmem:[#allocation4_spill] sm:$0xff] }
 0x836   :  { %v3191_v14 = vpack.i.bf16 %v2354_v27, %v2355_v12  ;;  %2359 = vst.msk [vmem:[#allocation2] sm:$0xff] %vm2358_vm7, %v2354_v27 }
 0x838   :  { %3192 = vrot.lane.b32.xlu2 %v3191_v14, %s3491_s30 }
 0x892   :  { %v3193_v57 = vpop.permute.xlu2 %3192 }
 0x893   :  { %v3194_v26 = vunpack.i.l.bf16 %v3193_v57  ;;  %v3195_v2 = vunpack.i.h.bf16 %v3193_v57 }
 0x8a7   :  { %v3188_v3 = vpop.permute.xlu1 %3187 }
 0x8a8   :  { %v3189_v37 = vunpack.i.l.bf16 %v3188_v3  ;;  %v3190_v56 = vunpack.i.h.bf16 %v3188_v3 }
 0x8aa   :  { %2391 = vmatpush.msrb.mxu2 %v3189_v37 }
 0x8ac   :  { %2392 = vmatpush.msrb.mxu2 %v3190_v56 }
 0x8ae   :  { %2393 = vmatpush.msrb.mxu2 %v3194_v26 }
 0x8b0   :  { %2394 = vmatpush.msrb.mxu2 %v3195_v2 }
 0x8b1   :  { %3059 = vmatmul.msk.f32.vlgmr.msrb.gmra.mxu2 %vm1124_vm0, %v5140_v11 }
 0x8b9   :  { %3060 = vmatmul.msk.f32.gmra.mxu2 %vm1124_vm0, %v5147_v0 }
 0x8c1   :  { %3061 = vmatmul.msk.f32.gmra.mxu2 %vm1124_vm0, %v5154_v52 }
 0x8c9   :  { %3062 = vmatmul.msk.f32.gmra.mxu2 %vm1124_vm0, %v5161_v5 }
 0x8d1   :  { %3063 = vmatmul.msk.f32.gmra.mxu2 %vm1124_vm0, %v5168_v41 }
 0x8d9   :  { %3064 = vmatmul.msk.f32.gmra.mxu2 %vm1124_vm0, %v5175_v55 }
 0x8e1   :  { %3065 = vmatmul.msk.f32.gmra.mxu2 %vm1124_vm0, %v5182_v49 }
 0x8e9   :  { %3066 = vmatmul.msk.f32.gmra.mxu2 %vm1124_vm0, %v5189_v6 }
 0x8f1   :  { %3067 = vmatmul.msk.f32.gmra.mxu2 %vm1124_vm0, %v5196_v32 }
 0x8f9   :  { %3068 = vmatmul.msk.f32.gmra.mxu2 %vm1124_vm0, %v5203_v38 }
 0x901   :  { %3069 = vmatmul.msk.f32.gmra.mxu2 %vm1124_vm0, %v5210_v48 }
 0x909   :  { %3070 = vmatmul.msk.f32.gmra.mxu2 %vm1124_vm0, %v5217_v30 }
 0x911   :  { %3071 = vmatmul.msk.f32.gmra.mxu2 %vm1124_vm0, %v5224_v24 }
 0x919   :  { %3072 = vmatmul.msk.f32.gmra.mxu2 %vm1124_vm0, %v5231_v58 }
 0x921   :  { %3073 = vmatmul.msk.f32.gmra.mxu2 %vm1124_vm0, %v5238_v19 }
 0x929   :  { %3074 = vmatmul.msk.f32.gmra.mxu2 %vm1124_vm0, %v5245_v61 }
 0x934   :  { %v2396_v11 = vpop.f32.mrf.mxu2 }
 0x935   :  { %2460 = vrot.lane.b32.xlu0 %v2396_v11, %s3509_s12 }
 0x93c   :  { %v2399_v0 = vpop.f32.mrf.mxu2 }
 0x93d   :  { %2462 = vrot.lane.b32.xlu1 %v2399_v0, %s3509_s12 }
 0x944   :  { %v2402_v52 = vpop.f32.mrf.mxu2 }
 0x945   :  { %2464 = vrot.lane.b32.xlu2 %v2402_v52, %s3509_s12 }
 0x94c   :  { %v2405_v5 = vpop.f32.mrf.mxu2 }
 0x94d   :  { %2466 = vrot.lane.b32.xlu0 %v2405_v5, %s3509_s12 }
 0x954   :  { %v2408_v41 = vpop.f32.mrf.mxu2 }
 0x95c   :  { %v2411_v55 = vpop.f32.mrf.mxu2 }
 0x95d   :  { %2470 = vrot.lane.b32.xlu2 %v2411_v55, %s3509_s12 }
 0x964   :  { %v2414_v49 = vpop.f32.mrf.mxu2 }
 0x965   :  { %2472 = vrot.lane.b32.xlu0 %v2414_v49, %s3509_s12 }
 0x96c   :  { %v2417_v6 = vpop.f32.mrf.mxu2 }
 0x96d   :  { %2474 = vrot.lane.b32.xlu1 %v2417_v6, %s3509_s12 }
 0x974   :  { %v2420_v32 = vpop.f32.mrf.mxu2 }
 0x975   :  { %2468 = vrot.lane.b32.xlu1 %v2408_v41, %s3509_s12 }
 0x97c   :  { %v2423_v38 = vpop.f32.mrf.mxu2 }
 0x984   :  { %v2426_v48 = vpop.f32.mrf.mxu2 }
 0x98c   :  { %v2429_v30 = vpop.f32.mrf.mxu2 }
 0x994   :  { %v2432_v24 = vpop.f32.mrf.mxu2 }
 0x99c   :  { %v2435_v58 = vpop.f32.mrf.mxu2 }
 0x99d   :  { %2486 = vrot.lane.b32.xlu1 %v2435_v58, %s3509_s12 }
 0x99f   :  { %v2465_v46 = vpop.permute.xlu2 %2464 }
 0x9a0   :  { %v2510_v34 = vadd.f32 %v2465_v46, %v4405_v23 }
 0x9a4   :  { %v2438_v19 = vpop.f32.mrf.mxu2 }
 0x9a5   :  { %2480 = vrot.lane.b32.xlu1 %v2426_v48, %s3509_s12  ;;  %2488 = vrot.lane.b32.xlu0 %v2438_v19, %s3509_s12 }
 0x9a7   :  { %v2461_v13 = vpop.permute.xlu0 %2460 }
 0x9a8   :  { %v2508_v62 = vadd.f32 %v2461_v13, %v4389_v15 }
 0x9aa   :  { %v3075_v59 = vmul.f32 -1.442695, %v2508_v62 }
 0x9ac   :  { %v2441_v61 = vpop.f32.mrf.mxu2 }
 0x9ad   :  { %2766 = vrot.lane.b32.xlu1 %v5512_v4, %s3507_s10  ;;  %2482 = vrot.lane.b32.xlu0 %v2429_v30, %s3509_s12  ;;  %v2807_v4 = vld [vmem:[%s5991_s14 + $0x10] sm:$0xff] }
 0x9ae   :  { %2490 = vrot.lane.b32.xlu2 %v2441_v61, %s3509_s12 }
 0x9af   :  { %v2463_v1 = vpop.permute.xlu1 %2462 }
 0x9b0   :  { %v2509_v16 = vadd.f32 %v2463_v1, %v4396_v7 }
 0x9b2   :  { %v3076_v53 = vmul.f32 -1.442695, %v2509_v16 }
 0x9b5   :  { %2760 = vrot.lane.b32.xlu1 %v5537_v45, %s3507_s10  ;;  %2476 = vrot.lane.b32.xlu0 %v2420_v32, %s3509_s12  ;;  %v2883_v45 = vld [vmem:[%s5992_s16] sm:$0x3f] }
 0x9b6   :  { %2484 = vrot.lane.b32.xlu2 %v2432_v24, %s3509_s12  ;;  %v6127_v24 = vld [vmem:[#allocation13_spill] sm:$0xff] }
 0x9b7   :  { %v2471_v21 = vpop.permute.xlu2 %2470 }
 0x9b8   :  { %v2513_v20 = vadd.f32 %v2471_v21, %v4454_v42 }
 0x9ba   :  { %v3080_v25 = vmul.f32 -1.442695, %v2513_v20 }
 0x9bd   :  { %2816 = vperm.xlu1 %3173, %v2806_v54   ;;  %2762 = vrot.lane.b32.xlu0 %v5539_v43, %s3507_s10  ;;  %v2805_v43 = vld [vmem:[%s5991_s14] sm:$0xff] }
 0x9be   :  { %2478 = vrot.lane.b32.xlu2 %v2423_v38, %s3509_s12 }
 0x9bf   :  { %v2467_v18 = vpop.permute.xlu0 %2466 }
 0x9c0   :  { %v2511_v23 = vadd.f32 %v2467_v18, %v4412_v39 }
 0x9c2   :  { %v3078_v51 = vmul.f32 -1.442695, %v2511_v23 }
 0x9c5   :  { %2821 = vperm.xlu0 %3175, %v2807_v4  }
 0x9c6   :  { %2764 = vrot.lane.b32.xlu2 %v5533_v47, %s3507_s10  ;;  %v3077_v47 = vmul.f32 -1.442695, %v2510_v34 }
 0x9c8   :  { %3405 = vpow2.f32 %v3077_v47 }
 0x9c9   :  { %3407 = vpow2.f32 %v3075_v59 }
 0x9ca   :  { %3409 = vpow2.f32 %v3076_v53 }
 0x9cb   :  { %3411 = vpow2.f32 %v3080_v25  ;;  %v6132_v25 = vld [vmem:[#allocation9_spill] sm:$0xff] }
 0x9cd   :  { %2886 = vperm.xlu0 %3175, %v2883_v45  }
 0x9ce   :  { %2826 = vperm.xlu2 %3174, %v2808_v10   ;;  %v3406_v35 = vpop.eup %3405 }
 0x9cf   :  { %v5654_v36 = vadd.f32 1.0, %v3406_v35  ;;  %v3408_v40 = vpop.eup %3407 }
 0x9d0   :  { %v5658_v17 = vadd.f32 1.0, %v3408_v40  ;;  %v3410_v42 = vpop.eup %3409 }
 0x9d1   :  { %3413 = vrcp.f32 %v5654_v36  ;;  %v3412_v39 = vpop.eup %3411  ;;  %v5662_v9 = vadd.f32 1.0, %v3410_v42  ;;  %v2611_v19 = vand.u32 2147483647, %v5654_v36  ;;  %v2613_v61 = vand.u32 2147483648, %v5654_v36 }
 0x9d2   :  { %3415 = vpow2.f32 %v3078_v51  ;;  %v5667_v3 = vadd.f32 1.0, %v3412_v39  ;;  %vm2607_vm1 = vweird.f32 %v5654_v36  ;;  %v2581_v34 = vand.u32 2147483647, %v5658_v17 }
 0x9d3   :  { %3417 = vrcp.f32 %v5658_v17  ;;  %v2583_v13 = vand.u32 2147483648, %v5658_v17  ;;  %vm5712_vm4 = vcmp.eq.f32.partialorder %v2611_v19, 8.507059e+37  ;;  %v2614_v59 = vor.u32 1.1754944e-38, %v2613_v61  ;;  %v6143_v19 = vld [vmem:[#allocation11_spill] sm:$0xff] }
 0x9d4   :  { %v2596_v18 = vand.u32 2147483647, %v5662_v9  ;;  %vm2577_vm6 = vweird.f32 %v5658_v17  ;;  %vm5729_vm8 = vcmp.eq.f32.partialorder %v2581_v34, 8.507059e+37  ;;  %vm2592_vm5 = vweird.f32 %v5662_v9 }
 0x9d5   :  { %v2584_v40 = vor.u32 1.1754944e-38, %v2583_v13  ;;  %vm2652_vm13 = vweird.f32 %v5667_v3 }
 0x9d6   :  { %2811 = vperm.xlu2 %3174, %v2805_v43   ;;  %vm5749_vm10 = vcmp.eq.f32.partialorder %v2596_v18, 8.507059e+37 }
 0x9d7   :  { %v2473_v15 = vpop.permute.xlu0 %2472  ;;  %v5665_v27 = vpop.eup %3413 }
 0x9d8   :  { %v2514_v7 = vadd.f32 %v2473_v15, %v4484_v22  ;;  %v3416_v22 = vpop.eup %3415  ;;  %v2603_v37 = vmul.f32 %v5665_v27, %v5654_v36  ;;  %vm2608_vm2 = vweird.f32 %v5665_v27 }
 0x9d9   :  { %v5672_v56 = vpop.eup %3417  ;;  %v5675_v26 = vadd.f32 1.0, %v3416_v22  ;;  %vm5708_vm3 = vmor %vm2607_vm1, %vm2608_vm2 }
 0x9da   :  { %v3081_v12 = vmul.f32 -1.442695, %v2514_v7  ;;  %v2604_v2 = vsub.f32 1.0, %v2603_v37  ;;  %v2573_v0 = vmul.f32 %v5672_v56, %v5658_v17  ;;  %vm2578_vm7 = vweird.f32 %v5672_v56 }
 0x9db   :  { %vm5745_vm9 = vmor %vm2577_vm6, %vm2578_vm7  ;;  %v2656_v17 = vand.u32 2147483647, %v5667_v3 }
 0x9dc   :  { %3419 = vpow2.f32 %v3081_v12  ;;  %v2605_v55 = vmul.f32 %v5665_v27, %v2604_v2  ;;  %v2574_v6 = vsub.f32 1.0, %v2573_v0 }
 0x9dd   :  { %3421 = vrcp.f32 %v5662_v9  ;;  %vm5784_vm15 = vcmp.eq.f32.partialorder %v2656_v17, 8.507059e+37 }
 0x9de   :  { %v2606_v54 = vadd.f32 %v5665_v27, %v2605_v55  ;;  %v2575_v46 = vmul.f32 %v5672_v56, %v2574_v6 }
 0x9df   :  { %v2475_v8 = vpop.permute.xlu1 %2474 }
 0x9e0   :  { %v2515_v31 = vadd.f32 %v2475_v8, %v6125_v28  ;;  %v2610_v21 = vsel %vm5708_vm3, %v5665_v27, %v2606_v54  ;;  %v2576_v8 = vadd.f32 %v5672_v56, %v2575_v46  ;;  %v2598_v28 = vand.u32 2147483648, %v5662_v9 }
 0x9e1   :  { %v5737_v42 = vsel %vm5712_vm4, %v2614_v59, %v2610_v21  ;;  %v2626_v54 = vand.u32 2147483647, %v5675_v26  ;;  %vm2622_vm3 = vweird.f32 %v5675_v26 }
 0x9e2   :  { %v3082_v14 = vmul.f32 -1.442695, %v2515_v31  ;;  %v3420_v11 = vpop.eup %3419  ;;  %v2580_v22 = vsel %vm5745_vm9, %v5672_v56, %v2576_v8  ;;  %v2599_v0 = vor.u32 1.1754944e-38, %v2598_v28 }
 0x9e3   :  { %v5679_v52 = vpop.eup %3421  ;;  %v5682_v41 = vadd.f32 1.0, %v3420_v11  ;;  %vm5820_vm4 = vcmp.eq.f32.partialorder %v2626_v54, 8.507059e+37 }
 0x9e4   :  { %3423 = vpow2.f32 %v3082_v14  ;;  %v2588_v38 = vmul.f32 %v5679_v52, %v5662_v9  ;;  %vm2593_vm11 = vweird.f32 %v5679_v52 }
 0x9e5   :  { %3425 = vrcp.f32 %v5667_v3  ;;  %vm5779_vm14 = vmor %vm2592_vm5, %vm2593_vm11  ;;  %vm2667_vm7 = vweird.f32 %v5682_v41 }
 0x9e6   :  { %v2589_v47 = vsub.f32 1.0, %v2588_v38 }
 0x9e7   :  { %v2469_v60 = vpop.permute.xlu1 %2468 }
 0x9e8   :  { %v2512_v63 = vadd.f32 %v2469_v60, %v6126_v29  ;;  %v2590_v51 = vmul.f32 %v5679_v52, %v2589_v47 }
 0x9ea   :  { %v3079_v57 = vmul.f32 -1.442695, %v2512_v63  ;;  %v3424_v5 = vpop.eup %3423 }
 0x9eb   :  { %v5685_v49 = vpop.eup %3425  ;;  %v5689_v48 = vadd.f32 1.0, %v3424_v5  ;;  %v2658_v5 = vand.u32 2147483648, %v5667_v3 }
 0x9ec   :  { %3427 = vpow2.f32 %v3079_v57  ;;  %v2648_v4 = vmul.f32 %v5685_v49, %v5667_v3  ;;  %v2591_v57 = vadd.f32 %v5679_v52, %v2590_v51  ;;  %vm2653_vm12 = vweird.f32 %v5685_v49 }
 0x9ed   :  { %3429 = vrcp.f32 %v5675_v26  ;;  %v2628_v3 = vand.u32 2147483648, %v5675_v26  ;;  %vm5799_vm2 = vmor %vm2652_vm13, %vm2653_vm12  ;;  %v2659_v13 = vor.u32 1.1754944e-38, %v2658_v5  ;;  %v2671_v51 = vand.u32 2147483647, %v5682_v41 }
 0x9ee   :  { %3431 = vrcp.f32 %v5682_v41  ;;  %v2649_v20 = vsub.f32 1.0, %v2648_v4  ;;  %v2595_v9 = vsel %vm5779_vm14, %v5679_v52, %v2591_v57  ;;  %vm2682_vm11 = vweird.f32 %v5689_v48 }
 0x9ef   :  { %3433 = vrcp.f32 %v5689_v48  ;;  %v5814_v18 = vsel %vm5749_vm10, %v2599_v0, %v2595_v9  ;;  %vm5858_vm10 = vcmp.eq.f32.partialorder %v2671_v51, 8.507059e+37 }
 0x9f0   :  { %v2650_v29 = vmul.f32 %v5685_v49, %v2649_v20 }
 0x9f2   :  { %v3428_v32 = vpop.eup %3427  ;;  %v2651_v55 = vadd.f32 %v5685_v49, %v2650_v29 }
 0x9f3   :  { %v5699_v45 = vpop.eup %3429  ;;  %v5701_v10 = vadd.f32 1.0, %v3428_v32 }
 0x9f4   :  { %v2618_v16 = vmul.f32 %v5699_v45, %v5675_v26  ;;  %v5726_v35 = vpop.eup %3431  ;;  %vm2623_vm1 = vweird.f32 %v5699_v45 }
 0x9f5   :  { %v5741_v31 = vpop.eup %3433  ;;  %v2663_v14 = vmul.f32 %v5726_v35, %v5682_v41  ;;  %vm5825_vm6 = vmor %vm2622_vm3, %vm2623_vm1  ;;  %v2643_v5 = vand.u32 2147483648, %v5701_v10  ;;  %v2641_v54 = vand.u32 2147483647, %v5701_v10 }
 0x9f6   :  { %v2619_v60 = vsub.f32 1.0, %v2618_v16  ;;  %v2678_v11 = vmul.f32 %v5741_v31, %v5689_v48  ;;  %vm2683_vm5 = vweird.f32 %v5741_v31 }
 0x9f7   :  { %v2664_v38 = vsub.f32 1.0, %v2663_v14  ;;  %vm5873_vm12 = vmor %vm2682_vm11, %vm2683_vm5  ;;  %vm2642_vm3 = vcmp.eq.f32.partialorder %v2641_v54, 8.507059e+37 }
 0x9f8   :  { %v2620_v56 = vmul.f32 %v5699_v45, %v2619_v60  ;;  %v2679_v46 = vsub.f32 1.0, %v2678_v11 }
 0x9f9   :  { %v2665_v21 = vmul.f32 %v5726_v35, %v2664_v38 }
 0x9fa   :  { %v2621_v59 = vadd.f32 %v5699_v45, %v2620_v56 }
 0x9fb   :  { %v2666_v28 = vadd.f32 %v5726_v35, %v2665_v21 }
 0xa08   :  { %v2491_v30 = vpop.permute.xlu2 %2490 }
 0xa09   :  { %v2523_v58 = vadd.f32 %v2491_v30, %v6127_v24  ;;  %v5775_v30 = vsel %vm5729_vm8, %v2584_v40, %v2580_v22  ;;  %v2625_v40 = vsel %vm5825_vm6, %v5699_v45, %v2621_v59  ;;  %vm2668_vm8 = vweird.f32 %v5726_v35 }
 0xa0a   :  { %vm5854_vm9 = vmor %vm2667_vm7, %vm2668_vm8  ;;  %vm2792_vm6 = vcmask 64560  }
 0xa0b   :  { %v3086_v43 = vmul.f32 -1.442695, %v2523_v58  ;;  %v2670_v0 = vsel %vm5854_vm9, %v5726_v35, %v2666_v28 }
 0xa0d   :  { %3435 = vpow2.f32 %v3086_v43 }
 0xa0e   :  { %3437 = vrcp.f32 %v5701_v10 }
 0xa0f   :  { %v2487_v53 = vpop.permute.xlu1 %2486 }
 0xa10   :  { %v2521_v23 = vadd.f32 %v2487_v53, %v6132_v25  ;;  %v2485_v36 = vpop.permute.xlu2 %2484  ;;  %v2680_v25 = vmul.f32 %v5741_v31, %v2679_v46 }
 0xa11   :  { %v2520_v7 = vadd.f32 %v2485_v36, %v6082_v50  ;;  %v2673_v50 = vand.u32 2147483648, %v5682_v41 }
 0xa12   :  { %v3084_v12 = vmul.f32 -1.442695, %v2521_v23  ;;  %v2629_v23 = vor.u32 1.1754944e-38, %v2628_v3  ;;  %v2681_v45 = vadd.f32 %v5741_v31, %v2680_v25 }
 0xa13   :  { %v3436_v63 = vpop.eup %3435  ;;  %v3083_v27 = vmul.f32 -1.442695, %v2520_v7 }
 0xa14   :  { %v5760_v37 = vadd.f32 1.0, %v3436_v63  ;;  %3439 = vpow2.f32 %v3084_v12  ;;  %v5764_v2 = vpop.eup %3437  ;;  %v6150_v12 = vld [vmem:[#allocation10_spill] sm:$0xff]  ;;  %v2686_v63 = vand.u32 2147483647, %v5689_v48  ;;  %v2630_v17 = vsel %vm5820_vm4, %v2629_v23, %v2625_v40 }
 0xa15   :  { %3441 = vpow2.f32 %v3083_v27  ;;  %v2633_v4 = vmul.f32 %v5764_v2, %v5701_v10  ;;  %v2688_v27 = vand.u32 2147483648, %v5689_v48  ;;  %vm2638_vm14 = vweird.f32 %v5764_v2 }
 0xa16   :  { %3443 = vrcp.f32 %v5760_v37  ;;  %v2685_v35 = vsel %vm5873_vm12, %v5741_v31, %v2681_v45  ;;  %vm2687_vm13 = vcmp.eq.f32.partialorder %v2686_v63, 8.507059e+37  ;;  %v2644_v31 = vor.u32 1.1754944e-38, %v2643_v5 }
 0xa17   :  { %v2481_v6 = vpop.permute.xlu1 %2480  ;;  %v2489_v32 = vpop.permute.xlu0 %2488  ;;  %v2689_v58 = vor.u32 1.1754944e-38, %v2688_v27  ;;  %v2748_v59 = vand.u32 2147483648, %v5760_v37  ;;  %vm2742_vm4 = vweird.f32 %v5760_v37 }
 0xa18   :  { %v2522_v61 = vadd.f32 %v2489_v32, %v6143_v19  ;;  %v2518_v43 = vadd.f32 %v2481_v6, %v6081_v44  ;;  %v2479_v1 = vpop.permute.xlu2 %2478  ;;  %v2655_v44 = vsel %vm5799_vm2, %v5685_v49, %v2651_v55  ;;  %v2634_v49 = vsub.f32 1.0, %v2633_v4 }
 0xa19   :  { %v5831_v36 = vsel %vm5784_vm15, %v2659_v13, %v2655_v44  ;;  %v2517_v60 = vadd.f32 %v2479_v1, %v6090_v33  ;;  %v2674_v32 = vor.u32 1.1754944e-38, %v2673_v50  ;;  %vm2637_vm15 = vweird.f32 %v5701_v10 }
 0xa1a   :  { %v3440_v47 = vpop.eup %3439  ;;  %v3085_v62 = vmul.f32 -1.442695, %v2522_v61  ;;  %v2635_v29 = vmul.f32 %v5764_v2, %v2634_v49  ;;  %vm5893_vm2 = vmor %vm2637_vm15, %vm2638_vm14  ;;  %v2749_v28 = vor.u32 1.1754944e-38, %v2748_v59 }
 0xa1b   :  { %v3442_v52 = vpop.eup %3441  ;;  %v5808_v16 = vadd.f32 1.0, %v3440_v47  ;;  %v2675_v61 = vsel %vm5858_vm10, %v2674_v32, %v2670_v0  ;;  %v2690_v47 = vsel %vm2687_vm13, %v2689_v58, %v2685_v35 }
 0xa1c   :  { %v5816_v20 = vpop.eup %3443  ;;  %v5818_v53 = vadd.f32 1.0, %v3442_v52  ;;  %3445 = vpow2.f32 %v3085_v62  ;;  %v2636_v48 = vadd.f32 %v5764_v2, %v2635_v29  ;;  %v6159_v62 = vld [vmem:[#allocation5_spill] sm:$0xff] }
 0xa1d   :  { %3447 = vtanh.f32 %v2518_v43  ;;  %v2738_v15 = vmul.f32 %v5816_v20, %v5760_v37  ;;  %vm2743_vm1 = vweird.f32 %v5816_v20  ;;  %vm2712_vm5 = vweird.f32 %v5808_v16 }
 0xa1e   :  { %3449 = vrcp.f32 %v5808_v16  ;;  %v2640_v10 = vsel %vm5893_vm2, %v5764_v2, %v2636_v48  ;;  %vm5909_vm7 = vmor %vm2742_vm4, %vm2743_vm1  ;;  %v2716_v58 = vand.u32 2147483647, %v5808_v16  ;;  %vm2697_vm15 = vweird.f32 %v5818_v53 }
 0xa1f   :  { %3451 = vrcp.f32 %v5818_v53  ;;  %v2483_v7 = vpop.permute.xlu0 %2482  ;;  %v2739_v22 = vsub.f32 1.0, %v2738_v15  ;;  %v2767_v6 = vpop.permute.xlu1 %2766  ;;  %v2645_v2 = vsel %vm2642_vm3, %v2644_v31, %v2640_v10  ;;  %v2801_v10 = vld [vmem:[%s5993_s13] sm:$0xff] }
 0xa20   :  { %v2519_v39 = vadd.f32 %v2483_v7, %v6150_v12  ;;  %v2765_v38 = vpop.permute.xlu2 %2764  ;;  %v2775_v44 = vmul.f32 %v2767_v6, %v2690_v47  ;;  %vm2717_vm3 = vcmp.eq.f32.partialorder %v2716_v58, 8.507059e+37 }
 0xa21   :  { %v2740_v19 = vmul.f32 %v5816_v20, %v2739_v22  ;;  %v2774_v43 = vmul.f32 %v2765_v38, %v2675_v61 }
 0xa22   :  { %v3446_v14 = vpop.eup %3445  ;;  %3453 = vtanh.f32 %v2519_v39 }
 0xa23   :  { %v3448_v57 = vpop.eup %3447  ;;  %v5862_v11 = vadd.f32 1.0, %v3446_v14  ;;  %3455 = vtanh.f32 %v2517_v60  ;;  %v2741_v8 = vadd.f32 %v5816_v20, %v2740_v19  ;;  %v2718_v60 = vand.u32 2147483648, %v5808_v16 }
 0xa24   :  { %v5869_v56 = vpop.eup %3449  ;;  %v2778_v9 = vmul.f32 %v3448_v57, %v5737_v42  ;;  %v2746_v42 = vand.u32 2147483647, %v5760_v37  ;;  %v2701_v19 = vand.u32 2147483647, %v5818_v53 }
 0xa25   :  { %v5879_v24 = vpop.eup %3451  ;;  %3457 = vrcp.f32 %v5862_v11  ;;  %v2708_v4 = vmul.f32 %v5869_v56, %v5808_v16  ;;  %v2745_v37 = vsel %vm5909_vm7, %v5816_v20, %v2741_v8  ;;  %v2733_v45 = vand.u32 2147483648, %v5862_v11 }
 0xa26   :  { %v2693_v13 = vmul.f32 %v5879_v24, %v5818_v53  ;;  %v2782_v23 = vadd.f32 %v2778_v9, %v2774_v43  ;;  %vm5913_vm8 = vcmp.eq.f32.partialorder %v2746_v42, 8.507059e+37  ;;  %v2731_v63 = vand.u32 2147483647, %v5862_v11  ;;  %v2804_v42 = vld [vmem:[%s5993_s13 + $0x18] sm:$0xff] }
 0xa27   :  { %v2477_v3 = vpop.permute.xlu0 %2476  ;;  %v2709_v25 = vsub.f32 1.0, %v2708_v4  ;;  %v2761_v39 = vpop.permute.xlu1 %2760  ;;  %vm2698_vm10 = vweird.f32 %v5879_v24  ;;  %vm2713_vm11 = vweird.f32 %v5869_v56  ;;  %vm2727_vm12 = vweird.f32 %v5862_v11 }
 0xa28   :  { %v3454_v34 = vpop.eup %3453  ;;  %v2516_v1 = vadd.f32 %v2477_v3, %v6159_v62  ;;  %v2694_v15 = vsub.f32 1.0, %v2693_v13  ;;  %v2772_v33 = vmul.f32 %v2761_v39, %v2645_v2  ;;  %v2750_v41 = vsel %vm5913_vm8, %v2749_v28, %v2745_v37  ;;  %vm2714_vm2 = vmor %vm2712_vm5, %vm2713_vm11  ;;  %v2802_v62 = vld [vmem:[%s5993_s13 + $0x8] sm:$0xff] }
 0xa29   :  { %v2779_v52 = vmul.f32 %v3454_v34, %v2630_v17  ;;  %v3456_v21 = vpop.eup %3455  ;;  %v2710_v29 = vmul.f32 %v5869_v56, %v2709_v25  ;;  %vm2732_vm13 = vcmp.eq.f32.partialorder %v2731_v63, 8.507059e+37  ;;  %v2734_v55 = vor.u32 1.1754944e-38, %v2733_v45  ;;  %vm2699_vm1 = vmor %vm2697_vm15, %vm2698_vm10 }
 0xa2a   :  { %3459 = vtanh.f32 %v2516_v1  ;;  %v2777_v50 = vmul.f32 %v3456_v21, %v5814_v18  ;;  %v2695_v22 = vmul.f32 %v5879_v24, %v2694_v15  ;;  %v2719_v9 = vor.u32 1.1754944e-38, %v2718_v60  ;;  %v2803_v1 = vld [vmem:[%s5993_s13 + $0x10] sm:$0xff] }
 0xa2b   :  { %v3458_v49 = vpop.eup %3457  ;;  %v2783_v26 = vadd.f32 %v2779_v52, %v2775_v44  ;;  %vm2702_vm4 = vcmp.eq.f32.partialorder %v2701_v19, 8.507059e+37  ;;  %v2827_v52 = vpop.permute.xlu2 %2826 }
 0xa2c   :  { %v2723_v40 = vmul.f32 %v3458_v49, %v5862_v11  ;;  %vm2728_vm9 = vweird.f32 %v3458_v49  ;;  %v2696_v32 = vadd.f32 %v5879_v24, %v2695_v22  ;;  %v2703_v11 = vand.u32 2147483648, %v5818_v53 }
 0xa2d   :  { %3461 = vtanh.f32 %v2783_v26  ;;  %vm2729_vm14 = vmor %vm2727_vm12, %vm2728_vm9  ;;  %vm2912_vm9 = vcmask 62464  }
 0xa2e   :  { %v2724_v12 = vsub.f32 1.0, %v2723_v40  ;;  %3463 = vtanh.f32 %v2782_v23  ;;  %v2700_v4 = vsel %vm2699_vm1, %v5879_v24, %v2696_v32  ;;  %v2704_v43 = vor.u32 1.1754944e-38, %v2703_v11 }
 0xa2f   :  { %v2763_v27 = vpop.permute.xlu0 %2762  ;;  %v2817_v25 = vpop.permute.xlu1 %2816 }
 0xa30   :  { %v3460_v14 = vpop.eup %3459  ;;  %v2725_v17 = vmul.f32 %v3458_v49, %v2724_v12  ;;  %v2773_v20 = vmul.f32 %v2763_v27, %v5831_v36  ;;  %v2711_v36 = vadd.f32 %v5869_v56, %v2710_v29  ;;  %v2705_v3 = vsel %vm2702_vm4, %v2704_v43, %v2700_v4 }
 0xa31   :  { %v2776_v18 = vmul.f32 %v3460_v14, %v5775_v30 }
 0xa32   :  { %v2726_v57 = vadd.f32 %v3458_v49, %v2725_v17  ;;  %v2781_v0 = vadd.f32 %v2777_v50, %v2773_v20  ;;  %v2715_v54 = vsel %vm2714_vm2, %v5869_v56, %v2711_v36  ;;  %v2882_v50 = vld [vmem:[%s5994_s15] sm:$0x3f] }
 0xa33   :  { %v3462_v5 = vpop.eup %3461  ;;  %v2780_v6 = vadd.f32 %v2776_v18, %v2772_v33  ;;  %v2720_v46 = vsel %vm2717_vm3, %v2719_v9, %v2715_v54  ;;  %v2812_v15 = vpop.permute.xlu2 %2811 }
 0xa34   :  { %v2791_v38 = vmul.f32 %v3462_v5, %v2750_v41  ;;  %v2730_v30 = vsel %vm2729_vm14, %v3458_v49, %v2726_v57  ;;  %3465 = vtanh.f32 %v2781_v0  ;;  %v3464_v48 = vpop.eup %3463 }
 0xa35   :  { %v2735_v35 = vsel %vm2732_vm13, %v2734_v55, %v2730_v30  ;;  %3467 = vtanh.f32 %v2780_v6 }
 0xa36   :  { %2796 = vst.msk [vmem:[#allocation2 + $0x18] sm:$0xff] %vm2792_vm6, %v2791_v38  ;;  %v2790_v61 = vmul.f32 %v3464_v48, %v2735_v35 }
 0xa37   :  { %v2822_v8 = vpop.permute.xlu0 %2821 }
 0xa38   :  { %2795 = vst.msk [vmem:[#allocation2 + $0x10] sm:$0xff] %vm2792_vm6, %v2790_v61 }
 0xa3a   :  { %v3466_v53 = vpop.eup %3465 }
 0xa3b   :  { %v3468_v31 = vpop.eup %3467  ;;  %v2789_v34 = vmul.f32 %v3466_v53, %v2720_v46 }
 0xa3c   :  { %v2788_v16 = vmul.f32 %v3468_v31, %v2705_v3 }
 0xa3d   :  { %2794 = vst.msk [vmem:[#allocation2 + $0x8] sm:$0xff] %vm2792_vm6, %v2789_v34  ;;  %v2800_v13 = vld [vmem:[#allocation2 + $0x18] sm:$0xff] }
 0xa3e   :  { %2793 = vst.msk [vmem:[#allocation2] sm:$0xff] %vm2792_vm6, %v2788_v16  ;;  %2853 = vmatpush.msra.mxu3 %v2800_v13 }
 0xa3f   :  { %v2799_v56 = vld [vmem:[#allocation2 + $0x10] sm:$0xff]  ;;  %v2887_v45 = vpop.permute.xlu0 %2886 }
 0xa40   :  { %2854 = vmatpush.msra.mxu3 %v2799_v56 }
 0xa44   :  { %v2798_v24 = vld [vmem:[#allocation2 + $0x8] sm:$0xff] }
 0xa45   :  { %2855 = vmatpush.msra.mxu3 %v2798_v24  ;;  %v2797_v47 = vld [vmem:[#allocation2] sm:$0xff] }
 0xa47   :  { %2856 = vmatpush.msra.mxu3 %v2797_v47 }
 0xa48   :  { %3087 = vmatmul.msk.f32.vlgmr.msra.gmra.mxu3 %vm1124_vm0, %v2801_v10 }
 0xa50   :  { %3088 = vmatmul.msk.f32.gmra.mxu3 %vm1124_vm0, %v2802_v62 }
 0xa58   :  { %3089 = vmatmul.msk.f32.gmra.mxu3 %vm1124_vm0, %v2803_v1 }
 0xa60   :  { %3090 = vmatmul.msk.f32.gmra.mxu3 %vm1124_vm0, %v2804_v42 }
 0xacb   :  { %v2858_v59 = vpop.f32.mrf.mxu3 }
 0xacc   :  { %v2859_v40 = vadd.f32 %v2858_v59, %v2812_v15 }
 0xace   :  { %v2874_v60 = vmul.f32 0.05, %v2859_v40  ;;  %vm2870_vm5 = vcmp.gt.f32.partialorder %v2859_v40, 0.0 }
 0xad0   :  { %v2878_v29 = vsel %vm2870_vm5, %v2859_v40, %v2874_v60 }
 0xad3   :  { %v2861_v44 = vpop.f32.mrf.mxu3 }
 0xad4   :  { %v2862_v23 = vadd.f32 %v2861_v44, %v2817_v25 }
 0xad6   :  { %v2875_v28 = vmul.f32 0.05, %v2862_v23  ;;  %vm2871_vm8 = vcmp.gt.f32.partialorder %v2862_v23, 0.0 }
 0xad8   :  { %v2879_v39 = vsel %vm2871_vm8, %v2862_v23, %v2875_v28 }
 0xadb   :  { %v2864_v21 = vpop.f32.mrf.mxu3 }
 0xadc   :  { %v2865_v49 = vadd.f32 %v2864_v21, %v2822_v8 }
 0xade   :  { %v2876_v51 = vmul.f32 0.05, %v2865_v49  ;;  %vm2872_vm7 = vcmp.gt.f32.partialorder %v2865_v49, 0.0 }
 0xae0   :  { %v2880_v12 = vsel %vm2872_vm7, %v2865_v49, %v2876_v51 }
 0xae3   :  { %v2867_v26 = vpop.f32.mrf.mxu3 }
 0xae4   :  { %v2868_v2 = vadd.f32 %v2867_v26, %v2827_v52 }
 0xae6   :  { %vm2873_vm6 = vcmp.gt.f32.partialorder %v2868_v2, 0.0  ;;  %v2877_v7 = vmul.f32 0.05, %v2868_v2 }
 0xae8   :  { %v2881_v37 = vsel %vm2873_vm6, %v2868_v2, %v2877_v7 }
 0xae9   :  { %2904 = vmatpush.msra.mxu0 %v2881_v37 }
 0xaeb   :  { %2905 = vmatpush.msra.mxu0 %v2880_v12 }
 0xaed   :  { %2906 = vmatpush.msra.mxu0 %v2879_v39 }
 0xaef   :  { %2907 = vmatpush.msra.mxu0 %v2878_v29 }
 0xaf0   :  { %3091 = vmatmul.msk.f32.vlgmr.msra.gmra.mxu0 %vm1124_vm0, %v2882_v50 }
 0xb6d   :  { %v2909_v63 = vpop.f32.mrf.mxu0 }
 0xb6e   :  { %v2910_v27 = vadd.f32 %v2909_v63, %v2887_v45 }
 0xb70   :  { %v2913_v14 = vsel %vm2912_vm9, %v2910_v27, -inf }
 0xb71   :  { %v2914_v22 = vrot.slane %v2913_v14, 4 }
 0xb73   :  { %v2915_v17 = vmax.f32 %v2913_v14, %v2914_v22 }
 0xb75   :  { %v2916_v20 = vrot.slane %v2915_v17, 2 }
 0xb77   :  { %v2917_v33 = vmax.f32 %v2915_v17, %v2916_v20 }
 0xb79   :  { %v2918_v18 = vrot.slane %v2917_v33, 1 }
 0xb7b   :  { %v2919_v41 = vmax.f32 %v2917_v33, %v2918_v18 }
 0xb7d   :  { %v2920_v57 = vsub.f32 %v2910_v27, %v2919_v41 }
 0xb7f   :  { %v2921_v0 = vmul.f32 1.442695, %v2920_v57 }
 0xb81   :  { %3469 = vpow2.f32 %v2921_v0 }
 0xb87   :  { %v3470_v5 = vpop.eup %3469 }
 0xb88   :  { %v2923_v55 = vsel %vm2912_vm9, %v3470_v5, 0.0 }
 0xb89   :  { %v2924_v6 = vrot.slane %v2923_v55, 4 }
 0xb8b   :  { %v2925_v36 = vadd.f32 %v2924_v6, %v2923_v55 }
 0xb8d   :  { %v2926_v32 = vrot.slane %v2925_v36, 2 }
 0xb8f   :  { %v2927_v38 = vadd.f32 %v2926_v32, %v2925_v36 }
 0xb91   :  { %v2928_v30 = vrot.slane %v2927_v38, 1 }
 0xb93   :  { %v2929_v48 = vadd.f32 %v2928_v30, %v2927_v38 }
 0xb95   :  { %3471 = vlog2.f32 %v2929_v48 }
 0xb9b   :  { %v3472_v11 = vpop.eup %3471 }
 0xb9c   :  { %v2931_v35 = vmul.f32 0.6931472, %v3472_v11 }
 0xb9e   :  { %v2932_v58 = vadd.f32 %v2931_v35, %v2919_v41 }
 0xba0   :  { %v2933_v19 = vsub.f32 %v2910_v27, %v2932_v58 }
 0xba2   :  { %2934 = vst.msk [vmem:[%s5995_s17] sm:$0x3f] %vm2912_vm9, %v2933_v19 }

</bundles_post_ra>
